<compile_context>
chip_gen: v7x
topology: tpu7x:2x2x1
jax: 0.10.0
libtpu: 0.0.40
codegen_flags: <defaults>
</compile_context>

<pallas_src>
import jax
import jax.numpy as jnp
from jax import lax
from jax.experimental import pallas as pl
from jax.experimental.pallas import tpu as pltpu

H = W = 28
HW = H * W                   # 784 spatial positions
CIN, COUT = 3, 16
KH = KW = 3
K27 = CIN * KH * KW          # 27 im2col contraction size
FC1_IN = COUT * HW           # 12544 = 98 * 128 (lane aligned, no padding needed)
FC1_OUT = 64
FC2_OUT = 10


# --------------------------- fused forward kernel ---------------------------

def fused_kernel(p_ref, wm_ref, cb_ref, w1_ref, b1_ref, w2_ref, b2_ref,
                 o_ref, feat_ref):
    # p_ref : (B, 27, 784)   im2col patches^T (lane = spatial position)
    # wm_ref: (16, 27)       conv weight as matrix (native reshape)
    # cb_ref: (16, 1)        conv bias as a column
    # w1_ref: (64, 12544)    fc1 weight, native PyTorch row-major layout
    # b1_ref: (1, 64)  w2_ref: (10, 64)  b2_ref: (1, 10)
    # o_ref : (B, 10)        logits
    # feat_ref: VMEM scratch (B, 12544) -- exact PyTorch flatten layout
    B = p_ref.shape[0]
    for b in range(B):
        # Conv as matmul, output lane-dense over spatial: (16, 784).
        conv = jnp.dot(wm_ref[...], p_ref[b],
                       preferred_element_type=jnp.float32)
        conv = jnp.maximum(conv + cb_ref[...], 0.0)             # bias + ReLU
        # Channel-major flatten (PyTorch .view order): row c -> cols c*784...
        for c in range(COUT):
            feat_ref[b:b + 1, c * HW:(c + 1) * HW] = conv[c:c + 1, :]

    # FC1: NT matmul against the native-layout weight (like q @ k^T).
    h = lax.dot_general(feat_ref[...], w1_ref[...],
                        dimension_numbers=(((1,), (1,)), ((), ())),
                        preferred_element_type=jnp.float32)     # (B, 64)
    h = jnp.maximum(h + b1_ref[...], 0.0)                       # bias + ReLU

    # FC2: NT matmul against the native (10, 64) weight.
    o_ref[...] = lax.dot_general(h, w2_ref[...],
                                 dimension_numbers=(((1,), (1,)), ((), ())),
                                 preferred_element_type=jnp.float32
                                 ) + b2_ref[...]


# ------------------------------ parameters ----------------------------------

def init_params(key):
    ks = jax.random.split(key, 6)
    return dict(
        conv_w=jax.random.normal(ks[0], (COUT, CIN, KH, KW), jnp.float32) * 0.1,
        conv_b=jax.random.normal(ks[1], (COUT,), jnp.float32) * 0.1,
        fc1_w=jax.random.normal(ks[2], (FC1_OUT, FC1_IN), jnp.float32) * 0.01,
        fc1_b=jax.random.normal(ks[3], (FC1_OUT,), jnp.float32) * 0.01,
        fc2_w=jax.random.normal(ks[4], (FC2_OUT, FC1_OUT), jnp.float32) * 0.1,
        fc2_b=jax.random.normal(ks[5], (FC2_OUT,), jnp.float32) * 0.1,
    )


# ------------------------------- forward ------------------------------------

def _im2col_t(x):
    """x: (B,3,28,28) NCHW -> (B, 27, 784) transposed patches (cheap XLA glue)."""
    B = x.shape[0]
    xpad = jnp.pad(x, ((0, 0), (0, 0), (1, 1), (1, 1)))         # (B,3,30,30)
    taps = [xpad[:, :, dh:dh + H, dw:dw + W]
            for dh in range(KH) for dw in range(KW)]            # 9 x (B,3,28,28)
    pt = jnp.stack(taps, axis=2)                                # (B,3,9,28,28)
    return pt.reshape(B, K27, HW)                               # k = cin*9+dh*3+dw


def forward(params, x):
    B = x.shape[0]
    patches = _im2col_t(x)                                      # (B, 27, 784)
    wm = params["conv_w"].reshape(COUT, K27)                    # free reshapes
    cb = params["conv_b"].reshape(COUT, 1)
    b1 = params["fc1_b"].reshape(1, FC1_OUT)
    b2 = params["fc2_b"].reshape(1, FC2_OUT)
    return pl.pallas_call(
        fused_kernel,
        out_shape=jax.ShapeDtypeStruct((B, FC2_OUT), jnp.float32),
        grid=(1,),
        in_specs=[
            pl.BlockSpec((B, K27, HW), lambda i: (0, 0, 0)),          # patches
            pl.BlockSpec((COUT, K27), lambda i: (0, 0)),              # conv W
            pl.BlockSpec((COUT, 1), lambda i: (0, 0)),                # conv b
            pl.BlockSpec((FC1_OUT, FC1_IN), lambda i: (0, 0)),        # fc1 W (native)
            pl.BlockSpec((1, FC1_OUT), lambda i: (0, 0)),             # fc1 b
            pl.BlockSpec((FC2_OUT, FC1_OUT), lambda i: (0, 0)),       # fc2 W (native)
            pl.BlockSpec((1, FC2_OUT), lambda i: (0, 0)),             # fc2 b
        ],
        out_specs=pl.BlockSpec((B, FC2_OUT), lambda i: (0, 0)),
        scratch_shapes=[pltpu.VMEM((B, FC1_IN), jnp.float32)],
        compiler_params=pltpu.CompilerParams(
            dimension_semantics=("arbitrary",)),
    )(patches, wm, cb, params["fc1_w"], b1, params["fc2_w"], b2)


# ------------------------------ reference -----------------------------------

def reference(params, x):
    conv = lax.conv_general_dilated(
        x, params["conv_w"], window_strides=(1, 1), padding="SAME",
        dimension_numbers=("NCHW", "OIHW", "NCHW"))
    conv = jnp.maximum(conv + params["conv_b"][None, :, None, None], 0.0)
    flat = conv.reshape(x.shape[0], -1)
    h = jnp.maximum(flat @ params["fc1_w"].T + params["fc1_b"], 0.0)
    return h @ params["fc2_w"].T + params["fc2_b"]


if __name__ == "__main__":
    key = jax.random.PRNGKey(0)
    kp, kx = jax.random.split(key)
    params = init_params(kp)
    x = jax.random.normal(kx, (2, 3, 28, 28), jnp.float32)   # NCHW like PyTorch

    out = jax.jit(forward)(params, x)
    out = jax.block_until_ready(out)
    assert out.shape == (2, 10)

    ref = reference(params, x)
    assert jnp.allclose(out, ref, atol=1e-3, rtol=1e-3), "mismatch vs reference"

    print("KERNEL_OK")
</pallas_src>

<mosaic_0001>
module attributes {stable_mosaic.version = 11 : i64} {
  func.func @fused_kernel(%arg0: i32, %arg1: memref<2x27x784xf32, #tpu.memory_space<vmem>>, %arg2: memref<16x27xf32, #tpu.memory_space<vmem>>, %arg3: memref<16x1xf32, #tpu.memory_space<vmem>>, %arg4: memref<64x12544xf32, #tpu.memory_space<vmem>>, %arg5: memref<1x64xf32, #tpu.memory_space<vmem>>, %arg6: memref<10x64xf32, #tpu.memory_space<vmem>>, %arg7: memref<1x10xf32, #tpu.memory_space<vmem>>, %arg8: memref<2x10xf32, #tpu.memory_space<vmem>>, %arg9: memref<2x12544xf32, #tpu.memory_space<vmem>>) attributes {dimension_semantics = [#tpu.dimension_semantics<arbitrary>], iteration_bounds = array<i64: 1>, scalar_prefetch = 0 : i64, scratch_operands = 1 : i64, tpu.core_type = #tpu.core_type<tc>, window_params = [{pipeline_mode = #tpu.pipeline_mode<synchronous>, transform_indices = @transform_0, window_bounds = array<i64: 2, 27, 784>}, {pipeline_mode = #tpu.pipeline_mode<synchronous>, transform_indices = @transform_1, window_bounds = array<i64: 16, 27>}, {pipeline_mode = #tpu.pipeline_mode<synchronous>, transform_indices = @transform_2, window_bounds = array<i64: 16, 1>}, {pipeline_mode = #tpu.pipeline_mode<synchronous>, transform_indices = @transform_3, window_bounds = array<i64: 64, 12544>}, {pipeline_mode = #tpu.pipeline_mode<synchronous>, transform_indices = @transform_4, window_bounds = array<i64: 1, 64>}, {pipeline_mode = #tpu.pipeline_mode<synchronous>, transform_indices = @transform_5, window_bounds = array<i64: 10, 64>}, {pipeline_mode = #tpu.pipeline_mode<synchronous>, transform_indices = @transform_6, window_bounds = array<i64: 1, 10>}, {pipeline_mode = #tpu.pipeline_mode<synchronous>, transform_indices = @transform_7, window_bounds = array<i64: 2, 10>}]} {
    %c0 = arith.constant 0 : index
    %c0_0 = arith.constant 0 : index
    %0 = vector.load %arg2[%c0, %c0_0] : memref<16x27xf32, #tpu.memory_space<vmem>>, vector<16x27xf32>
    %c0_1 = arith.constant 0 : index
    %c0_2 = arith.constant 0 : index
    %c0_3 = arith.constant 0 : index
    %1 = vector.load %arg1[%c0_1, %c0_2, %c0_3] : memref<2x27x784xf32, #tpu.memory_space<vmem>>, vector<1x27x784xf32>
    %2 = vector.shape_cast %1 : vector<1x27x784xf32> to vector<27x784xf32>
    %cst = arith.constant dense<0.000000e+00> : vector<16x784xf32>
    %3 = tpu.matmul %0, %2, %cst {dimension_numbers = #tpu.dot_dimension_numbers<[1], [0], [0], [1], [0, 0, 1, 1], [], []>} : vector<16x27xf32>, vector<27x784xf32>, vector<16x784xf32> -> vector<16x784xf32>
    %c0_4 = arith.constant 0 : index
    %c0_5 = arith.constant 0 : index
    %4 = vector.load %arg3[%c0_4, %c0_5] : memref<16x1xf32, #tpu.memory_space<vmem>>, vector<16x1xf32>
    %5 = vector.broadcast %4 : vector<16x1xf32> to vector<16x784xf32>
    %6 = arith.addf %3, %5 : vector<16x784xf32>
    %cst_6 = arith.constant 0.000000e+00 : f32
    %7 = vector.broadcast %cst_6 : f32 to vector<16x784xf32>
    %8 = arith.maximumf %6, %7 : vector<16x784xf32>
    %9 = vector.extract_strided_slice %8 {offsets = [0, 0], sizes = [1, 784], strides = [1, 1]} : vector<16x784xf32> to vector<1x784xf32>
    %c0_7 = arith.constant 0 : index
    %c0_8 = arith.constant 0 : index
    %10 = vector.load %arg9[%c0_7, %c0_8] : memref<2x12544xf32, #tpu.memory_space<vmem>>, vector<1x784xf32>
    tpu.vector_store %arg9[%c0_7, %c0_8], %9 {strides = array<i32>} : memref<2x12544xf32, #tpu.memory_space<vmem>>, vector<1x784xf32>,
    %11 = vector.extract_strided_slice %8 {offsets = [1, 0], sizes = [1, 784], strides = [1, 1]} : vector<16x784xf32> to vector<1x784xf32>
    %c0_9 = arith.constant 0 : index
    %c784 = arith.constant 784 : index
    %12 = vector.load %arg9[%c0_9, %c784] : memref<2x12544xf32, #tpu.memory_space<vmem>>, vector<1x784xf32>
    tpu.vector_store %arg9[%c0_9, %c784], %11 {strides = array<i32>} : memref<2x12544xf32, #tpu.memory_space<vmem>>, vector<1x784xf32>,
    %13 = vector.extract_strided_slice %8 {offsets = [2, 0], sizes = [1, 784], strides = [1, 1]} : vector<16x784xf32> to vector<1x784xf32>
    %c0_10 = arith.constant 0 : index
    %c1568 = arith.constant 1568 : index
    %14 = vector.load %arg9[%c0_10, %c1568] : memref<2x12544xf32, #tpu.memory_space<vmem>>, vector<1x784xf32>
    tpu.vector_store %arg9[%c0_10, %c1568], %13 {strides = array<i32>} : memref<2x12544xf32, #tpu.memory_space<vmem>>, vector<1x784xf32>,
    %15 = vector.extract_strided_slice %8 {offsets = [3, 0], sizes = [1, 784], strides = [1, 1]} : vector<16x784xf32> to vector<1x784xf32>
    %c0_11 = arith.constant 0 : index
    %c2352 = arith.constant 2352 : index
    %16 = vector.load %arg9[%c0_11, %c2352] : memref<2x12544xf32, #tpu.memory_space<vmem>>, vector<1x784xf32>
    tpu.vector_store %arg9[%c0_11, %c2352], %15 {strides = array<i32>} : memref<2x12544xf32, #tpu.memory_space<vmem>>, vector<1x784xf32>,
    %17 = vector.extract_strided_slice %8 {offsets = [4, 0], sizes = [1, 784], strides = [1, 1]} : vector<16x784xf32> to vector<1x784xf32>
    %c0_12 = arith.constant 0 : index
    %c3136 = arith.constant 3136 : index
    %18 = vector.load %arg9[%c0_12, %c3136] : memref<2x12544xf32, #tpu.memory_space<vmem>>, vector<1x784xf32>
    tpu.vector_store %arg9[%c0_12, %c3136], %17 {strides = array<i32>} : memref<2x12544xf32, #tpu.memory_space<vmem>>, vector<1x784xf32>,
    %19 = vector.extract_strided_slice %8 {offsets = [5, 0], sizes = [1, 784], strides = [1, 1]} : vector<16x784xf32> to vector<1x784xf32>
    %c0_13 = arith.constant 0 : index
    %c3920 = arith.constant 3920 : index
    %20 = vector.load %arg9[%c0_13, %c3920] : memref<2x12544xf32, #tpu.memory_space<vmem>>, vector<1x784xf32>
    tpu.vector_store %arg9[%c0_13, %c3920], %19 {strides = array<i32>} : memref<2x12544xf32, #tpu.memory_space<vmem>>, vector<1x784xf32>,
    %21 = vector.extract_strided_slice %8 {offsets = [6, 0], sizes = [1, 784], strides = [1, 1]} : vector<16x784xf32> to vector<1x784xf32>
    %c0_14 = arith.constant 0 : index
    %c4704 = arith.constant 4704 : index
    %22 = vector.load %arg9[%c0_14, %c4704] : memref<2x12544xf32, #tpu.memory_space<vmem>>, vector<1x784xf32>
    tpu.vector_store %arg9[%c0_14, %c4704], %21 {strides = array<i32>} : memref<2x12544xf32, #tpu.memory_space<vmem>>, vector<1x784xf32>,
    %23 = vector.extract_strided_slice %8 {offsets = [7, 0], sizes = [1, 784], strides = [1, 1]} : vector<16x784xf32> to vector<1x784xf32>
    %c0_15 = arith.constant 0 : index
    %c5488 = arith.constant 5488 : index
    %24 = vector.load %arg9[%c0_15, %c5488] : memref<2x12544xf32, #tpu.memory_space<vmem>>, vector<1x784xf32>
    tpu.vector_store %arg9[%c0_15, %c5488], %23 {strides = array<i32>} : memref<2x12544xf32, #tpu.memory_space<vmem>>, vector<1x784xf32>,
    %25 = vector.extract_strided_slice %8 {offsets = [8, 0], sizes = [1, 784], strides = [1, 1]} : vector<16x784xf32> to vector<1x784xf32>
    %c0_16 = arith.constant 0 : index
    %c6272 = arith.constant 6272 : index
    %26 = vector.load %arg9[%c0_16, %c6272] : memref<2x12544xf32, #tpu.memory_space<vmem>>, vector<1x784xf32>
    tpu.vector_store %arg9[%c0_16, %c6272], %25 {strides = array<i32>} : memref<2x12544xf32, #tpu.memory_space<vmem>>, vector<1x784xf32>,
    %27 = vector.extract_strided_slice %8 {offsets = [9, 0], sizes = [1, 784], strides = [1, 1]} : vector<16x784xf32> to vector<1x784xf32>
    %c0_17 = arith.constant 0 : index
    %c7056 = arith.constant 7056 : index
    %28 = vector.load %arg9[%c0_17, %c7056] : memref<2x12544xf32, #tpu.memory_space<vmem>>, vector<1x784xf32>
    tpu.vector_store %arg9[%c0_17, %c7056], %27 {strides = array<i32>} : memref<2x12544xf32, #tpu.memory_space<vmem>>, vector<1x784xf32>,
    %29 = vector.extract_strided_slice %8 {offsets = [10, 0], sizes = [1, 784], strides = [1, 1]} : vector<16x784xf32> to vector<1x784xf32>
    %c0_18 = arith.constant 0 : index
    %c7840 = arith.constant 7840 : index
    %30 = vector.load %arg9[%c0_18, %c7840] : memref<2x12544xf32, #tpu.memory_space<vmem>>, vector<1x784xf32>
    tpu.vector_store %arg9[%c0_18, %c7840], %29 {strides = array<i32>} : memref<2x12544xf32, #tpu.memory_space<vmem>>, vector<1x784xf32>,
    %31 = vector.extract_strided_slice %8 {offsets = [11, 0], sizes = [1, 784], strides = [1, 1]} : vector<16x784xf32> to vector<1x784xf32>
    %c0_19 = arith.constant 0 : index
    %c8624 = arith.constant 8624 : index
    %32 = vector.load %arg9[%c0_19, %c8624] : memref<2x12544xf32, #tpu.memory_space<vmem>>, vector<1x784xf32>
    tpu.vector_store %arg9[%c0_19, %c8624], %31 {strides = array<i32>} : memref<2x12544xf32, #tpu.memory_space<vmem>>, vector<1x784xf32>,
    %33 = vector.extract_strided_slice %8 {offsets = [12, 0], sizes = [1, 784], strides = [1, 1]} : vector<16x784xf32> to vector<1x784xf32>
    %c0_20 = arith.constant 0 : index
    %c9408 = arith.constant 9408 : index
    %34 = vector.load %arg9[%c0_20, %c9408] : memref<2x12544xf32, #tpu.memory_space<vmem>>, vector<1x784xf32>
    tpu.vector_store %arg9[%c0_20, %c9408], %33 {strides = array<i32>} : memref<2x12544xf32, #tpu.memory_space<vmem>>, vector<1x784xf32>,
    %35 = vector.extract_strided_slice %8 {offsets = [13, 0], sizes = [1, 784], strides = [1, 1]} : vector<16x784xf32> to vector<1x784xf32>
    %c0_21 = arith.constant 0 : index
    %c10192 = arith.constant 10192 : index
    %36 = vector.load %arg9[%c0_21, %c10192] : memref<2x12544xf32, #tpu.memory_space<vmem>>, vector<1x784xf32>
    tpu.vector_store %arg9[%c0_21, %c10192], %35 {strides = array<i32>} : memref<2x12544xf32, #tpu.memory_space<vmem>>, vector<1x784xf32>,
    %37 = vector.extract_strided_slice %8 {offsets = [14, 0], sizes = [1, 784], strides = [1, 1]} : vector<16x784xf32> to vector<1x784xf32>
    %c0_22 = arith.constant 0 : index
    %c10976 = arith.constant 10976 : index
    %38 = vector.load %arg9[%c0_22, %c10976] : memref<2x12544xf32, #tpu.memory_space<vmem>>, vector<1x784xf32>
    tpu.vector_store %arg9[%c0_22, %c10976], %37 {strides = array<i32>} : memref<2x12544xf32, #tpu.memory_space<vmem>>, vector<1x784xf32>,
    %39 = vector.extract_strided_slice %8 {offsets = [15, 0], sizes = [1, 784], strides = [1, 1]} : vector<16x784xf32> to vector<1x784xf32>
    %c0_23 = arith.constant 0 : index
    %c11760 = arith.constant 11760 : index
    %40 = vector.load %arg9[%c0_23, %c11760] : memref<2x12544xf32, #tpu.memory_space<vmem>>, vector<1x784xf32>
    tpu.vector_store %arg9[%c0_23, %c11760], %39 {strides = array<i32>} : memref<2x12544xf32, #tpu.memory_space<vmem>>, vector<1x784xf32>,
    %c0_24 = arith.constant 0 : index
    %c0_25 = arith.constant 0 : index
    %41 = vector.load %arg2[%c0_24, %c0_25] : memref<16x27xf32, #tpu.memory_space<vmem>>, vector<16x27xf32>
    %c1 = arith.constant 1 : index
    %c0_26 = arith.constant 0 : index
    %c0_27 = arith.constant 0 : index
    %42 = vector.load %arg1[%c1, %c0_26, %c0_27] : memref<2x27x784xf32, #tpu.memory_space<vmem>>, vector<1x27x784xf32>
    %43 = vector.shape_cast %42 : vector<1x27x784xf32> to vector<27x784xf32>
    %cst_28 = arith.constant dense<0.000000e+00> : vector<16x784xf32>
    %44 = tpu.matmul %41, %43, %cst_28 {dimension_numbers = #tpu.dot_dimension_numbers<[1], [0], [0], [1], [0, 0, 1, 1], [], []>} : vector<16x27xf32>, vector<27x784xf32>, vector<16x784xf32> -> vector<16x784xf32>
    %c0_29 = arith.constant 0 : index
    %c0_30 = arith.constant 0 : index
    %45 = vector.load %arg3[%c0_29, %c0_30] : memref<16x1xf32, #tpu.memory_space<vmem>>, vector<16x1xf32>
    %46 = vector.broadcast %45 : vector<16x1xf32> to vector<16x784xf32>
    %47 = arith.addf %44, %46 : vector<16x784xf32>
    %cst_31 = arith.constant 0.000000e+00 : f32
    %48 = vector.broadcast %cst_31 : f32 to vector<16x784xf32>
    %49 = arith.maximumf %47, %48 : vector<16x784xf32>
    %50 = vector.extract_strided_slice %49 {offsets = [0, 0], sizes = [1, 784], strides = [1, 1]} : vector<16x784xf32> to vector<1x784xf32>
    %c1_32 = arith.constant 1 : index
    %c0_33 = arith.constant 0 : index
    %51 = vector.load %arg9[%c1_32, %c0_33] : memref<2x12544xf32, #tpu.memory_space<vmem>>, vector<1x784xf32>
    tpu.vector_store %arg9[%c1_32, %c0_33], %50 {strides = array<i32>} : memref<2x12544xf32, #tpu.memory_space<vmem>>, vector<1x784xf32>,
    %52 = vector.extract_strided_slice %49 {offsets = [1, 0], sizes = [1, 784], strides = [1, 1]} : vector<16x784xf32> to vector<1x784xf32>
    %c1_34 = arith.constant 1 : index
    %c784_35 = arith.constant 784 : index
    %53 = vector.load %arg9[%c1_34, %c784_35] : memref<2x12544xf32, #tpu.memory_space<vmem>>, vector<1x784xf32>
    tpu.vector_store %arg9[%c1_34, %c784_35], %52 {strides = array<i32>} : memref<2x12544xf32, #tpu.memory_space<vmem>>, vector<1x784xf32>,
    %54 = vector.extract_strided_slice %49 {offsets = [2, 0], sizes = [1, 784], strides = [1, 1]} : vector<16x784xf32> to vector<1x784xf32>
    %c1_36 = arith.constant 1 : index
    %c1568_37 = arith.constant 1568 : index
    %55 = vector.load %arg9[%c1_36, %c1568_37] : memref<2x12544xf32, #tpu.memory_space<vmem>>, vector<1x784xf32>
    tpu.vector_store %arg9[%c1_36, %c1568_37], %54 {strides = array<i32>} : memref<2x12544xf32, #tpu.memory_space<vmem>>, vector<1x784xf32>,
    %56 = vector.extract_strided_slice %49 {offsets = [3, 0], sizes = [1, 784], strides = [1, 1]} : vector<16x784xf32> to vector<1x784xf32>
    %c1_38 = arith.constant 1 : index
    %c2352_39 = arith.constant 2352 : index
    %57 = vector.load %arg9[%c1_38, %c2352_39] : memref<2x12544xf32, #tpu.memory_space<vmem>>, vector<1x784xf32>
    tpu.vector_store %arg9[%c1_38, %c2352_39], %56 {strides = array<i32>} : memref<2x12544xf32, #tpu.memory_space<vmem>>, vector<1x784xf32>,
    %58 = vector.extract_strided_slice %49 {offsets = [4, 0], sizes = [1, 784], strides = [1, 1]} : vector<16x784xf32> to vector<1x784xf32>
    %c1_40 = arith.constant 1 : index
    %c3136_41 = arith.constant 3136 : index
    %59 = vector.load %arg9[%c1_40, %c3136_41] : memref<2x12544xf32, #tpu.memory_space<vmem>>, vector<1x784xf32>
    tpu.vector_store %arg9[%c1_40, %c3136_41], %58 {strides = array<i32>} : memref<2x12544xf32, #tpu.memory_space<vmem>>, vector<1x784xf32>,
    %60 = vector.extract_strided_slice %49 {offsets = [5, 0], sizes = [1, 784], strides = [1, 1]} : vector<16x784xf32> to vector<1x784xf32>
    %c1_42 = arith.constant 1 : index
    %c3920_43 = arith.constant 3920 : index
    %61 = vector.load %arg9[%c1_42, %c3920_43] : memref<2x12544xf32, #tpu.memory_space<vmem>>, vector<1x784xf32>
    tpu.vector_store %arg9[%c1_42, %c3920_43], %60 {strides = array<i32>} : memref<2x12544xf32, #tpu.memory_space<vmem>>, vector<1x784xf32>,
    %62 = vector.extract_strided_slice %49 {offsets = [6, 0], sizes = [1, 784], strides = [1, 1]} : vector<16x784xf32> to vector<1x784xf32>
    %c1_44 = arith.constant 1 : index
    %c4704_45 = arith.constant 4704 : index
    %63 = vector.load %arg9[%c1_44, %c4704_45] : memref<2x12544xf32, #tpu.memory_space<vmem>>, vector<1x784xf32>
    tpu.vector_store %arg9[%c1_44, %c4704_45], %62 {strides = array<i32>} : memref<2x12544xf32, #tpu.memory_space<vmem>>, vector<1x784xf32>,
    %64 = vector.extract_strided_slice %49 {offsets = [7, 0], sizes = [1, 784], strides = [1, 1]} : vector<16x784xf32> to vector<1x784xf32>
    %c1_46 = arith.constant 1 : index
    %c5488_47 = arith.constant 5488 : index
    %65 = vector.load %arg9[%c1_46, %c5488_47] : memref<2x12544xf32, #tpu.memory_space<vmem>>, vector<1x784xf32>
    tpu.vector_store %arg9[%c1_46, %c5488_47], %64 {strides = array<i32>} : memref<2x12544xf32, #tpu.memory_space<vmem>>, vector<1x784xf32>,
    %66 = vector.extract_strided_slice %49 {offsets = [8, 0], sizes = [1, 784], strides = [1, 1]} : vector<16x784xf32> to vector<1x784xf32>
    %c1_48 = arith.constant 1 : index
    %c6272_49 = arith.constant 6272 : index
    %67 = vector.load %arg9[%c1_48, %c6272_49] : memref<2x12544xf32, #tpu.memory_space<vmem>>, vector<1x784xf32>
    tpu.vector_store %arg9[%c1_48, %c6272_49], %66 {strides = array<i32>} : memref<2x12544xf32, #tpu.memory_space<vmem>>, vector<1x784xf32>,
    %68 = vector.extract_strided_slice %49 {offsets = [9, 0], sizes = [1, 784], strides = [1, 1]} : vector<16x784xf32> to vector<1x784xf32>
    %c1_50 = arith.constant 1 : index
    %c7056_51 = arith.constant 7056 : index
    %69 = vector.load %arg9[%c1_50, %c7056_51] : memref<2x12544xf32, #tpu.memory_space<vmem>>, vector<1x784xf32>
    tpu.vector_store %arg9[%c1_50, %c7056_51], %68 {strides = array<i32>} : memref<2x12544xf32, #tpu.memory_space<vmem>>, vector<1x784xf32>,
    %70 = vector.extract_strided_slice %49 {offsets = [10, 0], sizes = [1, 784], strides = [1, 1]} : vector<16x784xf32> to vector<1x784xf32>
    %c1_52 = arith.constant 1 : index
    %c7840_53 = arith.constant 7840 : index
    %71 = vector.load %arg9[%c1_52, %c7840_53] : memref<2x12544xf32, #tpu.memory_space<vmem>>, vector<1x784xf32>
    tpu.vector_store %arg9[%c1_52, %c7840_53], %70 {strides = array<i32>} : memref<2x12544xf32, #tpu.memory_space<vmem>>, vector<1x784xf32>,
    %72 = vector.extract_strided_slice %49 {offsets = [11, 0], sizes = [1, 784], strides = [1, 1]} : vector<16x784xf32> to vector<1x784xf32>
    %c1_54 = arith.constant 1 : index
    %c8624_55 = arith.constant 8624 : index
    %73 = vector.load %arg9[%c1_54, %c8624_55] : memref<2x12544xf32, #tpu.memory_space<vmem>>, vector<1x784xf32>
    tpu.vector_store %arg9[%c1_54, %c8624_55], %72 {strides = array<i32>} : memref<2x12544xf32, #tpu.memory_space<vmem>>, vector<1x784xf32>,
    %74 = vector.extract_strided_slice %49 {offsets = [12, 0], sizes = [1, 784], strides = [1, 1]} : vector<16x784xf32> to vector<1x784xf32>
    %c1_56 = arith.constant 1 : index
    %c9408_57 = arith.constant 9408 : index
    %75 = vector.load %arg9[%c1_56, %c9408_57] : memref<2x12544xf32, #tpu.memory_space<vmem>>, vector<1x784xf32>
    tpu.vector_store %arg9[%c1_56, %c9408_57], %74 {strides = array<i32>} : memref<2x12544xf32, #tpu.memory_space<vmem>>, vector<1x784xf32>,
    %76 = vector.extract_strided_slice %49 {offsets = [13, 0], sizes = [1, 784], strides = [1, 1]} : vector<16x784xf32> to vector<1x784xf32>
    %c1_58 = arith.constant 1 : index
    %c10192_59 = arith.constant 10192 : index
    %77 = vector.load %arg9[%c1_58, %c10192_59] : memref<2x12544xf32, #tpu.memory_space<vmem>>, vector<1x784xf32>
    tpu.vector_store %arg9[%c1_58, %c10192_59], %76 {strides = array<i32>} : memref<2x12544xf32, #tpu.memory_space<vmem>>, vector<1x784xf32>,
    %78 = vector.extract_strided_slice %49 {offsets = [14, 0], sizes = [1, 784], strides = [1, 1]} : vector<16x784xf32> to vector<1x784xf32>
    %c1_60 = arith.constant 1 : index
    %c10976_61 = arith.constant 10976 : index
    %79 = vector.load %arg9[%c1_60, %c10976_61] : memref<2x12544xf32, #tpu.memory_space<vmem>>, vector<1x784xf32>
    tpu.vector_store %arg9[%c1_60, %c10976_61], %78 {strides = array<i32>} : memref<2x12544xf32, #tpu.memory_space<vmem>>, vector<1x784xf32>,
    %80 = vector.extract_strided_slice %49 {offsets = [15, 0], sizes = [1, 784], strides = [1, 1]} : vector<16x784xf32> to vector<1x784xf32>
    %c1_62 = arith.constant 1 : index
    %c11760_63 = arith.constant 11760 : index
    %81 = vector.load %arg9[%c1_62, %c11760_63] : memref<2x12544xf32, #tpu.memory_space<vmem>>, vector<1x784xf32>
    tpu.vector_store %arg9[%c1_62, %c11760_63], %80 {strides = array<i32>} : memref<2x12544xf32, #tpu.memory_space<vmem>>, vector<1x784xf32>,
    %c0_64 = arith.constant 0 : index
    %c0_65 = arith.constant 0 : index
    %82 = vector.load %arg9[%c0_64, %c0_65] : memref<2x12544xf32, #tpu.memory_space<vmem>>, vector<2x12544xf32>
    %c0_66 = arith.constant 0 : index
    %c0_67 = arith.constant 0 : index
    %83 = vector.load %arg4[%c0_66, %c0_67] : memref<64x12544xf32, #tpu.memory_space<vmem>>, vector<64x12544xf32>
    %cst_68 = arith.constant dense<0.000000e+00> : vector<2x64xf32>
    %84 = tpu.matmul %82, %83, %cst_68 {dimension_numbers = #tpu.dot_dimension_numbers<[1], [1], [0], [0], [0, 0, 1, 0], [], []>} : vector<2x12544xf32>, vector<64x12544xf32>, vector<2x64xf32> -> vector<2x64xf32>
    %c0_69 = arith.constant 0 : index
    %c0_70 = arith.constant 0 : index
    %85 = vector.load %arg5[%c0_69, %c0_70] : memref<1x64xf32, #tpu.memory_space<vmem>>, vector<1x64xf32>
    %86 = vector.broadcast %85 : vector<1x64xf32> to vector<2x64xf32>
    %87 = arith.addf %84, %86 : vector<2x64xf32>
    %cst_71 = arith.constant 0.000000e+00 : f32
    %88 = vector.broadcast %cst_71 : f32 to vector<2x64xf32>
    %89 = arith.maximumf %87, %88 : vector<2x64xf32>
    %c0_72 = arith.constant 0 : index
    %c0_73 = arith.constant 0 : index
    %90 = vector.load %arg6[%c0_72, %c0_73] : memref<10x64xf32, #tpu.memory_space<vmem>>, vector<10x64xf32>
    %cst_74 = arith.constant dense<0.000000e+00> : vector<2x10xf32>
    %91 = tpu.matmul %89, %90, %cst_74 {dimension_numbers = #tpu.dot_dimension_numbers<[1], [1], [0], [0], [0, 0, 1, 0], [], []>} : vector<2x64xf32>, vector<10x64xf32>, vector<2x10xf32> -> vector<2x10xf32>
    %c0_75 = arith.constant 0 : index
    %c0_76 = arith.constant 0 : index
    %92 = vector.load %arg7[%c0_75, %c0_76] : memref<1x10xf32, #tpu.memory_space<vmem>>, vector<1x10xf32>
    %93 = vector.broadcast %92 : vector<1x10xf32> to vector<2x10xf32>
    %94 = arith.addf %91, %93 : vector<2x10xf32>
    %c0_77 = arith.constant 0 : index
    %c0_78 = arith.constant 0 : index
    %95 = vector.load %arg8[%c0_77, %c0_78] : memref<2x10xf32, #tpu.memory_space<vmem>>, vector<2x10xf32>
    tpu.vector_store %arg8[%c0_77, %c0_78], %94 {strides = array<i32>} : memref<2x10xf32, #tpu.memory_space<vmem>>, vector<2x10xf32>,
    return
  }
  func.func @transform_0(%arg0: i32) -> (i32, i32, i32) {
    %c0_i32 = arith.constant 0 : i32
    %c0_i32_0 = arith.constant 0 : i32
    %c0_i32_1 = arith.constant 0 : i32
    %c0_i32_2 = arith.constant 0 : i32
    return %c0_i32, %c0_i32_0, %c0_i32_1 : i32, i32, i32
  }
  func.func @transform_1(%arg0: i32) -> (i32, i32) {
    %c0_i32 = arith.constant 0 : i32
    %c0_i32_0 = arith.constant 0 : i32
    %c0_i32_1 = arith.constant 0 : i32
    return %c0_i32, %c0_i32_0 : i32, i32
  }
  func.func @transform_2(%arg0: i32) -> (i32, i32) {
    %c0_i32 = arith.constant 0 : i32
    %c0_i32_0 = arith.constant 0 : i32
    %c0_i32_1 = arith.constant 0 : i32
    return %c0_i32, %c0_i32_0 : i32, i32
  }
  func.func @transform_3(%arg0: i32) -> (i32, i32) {
    %c0_i32 = arith.constant 0 : i32
    %c0_i32_0 = arith.constant 0 : i32
    %c0_i32_1 = arith.constant 0 : i32
    return %c0_i32, %c0_i32_0 : i32, i32
  }
  func.func @transform_4(%arg0: i32) -> (i32, i32) {
    %c0_i32 = arith.constant 0 : i32
    %c0_i32_0 = arith.constant 0 : i32
    %c0_i32_1 = arith.constant 0 : i32
    return %c0_i32, %c0_i32_0 : i32, i32
  }
  func.func @transform_5(%arg0: i32) -> (i32, i32) {
    %c0_i32 = arith.constant 0 : i32
    %c0_i32_0 = arith.constant 0 : i32
    %c0_i32_1 = arith.constant 0 : i32
    return %c0_i32, %c0_i32_0 : i32, i32
  }
  func.func @transform_6(%arg0: i32) -> (i32, i32) {
    %c0_i32 = arith.constant 0 : i32
    %c0_i32_0 = arith.constant 0 : i32
    %c0_i32_1 = arith.constant 0 : i32
    return %c0_i32, %c0_i32_0 : i32, i32
  }
  func.func @transform_7(%arg0: i32) -> (i32, i32) {
    %c0_i32 = arith.constant 0 : i32
    %c0_i32_0 = arith.constant 0 : i32
    %c0_i32_1 = arith.constant 0 : i32
    return %c0_i32, %c0_i32_0 : i32, i32
  }
}

</mosaic_0001>

<bundles_post_ra>
// kernel: forward.1
= control target key start
LH: loop header
LB: loop body
LE: loop exit
PB: predicated region body
PF: predicated region fallthrough
CT: control target
= control target key end

     0   :  { %vm76_vm0 = vcmask 1042432   ;;  %v7641_v7 = vmov 0.0   ;;  %vm7642_vm1 = vmmov 1   ;;  %v7643_v13 = vmov 0   ;;  %s11285_s0 = inlined_call_operand.vmem [shape: f32[2,27,784], index: 0, kind: input, shape index: {}]   ;;  %s11286_s1 = inlined_call_operand.vmem [shape: f32[16,27], index: 1, kind: input, shape index: {}]   ;;  %s11287_s2 = inlined_call_operand.vmem [shape: f32[16,1], index: 2, kind: input, shape index: {}]   ;;  %s11288_s3 = inlined_call_operand.vmem [shape: f32[64,12544], index: 3, kind: input, shape index: {}]   ;;  %s11289_s4 = inlined_call_operand.vmem [shape: f32[1,64], index: 4, kind: input, shape index: {}]   ;;  %s11290_s5 = inlined_call_operand.vmem [shape: f32[10,64], index: 5, kind: input, shape index: {}]   ;;  %s11291_s6 = inlined_call_operand.vmem [shape: f32[1,10], index: 6, kind: input, shape index: {}]   ;;  %s11292_s7 = inlined_call_operand.hbm [shape: f32[2,10], index: 7, kind: output, shape index: {}]  }
   0x1   :  { %v30_v0 = vld [vmem:[%s11285_s0 + $0x8] sm:$0xff]  ;;  %v37_v1 = vld [vmem:[%s11285_s0 + $0x40] sm:$0xff]  ;;  %v36_v4 = vld [vmem:[%s11285_s0 + $0x38] sm:$0xff]  ;;  %162 = vmatprep.mubr.f32.mxu1 %v7641_v7  ;;  %316 = vmatprep.mubr.f32.mxu0 %v7641_v7  ;;  %vm69_vm3 = vcmask 220160  }
   0x2   :  { %v29_v2 = vld [vmem:[%s11285_s0] sm:$0xff]  ;;  %v6613_v3 = vpack.c.bf16 %v37_v1, %v30_v0  ;;  %v44_v5 = vld [vmem:[%s11285_s0 + $0x78] sm:$0xff]  ;;  %v51_v6 = vld [vmem:[%s11285_s0 + $0xb0] sm:$0x7]  ;;  %7592 = vset.pattern.permute.xlu0 %v7643_v13  ;;  %7593 = vset.pattern.permute.xlu1 %v7643_v13 }
   0x3   :  { %v6615_v8 = vpack.c.bf16 %v36_v4, %v29_v2  ;;  %v6617_v9 = vpack.c.bf16 %v51_v6, %v44_v5  ;;  %vm7716_vm2 = vmpackc.low %vm76_vm0, %vm7642_vm1  ;;  %v43_v11 = vld [vmem:[%s11285_s0 + $0x70] sm:$0xff]  ;;  %v50_v12 = vld [vmem:[%s11285_s0 + $0xa8] sm:$0x7] }
   0x4   :  { %6614 = vmatprep.subr.bf16.mxu1 %v6613_v3  ;;  %v32_v14 = vld [vmem:[%s11285_s0 + $0x18] sm:$0xff]  ;;  %v39_v15 = vld [vmem:[%s11285_s0 + $0x50] sm:$0xff]  ;;  %v6620_v16 = vpack.c.bf16 %v50_v12, %v43_v11  ;;  %v38_v18 = vld [vmem:[%s11285_s0 + $0x48] sm:$0xff] }
   0x5   :  { %6616 = vmatpush1.bf16.msra.mxu1 %v6615_v8  ;;  %v31_v17 = vld [vmem:[%s11285_s0 + $0x10] sm:$0xff]  ;;  %v34_v19 = vld [vmem:[%s11285_s0 + $0x28] sm:$0xff]  ;;  %v6623_v20 = vpack.c.bf16 %v39_v15, %v32_v14  ;;  %v41_v21 = vld [vmem:[%s11285_s0 + $0x60] sm:$0xff] }
   0x6   :  { %6619 = vmatprep.subr.msk.bf16.mxu1 %vm7716_vm2, %v6617_v9  ;;  %v33_v22 = vld [vmem:[%s11285_s0 + $0x20] sm:$0xff]  ;;  %v40_v23 = vld [vmem:[%s11285_s0 + $0x58] sm:$0xff]  ;;  %v6633_v24 = vpack.c.bf16 %v41_v21, %v34_v19  ;;  %v46_v26 = vld [vmem:[%s11285_s0 + $0x88] sm:$0xff]  ;;  %v6625_v30 = vpack.c.bf16 %v38_v18, %v31_v17 }
   0x7   :  { %v6635_v25 = vpack.c.bf16 %v40_v23, %v33_v22  ;;  %v53_v27 = vld [vmem:[%s11285_s0 + $0xc0] sm:$0x7]  ;;  %v48_v29 = vld [vmem:[%s11285_s0 + $0x98] sm:$0xff]  ;;  %v55_v31 = vld [vmem:[%s11285_s0 + $0xd0] sm:$0x7] }
   0x8   :  { %v7761_v28 = vld [vmem:[%s11286_s1] sm:$0xff]  ;;  %6634 = vmatprep.subr.bf16.mxu0 %v6633_v24  ;;  %v47_v32 = vld [vmem:[%s11285_s0 + $0x90] sm:$0xff]  ;;  %v54_v33 = vld [vmem:[%s11285_s0 + $0xc8] sm:$0x7]  ;;  %v6627_v34 = vpack.c.bf16 %v53_v27, %v46_v26  ;;  %v6637_v37 = vpack.c.bf16 %v55_v31, %v48_v29 }
   0x9   :  { %6622 = vmatpush1.bf16.msk.msra.mxu1 %vm7716_vm2, %v6620_v16  ;;  %6636 = vmatpush1.bf16.msra.mxu0 %v6635_v25  ;;  %v45_v35 = vld [vmem:[%s11285_s0 + $0x80] sm:$0xff]  ;;  %v52_v36 = vld [vmem:[%s11285_s0 + $0xb8] sm:$0x7]  ;;  %v6640_v38 = vpack.c.bf16 %v54_v33, %v47_v32  ;;  %v6521_v39 = vld [vmem:[%s11285_s0 + $0xe8] sm:$0xff] }
   0xa   :  { %6624 = vmatprep.subr.bf16.mxu1 %v6623_v20  ;;  %v35_v40 = vld [vmem:[%s11285_s0 + $0x30] sm:$0xff]  ;;  %v42_v41 = vld [vmem:[%s11285_s0 + $0x68] sm:$0xff]  ;;  %v6528_v42 = vld [vmem:[%s11285_s0 + $0x120] sm:$0xff]  ;;  %6639 = vmatprep.subr.msk.bf16.mxu0 %vm7716_vm2, %v6637_v37  ;;  %v6630_v47 = vpack.c.bf16 %v52_v36, %v45_v35 }
   0xb   :  { %v6653_v43 = vpack.c.bf16 %v6528_v42, %v6521_v39  ;;  %v6520_v44 = vld [vmem:[%s11285_s0 + $0xe0] sm:$0xff]  ;;  %v6527_v45 = vld [vmem:[%s11285_s0 + $0x118] sm:$0xff]  ;;  %v7809_v46 = vld [vmem:[%s11286_s1 + $0x8] sm:$0xff]  ;;  %v6643_v50 = vpack.c.bf16 %v42_v41, %v35_v40 }
   0xc   :  { %6507 = vmatmul.mubr.msk.f32.vlgmr.msra.gmra.mrb[0].mxu1 %vm69_vm3, %v7761_v28  ;;  %v6535_v48 = vld [vmem:[%s11285_s0 + $0x158] sm:$0xff]  ;;  %v6542_v49 = vld [vmem:[%s11285_s0 + $0x190] sm:$0x7]  ;;  %v6655_v51 = vpack.c.bf16 %v6527_v45, %v6520_v44  ;;  %v49_v52 = vld [vmem:[%s11285_s0 + $0xa0] sm:$0xff] }
   0xd   :  { %6626 = vmatpush1.bf16.msra.mxu1 %v6625_v30  ;;  %168 = vmatprep.mubr.f32.mxu1 %v7641_v7  ;;  %v56_v53 = vld [vmem:[%s11285_s0 + $0xd8] sm:$0x7]  ;;  %v6657_v54 = vpack.c.bf16 %v6542_v49, %v6535_v48  ;;  %v6534_v55 = vld [vmem:[%s11285_s0 + $0x150] sm:$0xff]  ;;  %v6541_v56 = vld [vmem:[%s11285_s0 + $0x188] sm:$0x7] }
   0xe   :  { %6629 = vmatprep.subr.msk.bf16.mxu1 %vm7716_vm2, %v6627_v34  ;;  %6642 = vmatpush1.bf16.msk.msra.mxu0 %vm7716_vm2, %v6640_v38  ;;  %v6525_v57 = vld [vmem:[%s11285_s0 + $0x108] sm:$0xff]  ;;  %v6532_v58 = vld [vmem:[%s11285_s0 + $0x140] sm:$0xff]  ;;  %v6647_v59 = vpack.c.bf16 %v56_v53, %v49_v52  ;;  %v6660_v60 = vpack.c.bf16 %v6541_v56, %v6534_v55  ;;  %v6523_v61 = vld [vmem:[%s11285_s0 + $0xf8] sm:$0xff] }
   0xf   :  { %6654 = vmatprep.subr.bf16.mxu0 %v6653_v43  ;;  %v6530_v62 = vld [vmem:[%s11285_s0 + $0x130] sm:$0xff]  ;;  %v6673_v63 = vpack.c.bf16 %v6532_v58, %v6525_v57  ;;  %v6524_v0 = vld [vmem:[%s11285_s0 + $0x100] sm:$0xff]  ;;  %v6531_v1 = vld [vmem:[%s11285_s0 + $0x138] sm:$0xff] }
  0x10   :  { %6508 = vmatmul.mubr.msk.f32.gmra.mrb[2].mxu1 %vm69_vm3, %v7809_v46  ;;  %v6539_v2 = vld [vmem:[%s11285_s0 + $0x178] sm:$0xff]  ;;  %v6546_v3 = vld [vmem:[%s11285_s0 + $0x1b0] sm:$0x7] }
  0x11   :  { %6632 = vmatpush1.bf16.msk.msra.mxu1 %vm7716_vm2, %v6630_v47  ;;  %239 = vmatprep.mubr.f32.mxu1 %v7641_v7 }
  0x12   :  { %6644 = vmatprep.subr.bf16.mxu1 %v6643_v50  ;;  %6515 = vmatmul.mubr.msk.f32.vlgmr.msra.gmra.mrb[0].mxu0 %vm69_vm3, %v7761_v28 }
  0x13   :  { %6656 = vmatpush1.bf16.msra.mxu0 %v6655_v51  ;;  %322 = vmatprep.mubr.f32.mxu0 %v7641_v7 }
  0x14   :  { %6511 = vmatmul.mubr.msk.f32.vlgmr.msra.gmra.mrb[4].mxu1 %vm69_vm3, %v7761_v28  ;;  %6659 = vmatprep.subr.msk.bf16.mxu0 %vm7716_vm2, %v6657_v54 }
  0x15   :  { %6646 = vmatpush3.bf16.msra.mxu1 %v6643_v50  ;;  %245 = vmatprep.mubr.f32.mxu1 %v7641_v7 }
  0x16   :  { %12 = vsyncpa [#allocation4], 0  ;;  %6649 = vmatprep.subr.msk.bf16.mxu1 %vm7716_vm2, %v6647_v59  ;;  %6516 = vmatmul.mubr.msk.f32.gmra.mrb[2].mxu0 %vm69_vm3, %v7809_v46  ;;  %v6663_v4 = vpack.c.bf16 %v6530_v62, %v6523_v61  ;;  %v6522_v5 = vld [vmem:[%s11285_s0 + $0xf0] sm:$0xff]  ;;  %v6529_v6 = vld [vmem:[%s11285_s0 + $0x128] sm:$0xff]  ;;  %v6675_v8 = vpack.c.bf16 %v6531_v1, %v6524_v0  ;;  %v6677_v12 = vpack.c.bf16 %v6546_v3, %v6539_v2  ;;  %v7644_v56 = vmov 1966171168  }
  0x17   :  { %6662 = vmatpush1.bf16.msk.msra.mxu0 %vm7716_vm2, %v6660_v60  ;;  %971 = vmatprep.mubr.f32.mxu0 %v7641_v7  ;;  %v6537_v9 = vld [vmem:[%s11285_s0 + $0x168] sm:$0xff]  ;;  %v6544_v11 = vld [vmem:[%s11285_s0 + $0x1a0] sm:$0x7]  ;;  %v6538_v13 = vld [vmem:[%s11285_s0 + $0x170] sm:$0xff]  ;;  %v6665_v15 = vpack.c.bf16 %v6529_v6, %v6522_v5  ;;  %v429_v57 = vunpack.c.l.s4 %v7644_v56  ;;  %v431_v58 = vlaneseq  ;;  %v7645_v62 = vmov 1983009808  }
  0x18   :  { %6512 = vmatmul.mubr.msk.f32.gmra.mrb[6].mxu1 %vm69_vm3, %v7809_v46  ;;  %6674 = vmatprep.subr.bf16.mxu0 %v6673_v63  ;;  %v6545_v14 = vld [vmem:[%s11285_s0 + $0x1a8] sm:$0x7]  ;;  %v6667_v16 = vpack.c.bf16 %v6544_v11, %v6537_v9  ;;  %v6536_v17 = vld [vmem:[%s11285_s0 + $0x160] sm:$0xff]  ;;  %v6543_v18 = vld [vmem:[%s11285_s0 + $0x198] sm:$0x7]  ;;  %v2458_v63 = vunpack.c.l.s4 %v7645_v62  ;;  %s7646_s11 = smov 16  }
  0x19   :  { %6652 = vmatpush3.bf16.msk.msra.mxu1 %vm7716_vm2, %v6647_v59  ;;  %6592 = vmatprep.mubr.msk.f32.mxu1 %vm69_vm3, %v7761_v28  ;;  %v6680_v19 = vpack.c.bf16 %v6545_v14, %v6538_v13  ;;  %v6526_v20 = vld [vmem:[%s11285_s0 + $0x110] sm:$0xff]  ;;  %v6533_v21 = vld [vmem:[%s11285_s0 + $0x148] sm:$0xff]  ;;  %v6670_v22 = vpack.c.bf16 %v6543_v18, %v6536_v17  ;;  %v57_v23 = vld [vmem:[%s11287_s2] sm:$0xff]  ;;  %v430_v3 = vunpack.c.0.s8 %v429_v57  ;;  %vm8145_vm4 = vcmp.lt.s32.totalorder %v431_v58, 784  ;;  %s7647_s12 = smov 32   ;;  %s7648_s13 = smov 48  }
  0x1a   :  { %6664 = vmatprep.subr.bf16.mxu1 %v6663_v4  ;;  %6550 = vmatmul.mubr.msk.f32.vlgmr.msra.gmra.mrb[4].mxu0 %vm69_vm3, %v7761_v28  ;;  %v58_v24 = vld [vmem:[%s11287_s2 + $0x8] sm:$0xff]  ;;  %v6683_v25 = vpack.c.bf16 %v6533_v21, %v6526_v20  ;;  %v6540_v26 = vld [vmem:[%s11285_s0 + $0x180] sm:$0xff]  ;;  %v6547_v27 = vld [vmem:[%s11285_s0 + $0x1b8] sm:$0x7]  ;;  %v432_v4 = vshrl.u32 %v431_v58, 7  ;;  %v2459_v11 = vunpack.c.0.s8 %v2458_v63  ;;  %s7649_s14 = smov 64  }
  0x1b   :  { %6676 = vmatpush1.bf16.msra.mxu0 %v6675_v8  ;;  %977 = vmatprep.mubr.f32.mxu0 %v7641_v7  ;;  %v6687_v29 = vpack.c.bf16 %v6547_v27, %v6540_v26  ;;  %v1641_v30 = vld [vmem:[%s11288_s3 + $0x8] sm:$0xff]  ;;  %v1739_v31 = vld [vmem:[%s11288_s3 + $0x318] sm:$0xff]  ;;  %v1640_v10 = vld [vmem:[%s11288_s3] sm:$0xff]  ;;  %s7650_s15 = smov 80   ;;  %s7651_s23 = smov 96   ;;  %vm502_vm5 = vcmp.ge.s32.totalorder %v431_v58, 16 }
  0x1c   :  { %6593 = vmatmul.mubr.msk.f32.vlgmr.msra.gmra.mrb[8].mxu1 %vm69_vm3, %v7809_v46  ;;  %6679 = vmatprep.subr.msk.bf16.mxu0 %vm7716_vm2, %v6677_v12  ;;  %v6693_v32 = vpack.c.bf16 %v1739_v31, %v1641_v30  ;;  %v1837_v34 = vld [vmem:[%s11288_s3 + $0x628] sm:$0xff]  ;;  %v1935_v35 = vld [vmem:[%s11288_s3 + $0x938] sm:$0xff]  ;;  %v1836_v37 = vld [vmem:[%s11288_s3 + $0x620] sm:$0xff]  ;;  %v8024_v26 = vsub.s32 %v2459_v11, %v432_v4  ;;  %s7652_s16 = smov 112   ;;  %vm503_vm6 = vcmp.lt.s32.totalorder %v431_v58, 800  ;;  %vm499_vm7 = vcmask 130048  }
  0x1d   :  { %6666 = vmatpush1.bf16.msra.mxu1 %v6665_v15  ;;  %1048 = vmatprep.mubr.f32.mxu1 %v7641_v7  ;;  %v6697_v36 = vpack.c.bf16 %v1935_v35, %v1837_v34  ;;  %v1934_v38 = vld [vmem:[%s11288_s3 + $0x930] sm:$0xff]  ;;  %v2033_v40 = vld [vmem:[%s11288_s3 + $0xc48] sm:$0xff]  ;;  %v2131_v41 = vld [vmem:[%s11288_s3 + $0xf58] sm:$0xff]  ;;  %vm514_vm9 = vcmp.ge.s32.totalorder %v431_v58, 32  ;;  %vm515_vm10 = vcmp.lt.s32.totalorder %v431_v58, 816  ;;  %vm511_vm11 = vcmask 261120  }
  0x1e   :  { %6669 = vmatprep.subr.msk.bf16.mxu1 %vm7716_vm2, %v6667_v16  ;;  %6551 = vmatmul.mubr.msk.f32.gmra.mrb[6].mxu0 %vm69_vm3, %v7809_v46  ;;  %v6699_v39 = vpack.c.bf16 %v1934_v38, %v1836_v37  ;;  %v6701_v42 = vpack.c.bf16 %v2131_v41, %v2033_v40  ;;  %v2032_v43 = vld [vmem:[%s11288_s3 + $0xc40] sm:$0xff]  ;;  %v2130_v44 = vld [vmem:[%s11288_s3 + $0xf50] sm:$0xff]  ;;  %v2327_v47 = vld [vmem:[%s11288_s3 + $0x1578] sm:$0xff]  ;;  %v8019_v16 = vsub.s32 %v430_v3, %v432_v4  ;;  %vm526_vm13 = vcmp.ge.s32.totalorder %v431_v58, 48  ;;  %s7655_s10 = smov [#allocation3]  }
  0x1f   :  { %6682 = vmatpush1.bf16.msk.msra.mxu0 %vm7716_vm2, %v6680_v19  ;;  %1125 = vmatprep.mubr.f32.mxu0 %v7641_v7  ;;  %v6703_v45 = vpack.c.bf16 %v2130_v44, %v2032_v43  ;;  %v2228_v49 = vld [vmem:[%s11288_s3 + $0x1260] sm:$0xff]  ;;  %v2326_v50 = vld [vmem:[%s11288_s3 + $0x1570] sm:$0xff]  ;;  %v1643_v52 = vld [vmem:[%s11288_s3 + $0x18] sm:$0xff]  ;;  %vm527_vm14 = vcmp.lt.s32.totalorder %v431_v58, 832  ;;  %vm523_vm15 = vcmask 392192   ;;  %vm586_vm1 = vcmp.ge.s32.totalorder %v431_v58, 64 }
  0x20   :  { %61 = vperm.xlu0 %7592, %v57_v23   ;;  %66 = vperm.xlu1 %7593, %v58_v24   ;;  %v6707_v51 = vpack.c.bf16 %v2326_v50, %v2228_v49  ;;  %v1741_v53 = vld [vmem:[%s11288_s3 + $0x328] sm:$0xff]  ;;  %vm8634_vm8 = vmand %vm502_vm5, %vm503_vm6  ;;  %vm614_vm5 = vcmp.ge.s32.totalorder %v431_v58, 80  ;;  %vm615_vm6 = vcmp.lt.s32.totalorder %v431_v58, 864  ;;  %s6497_s17 = sshll.u32 %s7655_s10, 4  ;;  %s6498_s17 = int_to_ptr.vmem [resolvable:$true] %s6497_s17 }
  0x21   :  { %6672 = vmatpush1.bf16.msk.msra.mxu1 %vm7716_vm2, %v6670_v22  ;;  %v6709_v54 = vpack.c.bf16 %v1741_v53, %v1643_v52  ;;  %vm8643_vm12 = vmand %vm514_vm9, %vm515_vm10  ;;  %vm611_vm9 = vcmask 654336   ;;  %p7622_p1 = scmp.lt.s32.totalorder %s6498_s17, %s6498_s17 }
  0x22   :  { %6684 = vmatprep.subr.bf16.mxu1 %v6683_v25  ;;  %6558 = vmatmul.mubr.msk.f32.vlgmr.msra.gmra.mrb[8].mxu0 %vm69_vm3, %v7761_v28  ;;  %vm8652_vm0 = vmand %vm526_vm13, %vm527_vm14  ;;  %vm626_vm13 = vcmp.ge.s32.totalorder %v431_v58, 96  ;;  %vm627_vm14 = vcmp.lt.s32.totalorder %v431_v58, 880 }
  0x23   :  { %1131 = vmatprep.mubr.f32.mxu0 %v7641_v7  ;;  %vm8674_vm10 = vmand %vm614_vm5, %vm615_vm6  ;;  %vm638_vm5 = vcmp.ge.s32.totalorder %v431_v58, 112  ;;  %vm639_vm6 = vcmp.lt.s32.totalorder %v431_v58, 896 }
  0x24   :  { %6554 = vmatmul.mubr.msk.f32.vlgmr.msra.gmra.mrb[10].mxu1 %vm69_vm3, %v7761_v28  ;;  %872 = vperm.xlu0 %7592, %v57_v23  }
  0x25   :  { %6686 = vmatpush3.bf16.msra.mxu1 %v6683_v25  ;;  %1054 = vmatprep.mubr.f32.mxu1 %v7641_v7 }
  0x26   :  { %6689 = vmatprep.subr.msk.bf16.mxu1 %vm7716_vm2, %v6687_v29  ;;  %6559 = vmatmul.mubr.msk.f32.gmra.mrb[10].mxu0 %vm69_vm3, %v7809_v46 }
  0x27   :  { %877 = vperm.xlu1 %7593, %v58_v24  }
  0x28   :  { %6555 = vmatmul.mubr.msk.f32.gmra.mrb[12].mxu1 %vm69_vm3, %v7809_v46 }
  0x29   :  { %6692 = vmatpush3.bf16.msk.msra.mxu1 %vm7716_vm2, %v6687_v29  ;;  %6603 = vmatprep.mubr.msk.f32.mxu1 %vm69_vm3, %v7761_v28  ;;  %v1738_v28 = vld [vmem:[%s11288_s3 + $0x310] sm:$0xff]  ;;  %vm587_vm2 = vcmp.lt.s32.totalorder %v431_v58, 848 }
  0x2a   :  { %v6695_v33 = vpack.c.bf16 %v1738_v28, %v1640_v10  ;;  %6694 = vmatprep.subr.bf16.mxu1 %v6693_v32 }
  0x2c   :  { %6604 = vmatmul.mubr.msk.f32.vlgmr.msra.gmra.mrb[14].mxu1 %vm69_vm3, %v7809_v46  ;;  %v2229_v46 = vld [vmem:[%s11288_s3 + $0x1268] sm:$0xff]  ;;  %vm583_vm3 = vcmask 523264  }
  0x2d   :  { %v6705_v48 = vpack.c.bf16 %v2327_v47, %v2229_v46 }
  0x32   :  { %6696 = vmatpush1.bf16.xpose.msra.mxu1 %v6695_v33 }
  0x33   :  { %6698 = vmatprep.subr.bf16.mxu1 %v6697_v36 }
  0x3a   :  { %6700 = vmatpush1.bf16.xpose.msra.mxu1 %v6699_v39 }
  0x3b   :  { %6702 = vmatprep.subr.bf16.mxu1 %v6701_v42 }
  0x42   :  { %6704 = vmatpush1.bf16.xpose.msra.mxu1 %v6703_v45 }
  0x43   :  { %6706 = vmatprep.subr.bf16.mxu1 %v6705_v48 }
  0x4a   :  { %6708 = vmatpush1.bf16.xpose.msra.mxu1 %v6707_v51 }
  0x4b   :  { %6710 = vmatprep.subr.bf16.mxu1 %v6709_v54 }
  0x9f   :  { %v8014_v55 = vpop.permute.xlu0 %61  ;;  %v67_v1 = vpop.permute.xlu1 %66 }
  0xa3   :  { %v8039_v41 = vpop.permute.xlu0 %872 }
  0xdf   :  { %v164_v59 = vpop.f32.mrb[0].mxu1 }
  0xe0   :  { %v165_v60 = vadd.f32 %v164_v59, %v8014_v55  ;;  %v166_v61 = vpop.f32.mrb[1].mxu1 }
  0xe1   :  { %v167_v0 = vadd.f32 %v166_v61, %v8014_v55 }
  0xe2   :  { %v404_v2 = vmax.f32 %v165_v60, 0.0 }
  0xe3   :  { %v405_v5 = vmax.f32 %v167_v0, 0.0  ;;  %v170_v6 = vpop.f32.mrb[2].mxu1 }
  0xe4   :  { %v171_v8 = vadd.f32 %v170_v6, %v67_v1  ;;  %v172_v9 = vpop.f32.mrb[3].mxu1  ;;  %v8055_v6 = vpop.permute.xlu1 %877 }
  0xe5   :  { %v425_v12 = vcombine.low %v404_v2, %v405_v5  ;;  %v531_v13 = vcombine.high %v404_v2, %v405_v5  ;;  %v173_v14 = vadd.f32 %v172_v9, %v67_v1  ;;  %v318_v15 = vpop.f32.mrb[0].mxu0 }
  0xe6   :  { %v411_v17 = vmax.f32 %v171_v8, 0.0  ;;  %v319_v18 = vadd.f32 %v318_v15, %v8014_v55  ;;  %v320_v19 = vpop.f32.mrb[1].mxu0 }
  0xe7   :  { %v412_v20 = vmax.f32 %v173_v14, 0.0  ;;  %v241_v21 = vpop.f32.mrb[4].mxu1  ;;  %v321_v22 = vadd.f32 %v320_v19, %v8014_v55  ;;  %v8028_v10 = vrot.slane %v425_v12, %v8019_v16  ;;  %v8031_v28 = vrot.slane %v531_v13, %v8019_v16 }
  0xe8   :  { %v242_v23 = vadd.f32 %v241_v21, %v8014_v55  ;;  %v243_v24 = vpop.f32.mrb[5].mxu1  ;;  %v408_v25 = vmax.f32 %v319_v18, 0.0 }
  0xe9   :  { %v650_v27 = vcombine.low %v411_v17, %v412_v20  ;;  %v741_v29 = vcombine.high %v411_v17, %v412_v20  ;;  %v244_v30 = vadd.f32 %v243_v24, %v8014_v55  ;;  %v409_v31 = vmax.f32 %v321_v22, 0.0  ;;  %v324_v32 = vpop.f32.mrb[2].mxu0 }
  0xea   :  { %v406_v33 = vmax.f32 %v242_v23, 0.0  ;;  %v325_v34 = vadd.f32 %v324_v32, %v67_v1  ;;  %v326_v35 = vpop.f32.mrb[3].mxu0 }
  0xeb   :  { %v8034_v36 = vrot.slane %v650_v27, %v8019_v16  ;;  %v8037_v37 = vrot.slane %v741_v29, %v8019_v16  ;;  %v407_v38 = vmax.f32 %v244_v30, 0.0  ;;  %v247_v39 = vpop.f32.mrb[6].mxu1  ;;  %v427_v40 = vcombine.low %v408_v25, %v409_v31 }
  0xec   :  { %v248_v42 = vadd.f32 %v247_v39, %v67_v1  ;;  %v533_v43 = vcombine.high %v408_v25, %v409_v31  ;;  %v249_v44 = vpop.f32.mrb[7].mxu1  ;;  %v415_v45 = vmax.f32 %v325_v34, 0.0  ;;  %v327_v46 = vadd.f32 %v326_v35, %v67_v1 }
  0xed   :  { %v426_v47 = vcombine.low %v406_v33, %v407_v38  ;;  %v532_v48 = vcombine.high %v406_v33, %v407_v38  ;;  %v8042_v49 = vrot.slane %v427_v40, %v8019_v16  ;;  %v250_v50 = vadd.f32 %v249_v44, %v67_v1  ;;  %v973_v51 = vpop.f32.mrb[4].mxu0 }
  0xee   :  { %v413_v52 = vmax.f32 %v248_v42, 0.0  ;;  %v8045_v53 = vrot.slane %v533_v43, %v8019_v16  ;;  %v416_v54 = vmax.f32 %v327_v46, 0.0  ;;  %v974_v56 = vadd.f32 %v973_v51, %v8039_v41  ;;  %v975_v57 = vpop.f32.mrb[5].mxu0 }
  0xef   :  { %v8049_v59 = vrot.slane %v426_v47, %v8019_v16  ;;  %v8052_v60 = vrot.slane %v532_v48, %v8019_v16  ;;  %v414_v61 = vmax.f32 %v250_v50, 0.0  ;;  %v6594_v62 = vpop.f32.mrb[8].mxu1  ;;  %v976_v63 = vadd.f32 %v975_v57, %v8039_v41 }
  0xf0   :  { %v652_v0 = vcombine.low %v415_v45, %v416_v54  ;;  %v743_v2 = vcombine.high %v415_v45, %v416_v54  ;;  %v401_v3 = vadd.f32 %v6594_v62, %v67_v1  ;;  %v395_v4 = vpop.f32.mrb[9].mxu1  ;;  %v1213_v5 = vmax.f32 %v974_v56, 0.0 }
  0xf1   :  { %v456_v8 = vcombine.low %v8028_v10, %v8049_v59  ;;  %v479_v9 = vcombine.high %v8028_v10, %v8049_v59  ;;  %v563_v11 = vcombine.low %v8031_v28, %v8052_v60  ;;  %v591_v12 = vcombine.high %v8031_v28, %v8052_v60  ;;  %v979_v13 = vpop.f32.mrb[6].mxu0 }
  0xf2   :  { %v651_v14 = vcombine.low %v413_v52, %v414_v61  ;;  %v742_v15 = vcombine.high %v413_v52, %v414_v61  ;;  %v8066_v1 = vrot.slane %v652_v0, %v8019_v16  ;;  %v8069_v17 = vrot.slane %v743_v2, %v8019_v16  ;;  %v981_v18 = vpop.f32.mrb[7].mxu0 }
  0xf3   :  { %v417_v19 = vmax.f32 %v401_v3, 0.0  ;;  %v396_v20 = vadd.f32 %v395_v4, %v8014_v55  ;;  %v1214_v21 = vmax.f32 %v976_v63, 0.0  ;;  %v980_v22 = vadd.f32 %v979_v13, %v8055_v6 }
  0xf4   :  { %v8074_v23 = vrot.slane %v651_v14, %v8019_v16  ;;  %v8077_v24 = vrot.slane %v742_v15, %v8019_v16  ;;  %v982_v25 = vadd.f32 %v981_v18, %v8055_v6  ;;  %v8081_v27 = vrot.slane %v479_v9, %v8019_v16 }
  0xf5   :  { %v8084_v29 = vrot.slane %v417_v19, %v8019_v16  ;;  %v744_v30 = vcombine.high %v417_v19, %v417_v19  ;;  %v410_v31 = vmax.f32 %v396_v20, 0.0  ;;  %v1234_v55 = vcombine.low %v1213_v5, %v1214_v21  ;;  %v1127_v32 = vpop.f32.mrb[8].mxu0 }
  0xf6   :  { %v681_v33 = vcombine.low %v8034_v36, %v8074_v23  ;;  %v701_v34 = vcombine.high %v8034_v36, %v8074_v23  ;;  %v773_v35 = vcombine.low %v8037_v37, %v8077_v24  ;;  %v797_v38 = vcombine.high %v8037_v37, %v8077_v24  ;;  %v1129_v39 = vpop.f32.mrb[9].mxu0 }
  0xf7   :  { %v682_v40 = vcombine.low %v8066_v1, %v8084_v29  ;;  %v702_v42 = vcombine.high %v8066_v1, %v8084_v29  ;;  %v8099_v43 = vrot.slane %v744_v30, %v8019_v16  ;;  %v8102_v44 = vrot.slane %v410_v31, %v8019_v16  ;;  %v1050_v45 = vpop.f32.mrb[10].mxu1 }
  0xf8   :  { %v534_v46 = vcombine.high %v410_v31, %v410_v31  ;;  %v8105_v47 = vrot.slane %v1234_v55, %v8019_v16  ;;  %v1325_v48 = vcombine.high %v1213_v5, %v1214_v21  ;;  %v1051_v50 = vadd.f32 %v1050_v45, %v8039_v41  ;;  %v1052_v51 = vpop.f32.mrb[11].mxu1 }
  0xf9   :  { %v774_v52 = vcombine.low %v8069_v17, %v8099_v43  ;;  %v798_v54 = vcombine.high %v8069_v17, %v8099_v43  ;;  %v457_v56 = vcombine.low %v8042_v49, %v8102_v44  ;;  %v480_v57 = vcombine.high %v8042_v49, %v8102_v44  ;;  %v1133_v61 = vpop.f32.mrb[10].mxu0 }
  0xfa   :  { %v8117_v62 = vrot.slane %v534_v46, %v8019_v16  ;;  %v8120_v63 = vrot.slane %v1325_v48, %v8019_v16  ;;  %v1215_v0 = vmax.f32 %v1051_v50, 0.0  ;;  %v1053_v2 = vadd.f32 %v1052_v51, %v8039_v41  ;;  %v1135_v3 = vpop.f32.mrb[11].mxu0 }
  0xfb   :  { %v1128_v4 = vadd.f32 %v1127_v32, %v8039_v41  ;;  %v1056_v5 = vpop.f32.mrb[12].mxu1  ;;  %v1130_v9 = vadd.f32 %v1129_v39, %v8039_v41  ;;  %v1220_v13 = vmax.f32 %v980_v22, 0.0  ;;  %v1221_v14 = vmax.f32 %v982_v25, 0.0 }
  0xfc   :  { %v564_v49 = vcombine.low %v8045_v53, %v8117_v62  ;;  %v592_v15 = vcombine.high %v8045_v53, %v8117_v62  ;;  %v1216_v18 = vmax.f32 %v1053_v2, 0.0  ;;  %v1057_v19 = vadd.f32 %v1056_v5, %v8055_v6  ;;  %v1058_v20 = vpop.f32.mrb[13].mxu1 }
  0xfd   :  { %v1217_v21 = vmax.f32 %v1128_v4, 0.0  ;;  %v1218_v30 = vmax.f32 %v1130_v9, 0.0  ;;  %v1059_v31 = vadd.f32 %v1058_v20, %v8055_v6  ;;  %v1428_v55 = vcombine.low %v1220_v13, %v1221_v14 }
  0xfe   :  { %v1235_v32 = vcombine.low %v1215_v0, %v1216_v18  ;;  %v1326_v44 = vcombine.high %v1215_v0, %v1216_v18  ;;  %v1222_v39 = vmax.f32 %v1057_v19, 0.0  ;;  %v1519_v22 = vcombine.high %v1220_v13, %v1221_v14 }
  0xff   :  { %v1236_v25 = vcombine.low %v1217_v21, %v1218_v30  ;;  %v1327_v45 = vcombine.high %v1217_v21, %v1218_v30  ;;  %v1223_v46 = vmax.f32 %v1059_v31, 0.0  ;;  %v8132_v48 = vrot.slane %v1428_v55, %v8019_v16  ;;  %v6605_v50 = vpop.f32.mrb[14].mxu1 }
 0x100   :  { %v8135_v51 = vrot.slane %v1235_v32, %v8019_v16  ;;  %v8138_v2 = vrot.slane %v1326_v44, %v8019_v16  ;;  %v8141_v4 = vrot.slane %v1519_v22, %v8019_v16  ;;  %v1134_v0 = vadd.f32 %v1133_v61, %v8055_v6  ;;  %v1204_v5 = vpop.f32.mrb[15].mxu1 }
 0x101   :  { %v1257_v13 = vrot.slane %v1236_v25, %v8019_v16  ;;  %v8151_v14 = vrot.slane %v1327_v45, %v8019_v16  ;;  %v1429_v18 = vcombine.low %v1222_v39, %v1223_v46  ;;  %v1520_v19 = vcombine.high %v1222_v39, %v1223_v46 }
 0x102   :  { %v1265_v20 = vcombine.low %v8105_v47, %v8135_v51  ;;  %v1285_v21 = vcombine.high %v8105_v47, %v8135_v51  ;;  %v1357_v61 = vcombine.low %v8120_v63, %v8138_v2  ;;  %v1381_v30 = vcombine.high %v8120_v63, %v8138_v2 }
 0x103   :  { %v8162_v31 = vrot.slane %v1429_v18, %v8019_v16  ;;  %v8165_v55 = vrot.slane %v1520_v19, %v8019_v16  ;;  %v1224_v32 = vmax.f32 %v1134_v0, 0.0  ;;  %v1136_v44 = vadd.f32 %v1135_v3, %v8055_v6 }
 0x104   :  { %v494_v39 = vrot.slane %v480_v57, %v8019_v16  ;;  %v1210_v22 = vadd.f32 %v6605_v50, %v8055_v6  ;;  %v1205_v47 = vadd.f32 %v1204_v5, %v8039_v41  ;;  %v464_v25 = vrot.slane %v456_v8, %v8019_v16 }
 0x105   :  { %v1459_v45 = vcombine.low %v8132_v48, %v8162_v31  ;;  %v1479_v46 = vcombine.high %v8132_v48, %v8162_v31  ;;  %v1551_v3 = vcombine.low %v8141_v4, %v8165_v55  ;;  %v1575_v57 = vcombine.high %v8141_v4, %v8165_v55  ;;  %v1839_v4 = vld [vmem:[%s11288_s3 + $0x638] sm:$0xff]  ;;  %v1937_v55 = vld [vmem:[%s11288_s3 + $0x948] sm:$0xff] }
 0x106   :  { %v1225_v6 = vmax.f32 %v1136_v44, 0.0  ;;  %v495_v41 = vcombine.low %v8081_v27, %v494_v39  ;;  %v1226_v50 = vmax.f32 %v1210_v22, 0.0  ;;  %v1219_v51 = vmax.f32 %v1205_v47, 0.0 }
 0x107   :  { %v471_v10 = vrot.slane %v457_v56, %v8019_v16  ;;  %v519_v59 = vcombine.high %v8081_v27, %v494_v39  ;;  %v8190_v8 = vrot.slane %v563_v11, %v8019_v16  ;;  %v8193_v0 = vrot.slane %v564_v49, %v8019_v16 }
 0x108   :  { %v1430_v5 = vcombine.low %v1224_v32, %v1225_v6  ;;  %v1521_v18 = vcombine.high %v1224_v32, %v1225_v6  ;;  %496 = vrot.lane.b32.xlu0 %v495_v41, %s7646_s11  ;;  %v8197_v19 = vrot.slane %v1226_v50, %v8019_v16  ;;  %v1522_v56 = vcombine.high %v1226_v50, %v1226_v50 }
 0x109   :  { %v1264_v27 = vrot.slane %v1219_v51, %v8019_v16  ;;  %v1328_v44 = vcombine.high %v1219_v51, %v1219_v51  ;;  %v507_v39 = vcombine.high %v464_v25, %v471_v10  ;;  %v472_v22 = vcombine.low %v464_v25, %v471_v10 }
 0x10a   :  { %v1451_v11 = vrot.slane %v1430_v5, %v8019_v16  ;;  %v8202_v47 = vrot.slane %v1521_v18, %v8019_v16  ;;  %v8205_v49 = vrot.slane %v1522_v56, %v8019_v16  ;;  %v579_v32 = vcombine.low %v8190_v8, %v8193_v0 }
 0x10b   :  { %v1266_v6 = vcombine.low %v1257_v13, %v1264_v27  ;;  %v1286_v41 = vcombine.high %v1257_v13, %v1264_v27  ;;  %v1356_v50 = vrot.slane %v1328_v44, %v8019_v16  ;;  %478 = vst.msk [vmem:[#allocation2] ss:$2 sm:$0x7f] %vm8145_vm4, %v472_v22  ;;  %v8213_v25 = vrot.slane %v1285_v21, %v8019_v16 }
 0x10c   :  { %v1460_v51 = vcombine.low %v1451_v11, %v8197_v19  ;;  %v1480_v10 = vcombine.high %v1451_v11, %v8197_v19  ;;  %v1552_v5 = vcombine.low %v8202_v47, %v8205_v49  ;;  %v1576_v18 = vcombine.high %v8202_v47, %v8205_v49  ;;  %508 = vrot.lane.b32.xlu0 %v507_v39, %s7647_s12 }
 0x10d   :  { %v1358_v13 = vcombine.low %v8151_v14, %v1356_v50  ;;  %v1382_v56 = vcombine.high %v8151_v14, %v1356_v50  ;;  %v1300_v21 = vrot.slane %v1286_v41, %v8019_v16  ;;  %v8229_v19 = vrot.slane %v591_v12, %v8019_v16 }
 0x10e   :  { %v8235_v27 = vrot.slane %v592_v15, %v8019_v16  ;;  %v1273_v44 = vrot.slane %v1265_v20, %v8019_v16  ;;  %v1280_v39 = vrot.slane %v1266_v6, %v8019_v16  ;;  %v619_v14 = vcombine.high %v8190_v8, %v8193_v0  ;;  %v1787_v8 = vld [vmem:[%s11288_s3 + $0x498] sm:$0xff]  ;;  %v1688_v0 = vld [vmem:[%s11288_s3 + $0x180] sm:$0xff] }
 0x10f   :  { %v1301_v22 = vcombine.low %v8213_v25, %v1300_v21  ;;  %v1317_v11 = vcombine.high %v8213_v25, %v1300_v21  ;;  %v8244_v28 = vrot.slane %v1357_v61, %v8019_v16  ;;  %v8247_v60 = vrot.slane %v1358_v13, %v8019_v16 }
 0x110   :  { %520 = vrot.lane.b32.xlu0 %v519_v59, %s7648_s13  ;;  %v607_v53 = vcombine.low %v8229_v19, %v8235_v27  ;;  %v1309_v12 = vcombine.high %v1273_v44, %v1280_v39  ;;  %v1281_v62 = vcombine.low %v1273_v44, %v1280_v39  ;;  %v631_v15 = vcombine.high %v8229_v19, %v8235_v27  ;;  %v2133_v19 = vld [vmem:[%s11288_s3 + $0xf68] sm:$0xff] }
 0x111   :  { %1302 = vrot.lane.b32.xlu1 %v1301_v22, %s7646_s11  ;;  %v1373_v20 = vcombine.low %v8244_v28, %v8247_v60  ;;  %v8261_v61 = vrot.slane %v701_v34, %v8019_v16  ;;  %v8267_v59 = vrot.slane %v702_v42, %v8019_v16  ;;  %v8273_v6 = vrot.slane %v1381_v30, %v8019_v16 }
 0x112   :  { %1284 = vst.msk [vmem:[#allocation2 + $0x1] ss:$2 sm:$0x7f] %vm8145_vm4, %v1281_v62  ;;  %v8278_v41 = vrot.slane %v1382_v56, %v8019_v16  ;;  %v8284_v34 = vrot.slane %v681_v33, %v8019_v16  ;;  %v8290_v42 = vrot.slane %v682_v40, %v8019_v16  ;;  %v1405_v63 = vcombine.high %v8244_v28, %v8247_v60  ;;  %v1983_v62 = vld [vmem:[%s11288_s3 + $0xab8] sm:$0xff]  ;;  %v2034_v60 = vld [vmem:[%s11288_s3 + $0xc50] sm:$0xff] }
 0x113   :  { %v717_v2 = vcombine.low %v8261_v61, %v8267_v59  ;;  %v733_v30 = vcombine.high %v8261_v61, %v8267_v59  ;;  %v8302_v36 = vrot.slane %v773_v35, %v8019_v16  ;;  %v8308_v1 = vrot.slane %v774_v52, %v8019_v16  ;;  %v2277_v61 = vld [vmem:[%s11288_s3 + $0x13e8] sm:$0xff]  ;;  %v2375_v59 = vld [vmem:[%s11288_s3 + $0x16f8] sm:$0xff] }
 0x114   :  { %580 = vrot.lane.b32.xlu0 %v579_v32, %s7649_s14  ;;  %v1397_v23 = vcombine.low %v8273_v6, %v8278_v41  ;;  %v697_v29 = vcombine.low %v8284_v34, %v8290_v42  ;;  %v725_v33 = vcombine.high %v8284_v34, %v8290_v42  ;;  %v1413_v35 = vcombine.high %v8273_v6, %v8278_v41  ;;  %v2231_v34 = vld [vmem:[%s11288_s3 + $0x1278] sm:$0xff]  ;;  %v2329_v42 = vld [vmem:[%s11288_s3 + $0x1588] sm:$0xff] }
 0x115   :  { %1310 = vrot.lane.b32.xlu1 %v1309_v12, %s7647_s12  ;;  %v789_v40 = vcombine.low %v8302_v36, %v8308_v1  ;;  %v8326_v52 = vrot.slane %v1479_v46, %v8019_v16  ;;  %v8329_v32 = vrot.slane %v1480_v10, %v8019_v16  ;;  %v8335_v50 = vrot.slane %v797_v38, %v8019_v16  ;;  %v1885_v12 = vld [vmem:[%s11288_s3 + $0x7a8] sm:$0xff] }
 0x116   :  { %700 = vst.msk [vmem:[#allocation2 + $0x62] ss:$2 sm:$0x7f] %vm8145_vm4, %v697_v29  ;;  %v8343_v25 = vrot.slane %v798_v54, %v8019_v16  ;;  %v8349_v46 = vrot.slane %v1459_v45, %v8019_v16  ;;  %v8352_v10 = vrot.slane %v1460_v51, %v8019_v16  ;;  %v821_v37 = vcombine.high %v8302_v36, %v8308_v1  ;;  %v1642_v51 = vld [vmem:[%s11288_s3 + $0x10] sm:$0xff]  ;;  %v1936_v29 = vld [vmem:[%s11288_s3 + $0x940] sm:$0xff]  ;;  %v1841_v36 = vld [vmem:[%s11288_s3 + $0x648] sm:$0xff] }
 0x117   :  { %v1495_v24 = vcombine.low %v8326_v52, %v8329_v32  ;;  %v1511_v17 = vcombine.high %v8326_v52, %v8329_v32  ;;  %v8364_v38 = vrot.slane %v1551_v3, %v8019_v16  ;;  %v8367_v43 = vrot.slane %v1552_v5, %v8019_v16  ;;  %v1740_v5 = vld [vmem:[%s11288_s3 + $0x320] sm:$0xff]  ;;  %v1939_v1 = vld [vmem:[%s11288_s3 + $0x958] sm:$0xff] }
 0x118   :  { %608 = vrot.lane.b32.xlu0 %v607_v53, %s7650_s15  ;;  %v813_v54 = vcombine.low %v8335_v50, %v8343_v25  ;;  %v1475_v48 = vcombine.low %v8349_v46, %v8352_v10  ;;  %v1503_v31 = vcombine.high %v8349_v46, %v8352_v10  ;;  %v829_v45 = vcombine.high %v8335_v50, %v8343_v25  ;;  %v1689_v53 = vld [vmem:[%s11288_s3 + $0x188] sm:$0xff]  ;;  %v1644_v32 = vld [vmem:[%s11288_s3 + $0x20] sm:$0xff]  ;;  %v1938_v25 = vld [vmem:[%s11288_s3 + $0x950] sm:$0xff] }
 0x119   :  { %1318 = vrot.lane.b32.xlu1 %v1317_v11, %s7648_s13  ;;  %v1615_v3 = vld [vmem:[#allocation2] sm:$0xff]  ;;  %v1567_v13 = vcombine.low %v8364_v38, %v8367_v43  ;;  %v8391_v56 = vrot.slane %v1575_v57, %v8019_v16  ;;  %v8397_v21 = vrot.slane %v1576_v18, %v8019_v16  ;;  %v1599_v44 = vcombine.high %v8364_v38, %v8367_v43 }
 0x11a   :  { %v2463_v39 = vrot.slane %v1615_v3, %v8024_v26  ;;  %v2456_v22 = vcombine.high %v1615_v3, %v1615_v3  ;;  %1478 = vst.msk [vmem:[#allocation2 + $0x63] ss:$2 sm:$0x7f] %vm8145_vm4, %v1475_v48  ;;  %v6711_v47 = vpack.c.bf16 %v1740_v5, %v1642_v51  ;;  %v6713_v11 = vpack.c.bf16 %v1937_v55, %v1839_v4  ;;  %v2035_v3 = vld [vmem:[%s11288_s3 + $0xc58] sm:$0xff]  ;;  %v1884_v5 = vld [vmem:[%s11288_s3 + $0x7a0] sm:$0xff]  ;;  %vm8662_vm4 = vmand %vm586_vm1, %vm587_vm2 }
 0x11b   :  { %v1591_v16 = vcombine.low %v8391_v56, %v8397_v21  ;;  %v1607_v57 = vcombine.high %v8391_v56, %v8397_v21  ;;  %v7077_v48 = vpack.c.bf16 %v1787_v8, %v1689_v53  ;;  %v6717_v51 = vpack.c.bf16 %v2133_v19, %v2035_v3  ;;  %v2328_v55 = vld [vmem:[%s11288_s3 + $0x1580] sm:$0xff]  ;;  %v2233_v8 = vld [vmem:[%s11288_s3 + $0x1288] sm:$0xff]  ;;  %v2331_v56 = vld [vmem:[%s11288_s3 + $0x1598] sm:$0xff] }
 0x11c   :  { %620 = vrot.lane.b32.xlu0 %v619_v14, %s7651_s23  ;;  %v2471_v9 = vcombine.high %v2463_v39, %v2463_v39  ;;  %v8419_v49 = vrot.slane %v2456_v22, %v8024_v26  ;;  %v1786_v14 = vld [vmem:[%s11288_s3 + $0x490] sm:$0xff]  ;;  %v2179_v22 = vld [vmem:[%s11288_s3 + $0x10d8] sm:$0xff]  ;;  %v6721_v41 = vpack.c.bf16 %v2329_v42, %v2231_v34  ;;  %v1840_v50 = vld [vmem:[%s11288_s3 + $0x640] sm:$0xff]  ;;  %vm623_vm1 = vcmask 785408  }
 0x11d   :  { %1374 = vrot.lane.b32.xlu1 %v1373_v20, %s7649_s14  ;;  %v1838_v20 = vld [vmem:[%s11288_s3 + $0x630] sm:$0xff]  ;;  %v7079_v27 = vpack.c.bf16 %v1786_v14, %v1688_v0  ;;  %7078 = vmatprep.subr.bf16.mxu0 %v7077_v48  ;;  %v2036_v43 = vld [vmem:[%s11288_s3 + $0xc60] sm:$0xff]  ;;  %vm8692_vm2 = vmand %vm626_vm13, %vm627_vm14  ;;  %vm635_vm13 = vcmask 916480  }
 0x11e   :  { %3034 = vmatprep.mubr.f32.mxu1 %v2471_v9  ;;  %v2472_v18 = vcombine.high %v8419_v49, %v8419_v49  ;;  %v7089_v9 = vpack.c.bf16 %v2375_v59, %v2277_v61  ;;  %v2232_v0 = vld [vmem:[%s11288_s3 + $0x1280] sm:$0xff]  ;;  %v2330_v14 = vld [vmem:[%s11288_s3 + $0x1590] sm:$0xff]  ;;  %vm8714_vm14 = vmand %vm638_vm5, %vm639_vm6 }
 0x11f   :  { %3035 = vmatmul.mubr.f32.vlgmr.msra.gmra.mrb[16].mxu1 %v2463_v39  ;;  %7080 = vmatpush1.bf16.xpose.msra.mxu0 %v7079_v27  ;;  %v1982_v39 = vld [vmem:[%s11288_s3 + $0xab0] sm:$0xff] }
 0x120   :  { %632 = vrot.lane.b32.xlu0 %v631_v15, %s7652_s16  ;;  %6712 = vmatpush1.bf16.xpose.msra.mxu1 %v6711_v47  ;;  %v7081_v15 = vpack.c.bf16 %v1983_v62, %v1885_v12  ;;  %v7083_v28 = vpack.c.bf16 %v1982_v39, %v1884_v5  ;;  %v1743_v47 = vld [vmem:[%s11288_s3 + $0x338] sm:$0xff]  ;;  %v1745_v62 = vld [vmem:[%s11288_s3 + $0x348] sm:$0xff] }
 0x121   :  { %3104 = vmatprep.mubr.f32.mxu1 %v2472_v18  ;;  %1398 = vrot.lane.b32.xlu1 %v1397_v23, %s7650_s15  ;;  %v6715_v23 = vpack.c.bf16 %v1936_v29, %v1838_v20  ;;  %v2374_v18 = vld [vmem:[%s11288_s3 + $0x16f0] sm:$0xff]  ;;  %v1647_v12 = vld [vmem:[%s11288_s3 + $0x38] sm:$0xff]  ;;  %v6739_v20 = vpack.c.bf16 %v2330_v14, %v2232_v0  ;;  %v1940_v14 = vld [vmem:[%s11288_s3 + $0x960] sm:$0xff] }
 0x122   :  { %6714 = vmatprep.subr.bf16.mxu1 %v6713_v11  ;;  %7082 = vmatprep.subr.bf16.mxu0 %v7081_v15  ;;  %v1789_v11 = vld [vmem:[%s11288_s3 + $0x4a8] sm:$0xff]  ;;  %v6741_v29 = vpack.c.bf16 %v1745_v62, %v1647_v12  ;;  %v1842_v0 = vld [vmem:[%s11288_s3 + $0x650] sm:$0xff] }
 0x124   :  { %718 = vrot.lane.b32.xlu0 %v717_v2, %s7646_s11  ;;  %v2081_v2 = vld [vmem:[%s11288_s3 + $0xdc8] sm:$0xff] }
 0x125   :  { %1406 = vrot.lane.b32.xlu1 %v1405_v63, %s7651_s23  ;;  %v2132_v63 = vld [vmem:[%s11288_s3 + $0xf60] sm:$0xff]  ;;  %v7085_v4 = vpack.c.bf16 %v2179_v22, %v2081_v2 }
 0x126   :  { %v6719_v6 = vpack.c.bf16 %v2132_v63, %v2034_v60 }
 0x127   :  { %7084 = vmatpush1.bf16.xpose.msra.mxu0 %v7083_v28 }
 0x128   :  { %726 = vrot.lane.b32.xlu0 %v725_v33, %s7647_s12  ;;  %6716 = vmatpush1.bf16.xpose.msra.mxu1 %v6715_v23  ;;  %v2080_v33 = vld [vmem:[%s11288_s3 + $0xdc0] sm:$0xff]  ;;  %v1985_v23 = vld [vmem:[%s11288_s3 + $0xac8] sm:$0xff] }
 0x129   :  { %1414 = vrot.lane.b32.xlu1 %v1413_v35, %s7652_s16  ;;  %6718 = vmatprep.subr.bf16.mxu1 %v6717_v51  ;;  %v2178_v35 = vld [vmem:[%s11288_s3 + $0x10d0] sm:$0xff] }
 0x12a   :  { %7086 = vmatprep.subr.bf16.mxu0 %v7085_v4 }
 0x12c   :  { %734 = vrot.lane.b32.xlu0 %v733_v30, %s7648_s13  ;;  %v7087_v30 = vpack.c.bf16 %v2178_v35, %v2080_v33 }
 0x12d   :  { %1496 = vrot.lane.b32.xlu1 %v1495_v24, %s7646_s11  ;;  %v2230_v24 = vld [vmem:[%s11288_s3 + $0x1270] sm:$0xff] }
 0x12e   :  { %v6723_v46 = vpack.c.bf16 %v2328_v55, %v2230_v24 }
 0x12f   :  { %7088 = vmatpush1.bf16.xpose.msra.mxu0 %v7087_v30  ;;  %v1942_v30 = vld [vmem:[%s11288_s3 + $0x970] sm:$0xff] }
 0x130   :  { %790 = vrot.lane.b32.xlu0 %v789_v40, %s7649_s14  ;;  %6720 = vmatpush1.bf16.xpose.msra.mxu1 %v6719_v6  ;;  %v1645_v40 = vld [vmem:[%s11288_s3 + $0x28] sm:$0xff] }
 0x131   :  { %1504 = vrot.lane.b32.xlu1 %v1503_v31, %s7647_s12  ;;  %6722 = vmatprep.subr.bf16.mxu1 %v6721_v41  ;;  %v6725_v10 = vpack.c.bf16 %v1743_v47, %v1645_v40  ;;  %v2276_v31 = vld [vmem:[%s11288_s3 + $0x13e0] sm:$0xff] }
 0x132   :  { %7090 = vmatprep.subr.bf16.mxu0 %v7089_v9  ;;  %v7091_v52 = vpack.c.bf16 %v2374_v18, %v2276_v31  ;;  %v1646_v31 = vld [vmem:[%s11288_s3 + $0x30] sm:$0xff]  ;;  %v1744_v18 = vld [vmem:[%s11288_s3 + $0x340] sm:$0xff] }
 0x134   :  { %814 = vrot.lane.b32.xlu0 %v813_v54, %s7650_s15  ;;  %v1691_v54 = vld [vmem:[%s11288_s3 + $0x198] sm:$0xff] }
 0x135   :  { %1512 = vrot.lane.b32.xlu1 %v1511_v17, %s7648_s13  ;;  %v1742_v17 = vld [vmem:[%s11288_s3 + $0x330] sm:$0xff]  ;;  %v7093_v53 = vpack.c.bf16 %v1789_v11, %v1691_v54  ;;  %v2279_v54 = vld [vmem:[%s11288_s3 + $0x13f8] sm:$0xff] }
 0x137   :  { %7092 = vmatpush1.bf16.xpose.msra.mxu0 %v7091_v52 }
 0x138   :  { %822 = vrot.lane.b32.xlu0 %v821_v37, %s7651_s23  ;;  %6724 = vmatpush1.bf16.xpose.msra.mxu1 %v6723_v46  ;;  %v6727_v37 = vpack.c.bf16 %v1742_v17, %v1644_v32 }
 0x139   :  { %1568 = vrot.lane.b32.xlu1 %v1567_v13, %s7649_s14  ;;  %6726 = vmatprep.subr.bf16.mxu1 %v6725_v10  ;;  %v6729_v13 = vpack.c.bf16 %v1939_v1, %v1841_v36  ;;  %v1941_v36 = vld [vmem:[%s11288_s3 + $0x968] sm:$0xff] }
 0x13a   :  { %7094 = vmatprep.subr.bf16.mxu0 %v7093_v53  ;;  %v1843_v53 = vld [vmem:[%s11288_s3 + $0x658] sm:$0xff] }
 0x13c   :  { %830 = vrot.lane.b32.xlu0 %v829_v45, %s7652_s16  ;;  %v2037_v45 = vld [vmem:[%s11288_s3 + $0xc68] sm:$0xff] }
 0x13d   :  { %1592 = vrot.lane.b32.xlu1 %v1591_v16, %s7650_s15  ;;  %v2135_v16 = vld [vmem:[%s11288_s3 + $0xf78] sm:$0xff] }
 0x13e   :  { %v6733_v38 = vpack.c.bf16 %v2135_v16, %v2037_v45 }
 0x13f   :  { %3105 = vmatmul.mubr.f32.vlgmr.msra.gmra.mrb[16].mxu1 %v8419_v49  ;;  %v6731_v49 = vpack.c.bf16 %v1938_v25, %v1840_v50  ;;  %v6743_v50 = vpack.c.bf16 %v1744_v18, %v1646_v31 }
 0x140   :  { %6728 = vmatpush1.bf16.xpose.msra.mxu1 %v6727_v37 }
 0x141   :  { %1600 = vrot.lane.b32.xlu1 %v1599_v44, %s7651_s23  ;;  %6730 = vmatprep.subr.bf16.mxu1 %v6729_v13  ;;  %v2134_v44 = vld [vmem:[%s11288_s3 + $0xf70] sm:$0xff] }
 0x142   :  { %v6735_v21 = vpack.c.bf16 %v2134_v44, %v2036_v43 }
 0x145   :  { %1608 = vrot.lane.b32.xlu1 %v1607_v57, %s7652_s16  ;;  %v6737_v57 = vpack.c.bf16 %v2331_v56, %v2233_v8 }
 0x148   :  { %6732 = vmatpush1.bf16.xpose.msra.mxu1 %v6731_v49  ;;  %v6745_v49 = vpack.c.bf16 %v1941_v36, %v1843_v53  ;;  %v1690_v53 = vld [vmem:[%s11288_s3 + $0x190] sm:$0xff]  ;;  %v1788_v36 = vld [vmem:[%s11288_s3 + $0x4a0] sm:$0xff] }
 0x149   :  { %6734 = vmatprep.subr.bf16.mxu1 %v6733_v38  ;;  %v2376_v38 = vld [vmem:[%s11288_s3 + $0x1700] sm:$0xff] }
 0x150   :  { %6736 = vmatpush1.bf16.xpose.msra.mxu1 %v6735_v21 }
 0x151   :  { %6738 = vmatprep.subr.bf16.mxu1 %v6737_v57 }
 0x158   :  { %6740 = vmatpush1.bf16.xpose.msra.mxu1 %v6739_v20  ;;  %v2039_v20 = vld [vmem:[%s11288_s3 + $0xc78] sm:$0xff] }
 0x159   :  { %6742 = vmatprep.subr.bf16.mxu1 %v6741_v29  ;;  %v2137_v29 = vld [vmem:[%s11288_s3 + $0xf88] sm:$0xff] }
 0x17a   :  { %v497_v48 = vpop.permute.xlu0 %496 }
 0x17b   :  { %v498_v19 = vrot.slane %v497_v48, 7 }
 0x17d   :  { %v500_v27 = vsel %vm499_vm7, %v498_v19, %v497_v48 }
 0x17e   :  { %506 = vst.msk [vmem:[#allocation2 + $0xc] ss:$2 sm:$0x7f] %vm8634_vm8, %v500_v27  ;;  %v509_v15 = vpop.permute.xlu0 %508  ;;  %v6747_v27 = vpack.c.bf16 %v1940_v14, %v1842_v0 }
 0x17f   :  { %v510_v51 = vrot.slane %v509_v15, 7 }
 0x181   :  { %v512_v5 = vsel %vm511_vm11, %v510_v51, %v509_v15 }
 0x182   :  { %518 = vst.msk [vmem:[#allocation2 + $0x18] ss:$2 sm:$0x7f] %vm8643_vm12, %v512_v5  ;;  %v521_v39 = vpop.permute.xlu0 %520  ;;  %v6749_v5 = vpack.c.bf16 %v2137_v29, %v2039_v20 }
 0x183   :  { %v522_v22 = vrot.slane %v521_v39, 7  ;;  %v1303_v28 = vpop.permute.xlu1 %1302 }
 0x184   :  { %v1304_v60 = vrot.slane %v1303_v28, 7 }
 0x185   :  { %v524_v63 = vsel %vm523_vm15, %v522_v22, %v521_v39 }
 0x186   :  { %530 = vst.msk [vmem:[#allocation2 + $0x24] ss:$2 sm:$0x7f] %vm8652_vm0, %v524_v63  ;;  %v581_v4 = vpop.permute.xlu0 %580  ;;  %v1305_v34 = vsel %vm499_vm7, %v1304_v60, %v1303_v28 }
 0x187   :  { %v582_v6 = vrot.slane %v581_v4, 7  ;;  %1308 = vst.msk [vmem:[#allocation2 + $0xd] ss:$2 sm:$0x7f] %vm8634_vm8, %v1305_v34  ;;  %v1311_v41 = vpop.permute.xlu1 %1310  ;;  %v2038_v34 = vld [vmem:[%s11288_s3 + $0xc70] sm:$0xff] }
 0x188   :  { %v1312_v33 = vrot.slane %v1311_v41, 7 }
 0x189   :  { %v584_v35 = vsel %vm583_vm3, %v582_v6, %v581_v4  ;;  %v2136_v6 = vld [vmem:[%s11288_s3 + $0xf80] sm:$0xff] }
 0x18a   :  { %590 = vst.msk [vmem:[#allocation2 + $0x30] ss:$2 sm:$0x7f] %vm8662_vm4, %v584_v35  ;;  %v609_v61 = vpop.permute.xlu0 %608  ;;  %v1313_v59 = vsel %vm511_vm11, %v1312_v33, %v1311_v41  ;;  %v2235_v35 = vld [vmem:[%s11288_s3 + $0x1298] sm:$0xff] }
 0x18b   :  { %v610_v24 = vrot.slane %v609_v61, 7  ;;  %1316 = vst.msk [vmem:[#allocation2 + $0x19] ss:$2 sm:$0x7f] %vm8643_vm12, %v1313_v59  ;;  %v1319_v55 = vpop.permute.xlu1 %1318 }
 0x18c   :  { %v1320_v9 = vrot.slane %v1319_v55, 7 }
 0x18d   :  { %v612_v40 = vsel %vm611_vm9, %v610_v24, %v609_v61  ;;  %v2333_v61 = vld [vmem:[%s11288_s3 + $0x15a8] sm:$0xff] }
 0x18e   :  { %618 = vst.msk [vmem:[#allocation2 + $0x3c] ss:$2 sm:$0x7f] %vm8674_vm10, %v612_v40  ;;  %v621_v47 = vpop.permute.xlu0 %620  ;;  %v1321_v46 = vsel %vm523_vm15, %v1320_v9, %v1319_v55  ;;  %v1616_v10 = vld [vmem:[#allocation2 + $0x8] sm:$0xff]  ;;  %v6751_v55 = vpack.c.bf16 %v2136_v6, %v2038_v34  ;;  %v1943_v34 = vld [vmem:[%s11288_s3 + $0x978] sm:$0xff] }
 0x18f   :  { %v622_v11 = vrot.slane %v621_v47, 7  ;;  %1324 = vst.msk [vmem:[#allocation2 + $0x25] ss:$2 sm:$0x7f] %vm8652_vm0, %v1321_v46  ;;  %v1375_v52 = vpop.permute.xlu1 %1374  ;;  %v2480_v32 = vrot.slane %v1616_v10, %v8024_v26  ;;  %v2473_v17 = vcombine.high %v1616_v10, %v1616_v10  ;;  %v2083_v6 = vld [vmem:[%s11288_s3 + $0xdd8] sm:$0xff] }
 0x190   :  { %v1376_v1 = vrot.slane %v1375_v52, 7 }
 0x191   :  { %v624_v37 = vsel %vm623_vm1, %v622_v11, %v621_v47  ;;  %v2488_v13 = vcombine.high %v2480_v32, %v2480_v32  ;;  %v8709_v25 = vrot.slane %v2473_v17, %v8024_v26  ;;  %v6753_v47 = vpack.c.bf16 %v2333_v61, %v2235_v35  ;;  %v2234_v11 = vld [vmem:[%s11288_s3 + $0x1290] sm:$0xff] }
 0x192   :  { %630 = vst.msk [vmem:[#allocation2 + $0x48] ss:$2 sm:$0x7f] %vm8692_vm2, %v624_v37  ;;  %v633_v45 = vpop.permute.xlu0 %632  ;;  %v1377_v16 = vsel %vm583_vm3, %v1376_v1, %v1375_v52  ;;  %v2332_v52 = vld [vmem:[%s11288_s3 + $0x15a0] sm:$0xff] }
 0x193   :  { %v634_v58 = vrot.slane %v633_v45, 7  ;;  %1380 = vst.msk [vmem:[#allocation2 + $0x31] ss:$2 sm:$0x7f] %vm8662_vm4, %v1377_v16  ;;  %v1399_v43 = vpop.permute.xlu1 %1398  ;;  %3174 = vmatprep.mubr.f32.mxu1 %v2488_v13  ;;  %v2489_v44 = vcombine.high %v8709_v25, %v8709_v25  ;;  %v1747_v16 = vld [vmem:[%s11288_s3 + $0x358] sm:$0xff] }
 0x194   :  { %v1400_v8 = vrot.slane %v1399_v43, 7  ;;  %3175 = vmatmul.mubr.f32.vlgmr.msra.gmra.mrb[16].mxu1 %v2480_v32 }
 0x195   :  { %v636_v56 = vsel %vm635_vm13, %v634_v58, %v633_v45  ;;  %6744 = vmatpush1.bf16.xpose.msra.mxu1 %v6743_v50  ;;  %3244 = vmatprep.mubr.f32.mxu1 %v2489_v44  ;;  %v1649_v45 = vld [vmem:[%s11288_s3 + $0x48] sm:$0xff]  ;;  %v6755_v58 = vpack.c.bf16 %v2332_v52, %v2234_v11  ;;  %v2139_v52 = vld [vmem:[%s11288_s3 + $0xf98] sm:$0xff] }
 0x196   :  { %642 = vst.msk [vmem:[#allocation2 + $0x54] ss:$2 sm:$0x7f] %vm8714_vm14, %v636_v56  ;;  %v719_v21 = vpop.permute.xlu0 %718  ;;  %v1401_v57 = vsel %vm611_vm9, %v1400_v8, %v1399_v43  ;;  %6746 = vmatprep.subr.bf16.mxu1 %v6745_v49  ;;  %v1887_v43 = vld [vmem:[%s11288_s3 + $0x7b8] sm:$0xff]  ;;  %v7095_v56 = vpack.c.bf16 %v1788_v36, %v1690_v53  ;;  %v6757_v14 = vpack.c.bf16 %v1747_v16, %v1649_v45  ;;  %v2041_v11 = vld [vmem:[%s11288_s3 + $0xc88] sm:$0xff]  ;;  %v2278_v45 = vld [vmem:[%s11288_s3 + $0x13f0] sm:$0xff] }
 0x197   :  { %v720_v12 = vrot.slane %v719_v21, 7  ;;  %1404 = vst.msk [vmem:[#allocation2 + $0x3d] ss:$2 sm:$0x7f] %vm8674_vm10, %v1401_v57  ;;  %v1407_v62 = vpop.permute.xlu1 %1406  ;;  %v7097_v29 = vpack.c.bf16 %v1985_v23, %v1887_v43  ;;  %v2237_v16 = vld [vmem:[%s11288_s3 + $0x12a8] sm:$0xff]  ;;  %v1791_v43 = vld [vmem:[%s11288_s3 + $0x4b8] sm:$0xff] }
 0x198   :  { %v1408_v48 = vrot.slane %v1407_v62, 7 }
 0x199   :  { %v721_v19 = vsel %vm499_vm7, %v720_v12, %v719_v21 }
 0x19a   :  { %724 = vst.msk [vmem:[#allocation2 + $0x6e] ss:$2 sm:$0x7f] %vm8634_vm8, %v721_v19  ;;  %v727_v15 = vpop.permute.xlu0 %726  ;;  %v1409_v51 = vsel %vm623_vm1, %v1408_v48, %v1407_v62  ;;  %v8812_v19 = vld [vmem:[#allocation2 + $0x10] sm:$0xff] }
 0x19b   :  { %v728_v39 = vrot.slane %v727_v15, 7  ;;  %1412 = vst.msk [vmem:[#allocation2 + $0x49] ss:$2 sm:$0x7f] %vm8692_vm2, %v1409_v51  ;;  %v1415_v22 = vpop.permute.xlu1 %1414  ;;  %v1648_v51 = vld [vmem:[%s11288_s3 + $0x40] sm:$0xff] }
 0x19c   :  { %v1416_v28 = vrot.slane %v1415_v22, 7 }
 0x19d   :  { %v729_v60 = vsel %vm511_vm11, %v728_v39, %v727_v15  ;;  %6748 = vmatpush1.bf16.xpose.msra.mxu1 %v6747_v27  ;;  %v1886_v39 = vld [vmem:[%s11288_s3 + $0x7b0] sm:$0xff] }
 0x19e   :  { %732 = vst.msk [vmem:[#allocation2 + $0x7a] ss:$2 sm:$0x7f] %vm8643_vm12, %v729_v60  ;;  %v735_v63 = vpop.permute.xlu0 %734  ;;  %v1417_v4 = vsel %vm635_vm13, %v1416_v28, %v1415_v22  ;;  %6750 = vmatprep.subr.bf16.mxu1 %v6749_v5  ;;  %v1746_v5 = vld [vmem:[%s11288_s3 + $0x350] sm:$0xff]  ;;  %v8831_v60 = vrot.slane %v8812_v19, %v8024_v26 }
 0x19f   :  { %v736_v41 = vrot.slane %v735_v63, 7  ;;  %1420 = vst.msk [vmem:[#allocation2 + $0x55] ss:$2 sm:$0x7f] %vm8714_vm14, %v1417_v4  ;;  %v1497_v33 = vpop.permute.xlu1 %1496  ;;  %v1845_v4 = vld [vmem:[%s11288_s3 + $0x668] sm:$0xff]  ;;  %v6759_v35 = vpack.c.bf16 %v1746_v5, %v1648_v51 }
 0x1a0   :  { %v1498_v59 = vrot.slane %v1497_v33, 7 }
 0x1a1   :  { %v737_v24 = vsel %vm523_vm15, %v736_v41, %v735_v63  ;;  %v1984_v63 = vld [vmem:[%s11288_s3 + $0xac0] sm:$0xff]  ;;  %v2181_v41 = vld [vmem:[%s11288_s3 + $0x10e8] sm:$0xff] }
 0x1a2   :  { %740 = vst.msk [vmem:[#allocation2 + $0x86] ss:$2 sm:$0x7f] %vm8652_vm0, %v737_v24  ;;  %v791_v9 = vpop.permute.xlu0 %790  ;;  %v1499_v40 = vsel %vm499_vm7, %v1498_v59, %v1497_v33  ;;  %v7099_v59 = vpack.c.bf16 %v1984_v63, %v1886_v39  ;;  %v6761_v24 = vpack.c.bf16 %v1943_v34, %v1845_v4  ;;  %v1650_v63 = vld [vmem:[%s11288_s3 + $0x50] sm:$0xff]  ;;  %v1748_v4 = vld [vmem:[%s11288_s3 + $0x360] sm:$0xff]  ;;  %vm7479_vm7 = vmpackc.low %vm583_vm3, %vm583_vm3 }
 0x1a3   :  { %v792_v46 = vrot.slane %v791_v9, 7  ;;  %1502 = vst.msk [vmem:[#allocation2 + $0x6f] ss:$2 sm:$0x7f] %vm8634_vm8, %v1499_v40  ;;  %v1505_v10 = vpop.permute.xlu1 %1504  ;;  %v7101_v40 = vpack.c.bf16 %v2181_v41, %v2083_v6  ;;  %v1945_v6 = vld [vmem:[%s11288_s3 + $0x988] sm:$0xff]  ;;  %vm7654_vm8 = vmmov 0  }
 0x1a4   :  { %v1506_v31 = vrot.slane %v1505_v10, 7  ;;  %v2085_v41 = vld [vmem:[%s11288_s3 + $0xde8] sm:$0xff] }
 0x1a5   :  { %v793_v18 = vsel %vm583_vm3, %v792_v46, %v791_v9  ;;  %6752 = vmatpush1.bf16.xpose.msra.mxu1 %v6751_v55  ;;  %v2505_v9 = vcombine.high %v8831_v60, %v8831_v60 }
 0x1a6   :  { %796 = vst.msk [vmem:[#allocation2 + $0x92] ss:$2 sm:$0x7f] %vm8662_vm4, %v793_v18  ;;  %v815_v32 = vpop.permute.xlu0 %814  ;;  %v1507_v3 = vsel %vm511_vm11, %v1506_v31, %v1505_v10  ;;  %6754 = vmatprep.subr.bf16.mxu1 %v6753_v47  ;;  %v1627_v17 = vld [vmem:[#allocation2 + $0x60] sm:$0xff]  ;;  %v2082_v31 = vld [vmem:[%s11288_s3 + $0xdd0] sm:$0xff]  ;;  %vm6489_vm11 = vcmask 74752  }
 0x1a7   :  { %v816_v1 = vrot.slane %v815_v32, 7  ;;  %1510 = vst.msk [vmem:[#allocation2 + $0x7b] ss:$2 sm:$0x7f] %vm8643_vm12, %v1507_v3  ;;  %v1513_v37 = vpop.permute.xlu1 %1512  ;;  %v2667_v13 = vrot.slane %v1627_v17, %v8024_v26  ;;  %v2660_v50 = vcombine.high %v1627_v17, %v1627_v17  ;;  %v1844_v10 = vld [vmem:[%s11288_s3 + $0x660] sm:$0xff]  ;;  %v2377_v3 = vld [vmem:[%s11288_s3 + $0x1708] sm:$0xff] }
 0x1a8   :  { %v1514_v49 = vrot.slane %v1513_v37, 7  ;;  %v2180_v18 = vld [vmem:[%s11288_s3 + $0x10e0] sm:$0xff]  ;;  %v6763_v17 = vpack.c.bf16 %v1942_v30, %v1844_v10  ;;  %v2141_v10 = vld [vmem:[%s11288_s3 + $0xfa8] sm:$0xff] }
 0x1a9   :  { %v817_v44 = vsel %vm611_vm9, %v816_v1, %v815_v32  ;;  %v2675_v8 = vcombine.high %v2667_v13, %v2667_v13  ;;  %v8803_v21 = vrot.slane %v2660_v50, %v8024_v26  ;;  %v7103_v36 = vpack.c.bf16 %v2180_v18, %v2082_v31  ;;  %v2138_v50 = vld [vmem:[%s11288_s3 + $0xf90] sm:$0xff]  ;;  %v2281_v30 = vld [vmem:[%s11288_s3 + $0x1408] sm:$0xff]  ;;  %v2379_v31 = vld [vmem:[%s11288_s3 + $0x1718] sm:$0xff] }
 0x1aa   :  { %820 = vst.msk [vmem:[#allocation2 + $0x9e] ss:$2 sm:$0x7f] %vm8674_vm10, %v817_v44  ;;  %v823_v57 = vpop.permute.xlu0 %822  ;;  %v1515_v0 = vsel %vm523_vm15, %v1514_v49, %v1513_v37  ;;  %v6765_v1 = vpack.c.bf16 %v2139_v52, %v2041_v11  ;;  %v7105_v37 = vpack.c.bf16 %v2377_v3, %v2279_v54  ;;  %v2335_v49 = vld [vmem:[%s11288_s3 + $0x15b8] sm:$0xff]  ;;  %v7107_v44 = vpack.c.bf16 %v2376_v38, %v2278_v45  ;;  %v2140_v54 = vld [vmem:[%s11288_s3 + $0xfa0] sm:$0xff] }
 0x1ab   :  { %v824_v12 = vrot.slane %v823_v57, 7  ;;  %1518 = vst.msk [vmem:[#allocation2 + $0x87] ss:$2 sm:$0x7f] %vm8652_vm0, %v1515_v0  ;;  %v1569_v62 = vpop.permute.xlu1 %1568  ;;  %4714 = vmatprep.mubr.f32.mxu0 %v2675_v8  ;;  %v2676_v20 = vcombine.high %v8803_v21, %v8803_v21  ;;  %v6769_v8 = vpack.c.bf16 %v2335_v49, %v2237_v16  ;;  %v2236_v0 = vld [vmem:[%s11288_s3 + $0x12a0] sm:$0xff]  ;;  %v7121_v52 = vpack.c.bf16 %v2379_v31, %v2281_v30  ;;  %v2238_v49 = vld [vmem:[%s11288_s3 + $0x12b0] sm:$0xff] }
 0x1ac   :  { %v1570_v48 = vrot.slane %v1569_v62, 7  ;;  %4715 = vmatmul.mubr.f32.vlgmr.msra.gmra.mrb[12].mxu0 %v2667_v13  ;;  %v2040_v13 = vld [vmem:[%s11288_s3 + $0xc80] sm:$0xff]  ;;  %v2282_v30 = vld [vmem:[%s11288_s3 + $0x1410] sm:$0xff] }
 0x1ad   :  { %v825_v27 = vsel %vm623_vm1, %v824_v12, %v823_v57  ;;  %6756 = vmatpush1.bf16.xpose.msra.mxu1 %v6755_v58  ;;  %7096 = vmatpush1.bf16.xpose.msra.mxu0 %v7095_v56  ;;  %v1693_v58 = vld [vmem:[%s11288_s3 + $0x1a8] sm:$0xff]  ;;  %v6767_v23 = vpack.c.bf16 %v2138_v50, %v2040_v13  ;;  %v1692_v12 = vld [vmem:[%s11288_s3 + $0x1a0] sm:$0xff] }
 0x1ae   :  { %828 = vst.msk [vmem:[#allocation2 + $0xaa] ss:$2 sm:$0x7f] %vm8692_vm2, %v825_v27  ;;  %v831_v15 = vpop.permute.xlu0 %830  ;;  %v1571_v2 = vsel %vm583_vm3, %v1570_v48, %v1569_v62  ;;  %4784 = vmatprep.mubr.f32.mxu0 %v2676_v20  ;;  %6758 = vmatprep.subr.bf16.mxu1 %v6757_v14  ;;  %v7109_v56 = vpack.c.bf16 %v1791_v43, %v1693_v58  ;;  %v8911_v57 = vld [vmem:[#allocation2 + $0x68] sm:$0xff]  ;;  %v2334_v14 = vld [vmem:[%s11288_s3 + $0x15b0] sm:$0xff]  ;;  %v1651_v20 = vld [vmem:[%s11288_s3 + $0x58] sm:$0xff] }
 0x1af   :  { %v832_v22 = vrot.slane %v831_v15, 7  ;;  %1574 = vst.msk [vmem:[#allocation2 + $0x93] ss:$2 sm:$0x7f] %vm8662_vm4, %v1571_v2  ;;  %v1593_v28 = vpop.permute.xlu1 %1592  ;;  %7098 = vmatprep.subr.bf16.mxu0 %v7097_v29  ;;  %v1790_v62 = vld [vmem:[%s11288_s3 + $0x4b0] sm:$0xff]  ;;  %v8930_v29 = vrot.slane %v8911_v57, %v8024_v26  ;;  %v1749_v48 = vld [vmem:[%s11288_s3 + $0x368] sm:$0xff]  ;;  %v6771_v2 = vpack.c.bf16 %v2334_v14, %v2236_v0  ;;  %v2677_v16 = vcombine.high %v8911_v57, %v8911_v57 }
 0x1b0   :  { %v1594_v42 = vrot.slane %v1593_v28, 7  ;;  %v1889_v27 = vld [vmem:[%s11288_s3 + $0x7c8] sm:$0xff]  ;;  %v7111_v51 = vpack.c.bf16 %v1790_v62, %v1692_v12  ;;  %v6773_v5 = vpack.c.bf16 %v1749_v48, %v1651_v20  ;;  %v2280_v3 = vld [vmem:[%s11288_s3 + $0x1400] sm:$0xff]  ;;  %v1694_v43 = vld [vmem:[%s11288_s3 + $0x1b0] sm:$0xff] }
 0x1b1   :  { %v833_v33 = vsel %vm635_vm13, %v832_v22, %v831_v15  ;;  %v1987_v15 = vld [vmem:[%s11288_s3 + $0xad8] sm:$0xff]  ;;  %v2490_v22 = vcombine.high %v8812_v19, %v8812_v19  ;;  %v1888_v19 = vld [vmem:[%s11288_s3 + $0x7c0] sm:$0xff]  ;;  %v1989_v0 = vld [vmem:[%s11288_s3 + $0xae8] sm:$0xff] }
 0x1b2   :  { %836 = vst.msk [vmem:[#allocation2 + $0xb6] ss:$2 sm:$0x7f] %vm8714_vm14, %v833_v33  ;;  %v1595_v61 = vsel %vm611_vm9, %v1594_v42, %v1593_v28  ;;  %v7113_v39 = vpack.c.bf16 %v1987_v15, %v1889_v27  ;;  %v2692_v28 = vcombine.high %v8930_v29, %v8930_v29  ;;  %v1847_v42 = vld [vmem:[%s11288_s3 + $0x678] sm:$0xff]  ;;  %v2336_v58 = vld [vmem:[%s11288_s3 + $0x15c0] sm:$0xff] }
 0x1b3   :  { %1598 = vst.msk [vmem:[#allocation2 + $0x9f] ss:$2 sm:$0x7f] %vm8674_vm10, %v1595_v61  ;;  %v1601_v55 = vpop.permute.xlu1 %1600  ;;  %v8956_v34 = vrot.slane %v2490_v22, %v8024_v26  ;;  %v2183_v33 = vld [vmem:[%s11288_s3 + $0x10f8] sm:$0xff]  ;;  %v6787_v14 = vpack.c.bf16 %v2336_v58, %v2238_v49  ;;  %v1652_v15 = vld [vmem:[%s11288_s3 + $0x60] sm:$0xff] }
 0x1b4   :  { %v1602_v47 = vrot.slane %v1601_v55, 7  ;;  %3245 = vmatmul.mubr.f32.vlgmr.msra.gmra.mrb[16].mxu1 %v8709_v25  ;;  %v1891_v57 = vld [vmem:[%s11288_s3 + $0x7d8] sm:$0xff]  ;;  %v2380_v31 = vld [vmem:[%s11288_s3 + $0x1720] sm:$0xff] }
 0x1b5   :  { %6760 = vmatpush1.bf16.xpose.msra.mxu1 %v6759_v35  ;;  %3314 = vmatprep.mubr.f32.mxu1 %v2505_v9  ;;  %v6775_v35 = vpack.c.bf16 %v1748_v4, %v1650_v63  ;;  %v1846_v9 = vld [vmem:[%s11288_s3 + $0x670] sm:$0xff]  ;;  %v7129_v20 = vpack.c.bf16 %v1989_v0, %v1891_v57  ;;  %v9055_v27 = vld [vmem:[#allocation2 + $0x18] sm:$0xff]  ;;  %v2185_v63 = vld [vmem:[%s11288_s3 + $0x1108] sm:$0xff] }
 0x1b6   :  { %v1603_v46 = vsel %vm623_vm1, %v1602_v47, %v1601_v55  ;;  %7100 = vmatpush1.bf16.xpose.msra.mxu0 %v7099_v59  ;;  %6762 = vmatprep.subr.bf16.mxu1 %v6761_v24  ;;  %v6777_v59 = vpack.c.bf16 %v1945_v6, %v1847_v42  ;;  %v2506_v24 = vcombine.high %v8956_v34, %v8956_v34  ;;  %v2084_v47 = vld [vmem:[%s11288_s3 + $0xde0] sm:$0xff]  ;;  %v1947_v22 = vld [vmem:[%s11288_s3 + $0x998] sm:$0xff]  ;;  %v1654_v0 = vld [vmem:[%s11288_s3 + $0x70] sm:$0xff] }
 0x1b7   :  { %1606 = vst.msk [vmem:[#allocation2 + $0xab] ss:$2 sm:$0x7f] %vm8692_vm2, %v1603_v46  ;;  %v1609_v25 = vpop.permute.xlu1 %1608  ;;  %7102 = vmatprep.subr.bf16.mxu0 %v7101_v40  ;;  %v7117_v55 = vpack.c.bf16 %v2183_v33, %v2085_v41  ;;  %v1944_v40 = vld [vmem:[%s11288_s3 + $0x980] sm:$0xff]  ;;  %v2043_v46 = vld [vmem:[%s11288_s3 + $0xc98] sm:$0xff]  ;;  %v1946_v33 = vld [vmem:[%s11288_s3 + $0x990] sm:$0xff] }
 0x1b8   :  { %v1610_v32 = vrot.slane %v1609_v25, 7  ;;  %v6781_v11 = vpack.c.bf16 %v2141_v10, %v2043_v46  ;;  %v1848_v41 = vld [vmem:[%s11288_s3 + $0x680] sm:$0xff]  ;;  %v2142_v10 = vld [vmem:[%s11288_s3 + $0xfb0] sm:$0xff]  ;;  %v1991_v49 = vld [vmem:[%s11288_s3 + $0xaf8] sm:$0xff] }
 0x1b9   :  { %v2044_v46 = vld [vmem:[%s11288_s3 + $0xca0] sm:$0xff] }
 0x1ba   :  { %v1611_v53 = vsel %vm635_vm13, %v1610_v32, %v1609_v25  ;;  %v6779_v25 = vpack.c.bf16 %v1944_v40, %v1846_v9  ;;  %v2042_v32 = vld [vmem:[%s11288_s3 + $0xc90] sm:$0xff]  ;;  %v6795_v9 = vpack.c.bf16 %v1946_v33, %v1848_v41 }
 0x1bb   :  { %1614 = vst.msk [vmem:[#allocation2 + $0xb7] ss:$2 sm:$0x7f] %vm8714_vm14, %v1611_v53  ;;  %v2239_v53 = vld [vmem:[%s11288_s3 + $0x12b8] sm:$0xff]  ;;  %v6783_v13 = vpack.c.bf16 %v2140_v54, %v2042_v32  ;;  %v6799_v32 = vpack.c.bf16 %v2142_v10, %v2044_v46  ;;  %v7139_v54 = vpack.c.bf16 %v2380_v31, %v2282_v30 }
 0x1bd   :  { %6764 = vmatpush1.bf16.xpose.msra.mxu1 %v6763_v17  ;;  %v2378_v17 = vld [vmem:[%s11288_s3 + $0x1710] sm:$0xff] }
 0x1be   :  { %7104 = vmatpush1.bf16.xpose.msra.mxu0 %v7103_v36  ;;  %6766 = vmatprep.subr.bf16.mxu1 %v6765_v1  ;;  %v2337_v36 = vld [vmem:[%s11288_s3 + $0x15c8] sm:$0xff]  ;;  %v1695_v1 = vld [vmem:[%s11288_s3 + $0x1b8] sm:$0xff]  ;;  %v7123_v50 = vpack.c.bf16 %v2378_v17, %v2280_v3 }
 0x1bf   :  { %7106 = vmatprep.subr.bf16.mxu0 %v7105_v37  ;;  %v1793_v37 = vld [vmem:[%s11288_s3 + $0x4c8] sm:$0xff]  ;;  %v6785_v45 = vpack.c.bf16 %v2337_v36, %v2239_v53  ;;  %v9137_v53 = vld [vmem:[#allocation2 + $0x70] sm:$0xff]  ;;  %v2240_v36 = vld [vmem:[%s11288_s3 + $0x12c0] sm:$0xff] }
 0x1c0   :  { %v7125_v38 = vpack.c.bf16 %v1793_v37, %v1695_v1  ;;  %v2338_v1 = vld [vmem:[%s11288_s3 + $0x15d0] sm:$0xff]  ;;  %v1696_v37 = vld [vmem:[%s11288_s3 + $0x1c0] sm:$0xff] }
 0x1c1   :  { %v6803_v58 = vpack.c.bf16 %v2338_v1, %v2240_v36  ;;  %v1993_v36 = vld [vmem:[%s11288_s3 + $0xb08] sm:$0xff] }
 0x1c5   :  { %6768 = vmatpush1.bf16.xpose.msra.mxu1 %v6767_v23  ;;  %v1792_v23 = vld [vmem:[%s11288_s3 + $0x4c0] sm:$0xff] }
 0x1c6   :  { %7108 = vmatpush1.bf16.xpose.msra.mxu0 %v7107_v44  ;;  %6770 = vmatprep.subr.bf16.mxu1 %v6769_v8  ;;  %v1653_v44 = vld [vmem:[%s11288_s3 + $0x68] sm:$0xff]  ;;  %v9042_v8 = vrot.slane %v2677_v16, %v8024_v26  ;;  %v7127_v12 = vpack.c.bf16 %v1792_v23, %v1694_v43 }
 0x1c7   :  { %7110 = vmatprep.subr.bf16.mxu0 %v7109_v56  ;;  %v1751_v56 = vld [vmem:[%s11288_s3 + $0x378] sm:$0xff]  ;;  %v1893_v16 = vld [vmem:[%s11288_s3 + $0x7e8] sm:$0xff] }
 0x1c8   :  { %v6789_v62 = vpack.c.bf16 %v1751_v56, %v1653_v44  ;;  %v2693_v48 = vcombine.high %v9042_v8, %v9042_v8  ;;  %v7145_v44 = vpack.c.bf16 %v1991_v49, %v1893_v16  ;;  %v2507_v56 = vcombine.high %v9055_v27, %v9055_v27  ;;  %v9281_v16 = vld [vmem:[#allocation2 + $0x20] sm:$0xff] }
 0x1c9   :  { %v1656_v49 = vld [vmem:[%s11288_s3 + $0x80] sm:$0xff] }
 0x1cd   :  { %4785 = vmatmul.mubr.f32.vlgmr.msra.gmra.mrb[12].mxu0 %v8803_v21  ;;  %6772 = vmatpush1.bf16.xpose.msra.mxu1 %v6771_v2  ;;  %v1986_v21 = vld [vmem:[%s11288_s3 + $0xad0] sm:$0xff] }
 0x1ce   :  { %7112 = vmatpush1.bf16.xpose.msra.mxu0 %v7111_v51  ;;  %4854 = vmatprep.mubr.f32.mxu0 %v2692_v28  ;;  %v7115_v61 = vpack.c.bf16 %v1986_v21, %v1888_v19  ;;  %v1750_v2 = vld [vmem:[%s11288_s3 + $0x370] sm:$0xff]  ;;  %v2087_v28 = vld [vmem:[%s11288_s3 + $0xdf8] sm:$0xff] }
 0x1cf   :  { %6774 = vmatprep.subr.bf16.mxu1 %v6773_v5  ;;  %7114 = vmatprep.subr.bf16.mxu0 %v7113_v39  ;;  %v1890_v51 = vld [vmem:[%s11288_s3 + $0x7d0] sm:$0xff]  ;;  %v1988_v5 = vld [vmem:[%s11288_s3 + $0xae0] sm:$0xff]  ;;  %v1849_v39 = vld [vmem:[%s11288_s3 + $0x688] sm:$0xff]  ;;  %v6791_v4 = vpack.c.bf16 %v1750_v2, %v1652_v15  ;;  %v7133_v6 = vpack.c.bf16 %v2185_v63, %v2087_v28 }
 0x1d0   :  { %v7131_v19 = vpack.c.bf16 %v1988_v5, %v1890_v51  ;;  %v6793_v21 = vpack.c.bf16 %v1947_v22, %v1849_v39  ;;  %v2187_v15 = vld [vmem:[%s11288_s3 + $0x1118] sm:$0xff]  ;;  %v1850_v28 = vld [vmem:[%s11288_s3 + $0x690] sm:$0xff]  ;;  %v1948_v63 = vld [vmem:[%s11288_s3 + $0x9a0] sm:$0xff] }
 0x1d1   :  { %v6811_v41 = vpack.c.bf16 %v1948_v63, %v1850_v28 }
 0x1d4   :  { %3315 = vmatmul.mubr.f32.vlgmr.msra.gmra.mrb[16].mxu1 %v8831_v60  ;;  %v2182_v60 = vld [vmem:[%s11288_s3 + $0x10f0] sm:$0xff] }
 0x1d5   :  { %6776 = vmatpush1.bf16.xpose.msra.mxu1 %v6775_v35  ;;  %3384 = vmatprep.mubr.f32.mxu1 %v2506_v24  ;;  %v7119_v18 = vpack.c.bf16 %v2182_v60, %v2084_v47  ;;  %v2086_v35 = vld [vmem:[%s11288_s3 + $0xdf0] sm:$0xff]  ;;  %v2283_v24 = vld [vmem:[%s11288_s3 + $0x1418] sm:$0xff] }
 0x1d6   :  { %7116 = vmatpush1.bf16.xpose.msra.mxu0 %v7115_v61  ;;  %6778 = vmatprep.subr.bf16.mxu1 %v6777_v59  ;;  %v2045_v61 = vld [vmem:[%s11288_s3 + $0xca8] sm:$0xff]  ;;  %v2143_v59 = vld [vmem:[%s11288_s3 + $0xfb8] sm:$0xff] }
 0x1d7   :  { %7118 = vmatprep.subr.bf16.mxu0 %v7117_v55  ;;  %v2381_v55 = vld [vmem:[%s11288_s3 + $0x1728] sm:$0xff]  ;;  %v6797_v47 = vpack.c.bf16 %v2143_v59, %v2045_v61  ;;  %v2046_v61 = vld [vmem:[%s11288_s3 + $0xcb0] sm:$0xff]  ;;  %v2144_v59 = vld [vmem:[%s11288_s3 + $0xfc0] sm:$0xff] }
 0x1d8   :  { %v7137_v60 = vpack.c.bf16 %v2381_v55, %v2283_v24  ;;  %v2284_v24 = vld [vmem:[%s11288_s3 + $0x1420] sm:$0xff]  ;;  %v2382_v55 = vld [vmem:[%s11288_s3 + $0x1730] sm:$0xff]  ;;  %v6815_v46 = vpack.c.bf16 %v2144_v59, %v2046_v61 }
 0x1d9   :  { %v7155_v10 = vpack.c.bf16 %v2382_v55, %v2284_v24 }
 0x1dd   :  { %6780 = vmatpush1.bf16.xpose.msra.mxu1 %v6779_v25  ;;  %v2241_v25 = vld [vmem:[%s11288_s3 + $0x12c8] sm:$0xff] }
 0x1de   :  { %7120 = vmatpush1.bf16.xpose.msra.mxu0 %v7119_v18  ;;  %6782 = vmatprep.subr.bf16.mxu1 %v6781_v11  ;;  %v2339_v18 = vld [vmem:[%s11288_s3 + $0x15d8] sm:$0xff]  ;;  %v1697_v11 = vld [vmem:[%s11288_s3 + $0x1c8] sm:$0xff] }
 0x1df   :  { %7122 = vmatprep.subr.bf16.mxu0 %v7121_v52  ;;  %v1795_v52 = vld [vmem:[%s11288_s3 + $0x4d8] sm:$0xff]  ;;  %v6801_v3 = vpack.c.bf16 %v2339_v18, %v2241_v25  ;;  %v2694_v25 = vcombine.high %v9137_v53, %v9137_v53  ;;  %v2242_v18 = vld [vmem:[%s11288_s3 + $0x12d0] sm:$0xff] }
 0x1e0   :  { %v7141_v17 = vpack.c.bf16 %v1795_v52, %v1697_v11  ;;  %v2340_v11 = vld [vmem:[%s11288_s3 + $0x15e0] sm:$0xff]  ;;  %v1698_v52 = vld [vmem:[%s11288_s3 + $0x1d0] sm:$0xff] }
 0x1e1   :  { %v6819_v1 = vpack.c.bf16 %v2340_v11, %v2242_v18  ;;  %v1995_v18 = vld [vmem:[%s11288_s3 + $0xb18] sm:$0xff] }
 0x1e5   :  { %6784 = vmatpush1.bf16.xpose.msra.mxu1 %v6783_v13  ;;  %v1794_v13 = vld [vmem:[%s11288_s3 + $0x4d0] sm:$0xff] }
 0x1e6   :  { %7124 = vmatpush1.bf16.xpose.msra.mxu0 %v7123_v50  ;;  %6786 = vmatprep.subr.bf16.mxu1 %v6785_v45  ;;  %v1655_v50 = vld [vmem:[%s11288_s3 + $0x78] sm:$0xff]  ;;  %v9156_v45 = vrot.slane %v9137_v53, %v8024_v26  ;;  %v7143_v43 = vpack.c.bf16 %v1794_v13, %v1696_v37 }
 0x1e7   :  { %7126 = vmatprep.subr.bf16.mxu0 %v7125_v38  ;;  %v1753_v38 = vld [vmem:[%s11288_s3 + $0x388] sm:$0xff]  ;;  %v1895_v53 = vld [vmem:[%s11288_s3 + $0x7f8] sm:$0xff] }
 0x1e8   :  { %v6805_v23 = vpack.c.bf16 %v1753_v38, %v1655_v50  ;;  %v2709_v57 = vcombine.high %v9156_v45, %v9156_v45  ;;  %v7161_v50 = vpack.c.bf16 %v1993_v36, %v1895_v53  ;;  %v1658_v36 = vld [vmem:[%s11288_s3 + $0x90] sm:$0xff] }
 0x1ed   :  { %4855 = vmatmul.mubr.f32.vlgmr.msra.gmra.mrb[12].mxu0 %v8930_v29  ;;  %6788 = vmatpush1.bf16.xpose.msra.mxu1 %v6787_v14  ;;  %v9069_v29 = vrot.slane %v9055_v27, %v8024_v26  ;;  %v1752_v14 = vld [vmem:[%s11288_s3 + $0x380] sm:$0xff]  ;;  %v2089_v27 = vld [vmem:[%s11288_s3 + $0xe08] sm:$0xff] }
 0x1ee   :  { %7128 = vmatpush1.bf16.xpose.msra.mxu0 %v7127_v12  ;;  %4924 = vmatprep.mubr.f32.mxu0 %v2693_v48  ;;  %v1892_v12 = vld [vmem:[%s11288_s3 + $0x7e0] sm:$0xff]  ;;  %v1949_v48 = vld [vmem:[%s11288_s3 + $0x9a8] sm:$0xff]  ;;  %v6807_v2 = vpack.c.bf16 %v1752_v14, %v1654_v0  ;;  %v7149_v22 = vpack.c.bf16 %v2187_v15, %v2089_v27  ;;  %v1950_v15 = vld [vmem:[%s11288_s3 + $0x9b0] sm:$0xff] }
 0x1ef   :  { %6790 = vmatprep.subr.bf16.mxu1 %v6789_v62  ;;  %7130 = vmatprep.subr.bf16.mxu0 %v7129_v20  ;;  %v2522_v42 = vcombine.high %v9069_v29, %v9069_v29  ;;  %v9182_v62 = vrot.slane %v2507_v56, %v8024_v26  ;;  %v1851_v20 = vld [vmem:[%s11288_s3 + $0x698] sm:$0xff]  ;;  %v2189_v0 = vld [vmem:[%s11288_s3 + $0x1128] sm:$0xff]  ;;  %v1852_v27 = vld [vmem:[%s11288_s3 + $0x6a0] sm:$0xff] }
 0x1f0   :  { %v6809_v5 = vpack.c.bf16 %v1949_v48, %v1851_v20  ;;  %v1951_v56 = vld [vmem:[%s11288_s3 + $0x9b8] sm:$0xff]  ;;  %v6827_v28 = vpack.c.bf16 %v1950_v15, %v1852_v27 }
 0x1f1   :  { %v2523_v39 = vcombine.high %v9182_v62, %v9182_v62 }
 0x1f4   :  { %3385 = vmatmul.mubr.f32.vlgmr.msra.gmra.mrb[16].mxu1 %v8956_v34  ;;  %v2184_v34 = vld [vmem:[%s11288_s3 + $0x1100] sm:$0xff] }
 0x1f5   :  { %6792 = vmatpush1.bf16.xpose.msra.mxu1 %v6791_v4  ;;  %3454 = vmatprep.mubr.f32.mxu1 %v2522_v42  ;;  %v7135_v40 = vpack.c.bf16 %v2184_v34, %v2086_v35  ;;  %v2088_v4 = vld [vmem:[%s11288_s3 + $0xe00] sm:$0xff]  ;;  %v2285_v42 = vld [vmem:[%s11288_s3 + $0x1428] sm:$0xff] }
 0x1f6   :  { %7132 = vmatpush1.bf16.xpose.msra.mxu0 %v7131_v19  ;;  %6794 = vmatprep.subr.bf16.mxu1 %v6793_v21  ;;  %v2047_v19 = vld [vmem:[%s11288_s3 + $0xcb8] sm:$0xff]  ;;  %v2145_v21 = vld [vmem:[%s11288_s3 + $0xfc8] sm:$0xff] }
 0x1f7   :  { %7134 = vmatprep.subr.bf16.mxu0 %v7133_v6  ;;  %v2383_v6 = vld [vmem:[%s11288_s3 + $0x1738] sm:$0xff]  ;;  %v6813_v35 = vpack.c.bf16 %v2145_v21, %v2047_v19  ;;  %v2048_v19 = vld [vmem:[%s11288_s3 + $0xcc0] sm:$0xff]  ;;  %v2146_v21 = vld [vmem:[%s11288_s3 + $0xfd0] sm:$0xff] }
 0x1f8   :  { %v7153_v34 = vpack.c.bf16 %v2383_v6, %v2285_v42  ;;  %v2286_v42 = vld [vmem:[%s11288_s3 + $0x1430] sm:$0xff]  ;;  %v2384_v6 = vld [vmem:[%s11288_s3 + $0x1740] sm:$0xff]  ;;  %v6831_v61 = vpack.c.bf16 %v2146_v21, %v2048_v19 }
 0x1f9   :  { %v7171_v59 = vpack.c.bf16 %v2384_v6, %v2286_v42 }
 0x1fd   :  { %6796 = vmatpush1.bf16.xpose.msra.mxu1 %v6795_v9  ;;  %v2243_v9 = vld [vmem:[%s11288_s3 + $0x12d8] sm:$0xff] }
 0x1fe   :  { %7136 = vmatpush1.bf16.xpose.msra.mxu0 %v7135_v40  ;;  %6798 = vmatprep.subr.bf16.mxu1 %v6797_v47  ;;  %v2341_v40 = vld [vmem:[%s11288_s3 + $0x15e8] sm:$0xff]  ;;  %v1699_v47 = vld [vmem:[%s11288_s3 + $0x1d8] sm:$0xff] }
 0x1ff   :  { %7138 = vmatprep.subr.bf16.mxu0 %v7137_v60  ;;  %v1797_v60 = vld [vmem:[%s11288_s3 + $0x4e8] sm:$0xff]  ;;  %v6817_v30 = vpack.c.bf16 %v2341_v40, %v2243_v9  ;;  %v9363_v9 = vld [vmem:[#allocation2 + $0x78] sm:$0xff]  ;;  %v2244_v40 = vld [vmem:[%s11288_s3 + $0x12e0] sm:$0xff] }
 0x200   :  { %v7157_v31 = vpack.c.bf16 %v1797_v60, %v1699_v47  ;;  %v2342_v47 = vld [vmem:[%s11288_s3 + $0x15f0] sm:$0xff]  ;;  %v1700_v60 = vld [vmem:[%s11288_s3 + $0x1e0] sm:$0xff] }
 0x201   :  { %v6835_v11 = vpack.c.bf16 %v2342_v47, %v2244_v40  ;;  %v1997_v40 = vld [vmem:[%s11288_s3 + $0xb28] sm:$0xff] }
 0x205   :  { %6800 = vmatpush1.bf16.xpose.msra.mxu1 %v6799_v32  ;;  %v1796_v32 = vld [vmem:[%s11288_s3 + $0x4e0] sm:$0xff] }
 0x206   :  { %7140 = vmatpush1.bf16.xpose.msra.mxu0 %v7139_v54  ;;  %6802 = vmatprep.subr.bf16.mxu1 %v6801_v3  ;;  %v1657_v54 = vld [vmem:[%s11288_s3 + $0x88] sm:$0xff]  ;;  %v9268_v3 = vrot.slane %v2694_v25, %v8024_v26  ;;  %v7159_v37 = vpack.c.bf16 %v1796_v32, %v1698_v52 }
 0x207   :  { %7142 = vmatprep.subr.bf16.mxu0 %v7141_v17  ;;  %v1755_v17 = vld [vmem:[%s11288_s3 + $0x398] sm:$0xff]  ;;  %v1897_v25 = vld [vmem:[%s11288_s3 + $0x808] sm:$0xff] }
 0x208   :  { %v6821_v13 = vpack.c.bf16 %v1755_v17, %v1657_v54  ;;  %v2710_v38 = vcombine.high %v9268_v3, %v9268_v3  ;;  %v7177_v54 = vpack.c.bf16 %v1995_v18, %v1897_v25  ;;  %v2524_v17 = vcombine.high %v9281_v16, %v9281_v16  ;;  %v9507_v25 = vld [vmem:[#allocation2 + $0x28] sm:$0xff]  ;;  %v1660_v18 = vld [vmem:[%s11288_s3 + $0xa0] sm:$0xff] }
 0x20d   :  { %4925 = vmatmul.mubr.f32.vlgmr.msra.gmra.mrb[12].mxu0 %v9042_v8  ;;  %6804 = vmatpush1.bf16.xpose.msra.mxu1 %v6803_v58  ;;  %v1990_v8 = vld [vmem:[%s11288_s3 + $0xaf0] sm:$0xff] }
 0x20e   :  { %7144 = vmatpush1.bf16.xpose.msra.mxu0 %v7143_v43  ;;  %4994 = vmatprep.mubr.f32.mxu0 %v2709_v57  ;;  %v7147_v51 = vpack.c.bf16 %v1990_v8, %v1892_v12  ;;  %v1754_v58 = vld [vmem:[%s11288_s3 + $0x390] sm:$0xff]  ;;  %v2091_v57 = vld [vmem:[%s11288_s3 + $0xe18] sm:$0xff] }
 0x20f   :  { %6806 = vmatprep.subr.bf16.mxu1 %v6805_v23  ;;  %7146 = vmatprep.subr.bf16.mxu0 %v7145_v44  ;;  %v1894_v43 = vld [vmem:[%s11288_s3 + $0x7f0] sm:$0xff]  ;;  %v1992_v23 = vld [vmem:[%s11288_s3 + $0xb00] sm:$0xff]  ;;  %v1853_v44 = vld [vmem:[%s11288_s3 + $0x6a8] sm:$0xff]  ;;  %v6823_v14 = vpack.c.bf16 %v1754_v58, %v1656_v49  ;;  %v7165_v48 = vpack.c.bf16 %v2189_v0, %v2091_v57 }
 0x210   :  { %v7163_v12 = vpack.c.bf16 %v1992_v23, %v1894_v43  ;;  %v6825_v8 = vpack.c.bf16 %v1951_v56, %v1853_v44  ;;  %v2191_v49 = vld [vmem:[%s11288_s3 + $0x1138] sm:$0xff]  ;;  %v1854_v57 = vld [vmem:[%s11288_s3 + $0x6b0] sm:$0xff]  ;;  %v1952_v0 = vld [vmem:[%s11288_s3 + $0x9c0] sm:$0xff] }
 0x211   :  { %v6843_v27 = vpack.c.bf16 %v1952_v0, %v1854_v57 }
 0x214   :  { %3455 = vmatmul.mubr.f32.vlgmr.msra.gmra.mrb[16].mxu1 %v9069_v29  ;;  %v2186_v29 = vld [vmem:[%s11288_s3 + $0x1110] sm:$0xff] }
 0x215   :  { %6808 = vmatpush1.bf16.xpose.msra.mxu1 %v6807_v2  ;;  %3524 = vmatprep.mubr.f32.mxu1 %v2523_v39  ;;  %v7151_v33 = vpack.c.bf16 %v2186_v29, %v2088_v4  ;;  %v2090_v2 = vld [vmem:[%s11288_s3 + $0xe10] sm:$0xff]  ;;  %v2287_v39 = vld [vmem:[%s11288_s3 + $0x1438] sm:$0xff] }
 0x216   :  { %7148 = vmatpush1.bf16.xpose.msra.mxu0 %v7147_v51  ;;  %6810 = vmatprep.subr.bf16.mxu1 %v6809_v5  ;;  %v2049_v51 = vld [vmem:[%s11288_s3 + $0xcc8] sm:$0xff]  ;;  %v2147_v5 = vld [vmem:[%s11288_s3 + $0xfd8] sm:$0xff] }
 0x217   :  { %7150 = vmatprep.subr.bf16.mxu0 %v7149_v22  ;;  %v2385_v22 = vld [vmem:[%s11288_s3 + $0x1748] sm:$0xff]  ;;  %v6829_v4 = vpack.c.bf16 %v2147_v5, %v2049_v51  ;;  %v2050_v51 = vld [vmem:[%s11288_s3 + $0xcd0] sm:$0xff]  ;;  %v2148_v5 = vld [vmem:[%s11288_s3 + $0xfe0] sm:$0xff] }
 0x218   :  { %v7169_v29 = vpack.c.bf16 %v2385_v22, %v2287_v39  ;;  %v2288_v39 = vld [vmem:[%s11288_s3 + $0x1440] sm:$0xff]  ;;  %v2386_v22 = vld [vmem:[%s11288_s3 + $0x1750] sm:$0xff]  ;;  %v6847_v19 = vpack.c.bf16 %v2148_v5, %v2050_v51 }
 0x219   :  { %v7187_v21 = vpack.c.bf16 %v2386_v22, %v2288_v39 }
 0x21d   :  { %6812 = vmatpush1.bf16.xpose.msra.mxu1 %v6811_v41  ;;  %v2245_v41 = vld [vmem:[%s11288_s3 + $0x12e8] sm:$0xff] }
 0x21e   :  { %7152 = vmatpush1.bf16.xpose.msra.mxu0 %v7151_v33  ;;  %6814 = vmatprep.subr.bf16.mxu1 %v6813_v35  ;;  %v2343_v33 = vld [vmem:[%s11288_s3 + $0x15f8] sm:$0xff]  ;;  %v1701_v35 = vld [vmem:[%s11288_s3 + $0x1e8] sm:$0xff] }
 0x21f   :  { %7154 = vmatprep.subr.bf16.mxu0 %v7153_v34  ;;  %v1799_v34 = vld [vmem:[%s11288_s3 + $0x4f8] sm:$0xff]  ;;  %v6833_v24 = vpack.c.bf16 %v2343_v33, %v2245_v41  ;;  %v2711_v41 = vcombine.high %v9363_v9, %v9363_v9  ;;  %v2246_v33 = vld [vmem:[%s11288_s3 + $0x12f0] sm:$0xff] }
 0x220   :  { %v7173_v55 = vpack.c.bf16 %v1799_v34, %v1701_v35  ;;  %v2344_v35 = vld [vmem:[%s11288_s3 + $0x1600] sm:$0xff]  ;;  %v1702_v34 = vld [vmem:[%s11288_s3 + $0x1f0] sm:$0xff] }
 0x221   :  { %v6851_v47 = vpack.c.bf16 %v2344_v35, %v2246_v33  ;;  %v1999_v33 = vld [vmem:[%s11288_s3 + $0xb38] sm:$0xff] }
 0x225   :  { %6816 = vmatpush1.bf16.xpose.msra.mxu1 %v6815_v46  ;;  %v1798_v46 = vld [vmem:[%s11288_s3 + $0x4f0] sm:$0xff] }
 0x226   :  { %7156 = vmatpush1.bf16.xpose.msra.mxu0 %v7155_v10  ;;  %6818 = vmatprep.subr.bf16.mxu1 %v6817_v30  ;;  %v1659_v10 = vld [vmem:[%s11288_s3 + $0x98] sm:$0xff]  ;;  %v9382_v30 = vrot.slane %v9363_v9, %v8024_v26  ;;  %v7175_v52 = vpack.c.bf16 %v1798_v46, %v1700_v60 }
 0x227   :  { %7158 = vmatprep.subr.bf16.mxu0 %v7157_v31  ;;  %v1757_v31 = vld [vmem:[%s11288_s3 + $0x3a8] sm:$0xff]  ;;  %v1899_v9 = vld [vmem:[%s11288_s3 + $0x818] sm:$0xff] }
 0x228   :  { %v6837_v32 = vpack.c.bf16 %v1757_v31, %v1659_v10  ;;  %v2726_v53 = vcombine.high %v9382_v30, %v9382_v30  ;;  %v7193_v10 = vpack.c.bf16 %v1997_v40, %v1899_v9  ;;  %v1662_v40 = vld [vmem:[%s11288_s3 + $0xb0] sm:$0xff] }
 0x22d   :  { %4995 = vmatmul.mubr.f32.vlgmr.msra.gmra.mrb[12].mxu0 %v9156_v45  ;;  %6820 = vmatpush1.bf16.xpose.msra.mxu1 %v6819_v1  ;;  %v9295_v45 = vrot.slane %v9281_v16, %v8024_v26  ;;  %v1756_v1 = vld [vmem:[%s11288_s3 + $0x3a0] sm:$0xff]  ;;  %v2093_v16 = vld [vmem:[%s11288_s3 + $0xe28] sm:$0xff] }
 0x22e   :  { %7160 = vmatpush1.bf16.xpose.msra.mxu0 %v7159_v37  ;;  %5064 = vmatprep.mubr.f32.mxu0 %v2710_v38  ;;  %v1896_v37 = vld [vmem:[%s11288_s3 + $0x800] sm:$0xff]  ;;  %v1953_v38 = vld [vmem:[%s11288_s3 + $0x9c8] sm:$0xff]  ;;  %v6839_v58 = vpack.c.bf16 %v1756_v1, %v1658_v36  ;;  %v7181_v56 = vpack.c.bf16 %v2191_v49, %v2093_v16  ;;  %v1954_v49 = vld [vmem:[%s11288_s3 + $0x9d0] sm:$0xff] }
 0x22f   :  { %6822 = vmatprep.subr.bf16.mxu1 %v6821_v13  ;;  %7162 = vmatprep.subr.bf16.mxu0 %v7161_v50  ;;  %v2539_v20 = vcombine.high %v9295_v45, %v9295_v45  ;;  %v9408_v13 = vrot.slane %v2524_v17, %v8024_v26  ;;  %v1855_v50 = vld [vmem:[%s11288_s3 + $0x6b8] sm:$0xff]  ;;  %v2193_v36 = vld [vmem:[%s11288_s3 + $0x1148] sm:$0xff]  ;;  %v1856_v16 = vld [vmem:[%s11288_s3 + $0x6c0] sm:$0xff] }
 0x230   :  { %v6841_v23 = vpack.c.bf16 %v1953_v38, %v1855_v50  ;;  %v1955_v17 = vld [vmem:[%s11288_s3 + $0x9d8] sm:$0xff]  ;;  %v6859_v57 = vpack.c.bf16 %v1954_v49, %v1856_v16 }
 0x231   :  { %v2540_v44 = vcombine.high %v9408_v13, %v9408_v13 }
 0x234   :  { %3525 = vmatmul.mubr.f32.vlgmr.msra.gmra.mrb[16].mxu1 %v9182_v62  ;;  %v2188_v62 = vld [vmem:[%s11288_s3 + $0x1120] sm:$0xff] }
 0x235   :  { %6824 = vmatpush1.bf16.xpose.msra.mxu1 %v6823_v14  ;;  %3594 = vmatprep.mubr.f32.mxu1 %v2539_v20  ;;  %v7167_v63 = vpack.c.bf16 %v2188_v62, %v2090_v2  ;;  %v2092_v14 = vld [vmem:[%s11288_s3 + $0xe20] sm:$0xff]  ;;  %v2289_v20 = vld [vmem:[%s11288_s3 + $0x1448] sm:$0xff] }
 0x236   :  { %7164 = vmatpush1.bf16.xpose.msra.mxu0 %v7163_v12  ;;  %6826 = vmatprep.subr.bf16.mxu1 %v6825_v8  ;;  %v2051_v12 = vld [vmem:[%s11288_s3 + $0xcd8] sm:$0xff]  ;;  %v2149_v8 = vld [vmem:[%s11288_s3 + $0xfe8] sm:$0xff] }
 0x237   :  { %7166 = vmatprep.subr.bf16.mxu0 %v7165_v48  ;;  %v2387_v48 = vld [vmem:[%s11288_s3 + $0x1758] sm:$0xff]  ;;  %v6845_v2 = vpack.c.bf16 %v2149_v8, %v2051_v12  ;;  %v2052_v12 = vld [vmem:[%s11288_s3 + $0xce0] sm:$0xff]  ;;  %v2150_v8 = vld [vmem:[%s11288_s3 + $0xff0] sm:$0xff] }
 0x238   :  { %v7185_v62 = vpack.c.bf16 %v2387_v48, %v2289_v20  ;;  %v2290_v20 = vld [vmem:[%s11288_s3 + $0x1450] sm:$0xff]  ;;  %v2388_v48 = vld [vmem:[%s11288_s3 + $0x1760] sm:$0xff]  ;;  %v6863_v51 = vpack.c.bf16 %v2150_v8, %v2052_v12 }
 0x239   :  { %v7203_v5 = vpack.c.bf16 %v2388_v48, %v2290_v20 }
 0x23d   :  { %6828 = vmatpush1.bf16.xpose.msra.mxu1 %v6827_v28  ;;  %v2247_v28 = vld [vmem:[%s11288_s3 + $0x12f8] sm:$0xff] }
 0x23e   :  { %7168 = vmatpush1.bf16.xpose.msra.mxu0 %v7167_v63  ;;  %6830 = vmatprep.subr.bf16.mxu1 %v6829_v4  ;;  %v2345_v63 = vld [vmem:[%s11288_s3 + $0x1608] sm:$0xff]  ;;  %v1703_v4 = vld [vmem:[%s11288_s3 + $0x1f8] sm:$0xff] }
 0x23f   :  { %7170 = vmatprep.subr.bf16.mxu0 %v7169_v29  ;;  %v1801_v29 = vld [vmem:[%s11288_s3 + $0x508] sm:$0xff]  ;;  %v6849_v42 = vpack.c.bf16 %v2345_v63, %v2247_v28  ;;  %v9589_v28 = vld [vmem:[#allocation2 + $0x80] sm:$0xff] }
 0x240   :  { %v7189_v6 = vpack.c.bf16 %v1801_v29, %v1703_v4  ;;  %v2248_v63 = vld [vmem:[%s11288_s3 + $0x1300] sm:$0xff]  ;;  %v2346_v4 = vld [vmem:[%s11288_s3 + $0x1610] sm:$0xff] }
 0x241   :  { %v1704_v29 = vld [vmem:[%s11288_s3 + $0x200] sm:$0xff]  ;;  %v6867_v35 = vpack.c.bf16 %v2346_v4, %v2248_v63  ;;  %v2001_v63 = vld [vmem:[%s11288_s3 + $0xb48] sm:$0xff] }
 0x245   :  { %6832 = vmatpush1.bf16.xpose.msra.mxu1 %v6831_v61  ;;  %v1800_v61 = vld [vmem:[%s11288_s3 + $0x500] sm:$0xff] }
 0x246   :  { %7172 = vmatpush1.bf16.xpose.msra.mxu0 %v7171_v59  ;;  %6834 = vmatprep.subr.bf16.mxu1 %v6833_v24  ;;  %v1661_v59 = vld [vmem:[%s11288_s3 + $0xa8] sm:$0xff]  ;;  %v9494_v24 = vrot.slane %v2711_v41, %v8024_v26  ;;  %v7191_v60 = vpack.c.bf16 %v1800_v61, %v1702_v34 }
 0x247   :  { %7174 = vmatprep.subr.bf16.mxu0 %v7173_v55  ;;  %v1759_v55 = vld [vmem:[%s11288_s3 + $0x3b8] sm:$0xff]  ;;  %v1901_v41 = vld [vmem:[%s11288_s3 + $0x828] sm:$0xff] }
 0x248   :  { %v6853_v46 = vpack.c.bf16 %v1759_v55, %v1661_v59  ;;  %v2727_v31 = vcombine.high %v9494_v24, %v9494_v24  ;;  %v7209_v59 = vpack.c.bf16 %v1999_v33, %v1901_v41  ;;  %v2541_v55 = vcombine.high %v9507_v25, %v9507_v25  ;;  %v9733_v41 = vld [vmem:[#allocation2 + $0x30] sm:$0xff]  ;;  %v1664_v33 = vld [vmem:[%s11288_s3 + $0xc0] sm:$0xff] }
 0x24d   :  { %5065 = vmatmul.mubr.f32.vlgmr.msra.gmra.mrb[12].mxu0 %v9268_v3  ;;  %6836 = vmatpush1.bf16.xpose.msra.mxu1 %v6835_v11  ;;  %v1994_v3 = vld [vmem:[%s11288_s3 + $0xb10] sm:$0xff] }
 0x24e   :  { %7176 = vmatpush1.bf16.xpose.msra.mxu0 %v7175_v52  ;;  %5134 = vmatprep.mubr.f32.mxu0 %v2726_v53  ;;  %v7179_v43 = vpack.c.bf16 %v1994_v3, %v1896_v37  ;;  %v1758_v11 = vld [vmem:[%s11288_s3 + $0x3b0] sm:$0xff]  ;;  %v2095_v53 = vld [vmem:[%s11288_s3 + $0xe38] sm:$0xff] }
 0x24f   :  { %6838 = vmatprep.subr.bf16.mxu1 %v6837_v32  ;;  %7178 = vmatprep.subr.bf16.mxu0 %v7177_v54  ;;  %v1898_v52 = vld [vmem:[%s11288_s3 + $0x810] sm:$0xff]  ;;  %v1996_v32 = vld [vmem:[%s11288_s3 + $0xb20] sm:$0xff]  ;;  %v1857_v54 = vld [vmem:[%s11288_s3 + $0x6c8] sm:$0xff]  ;;  %v6855_v1 = vpack.c.bf16 %v1758_v11, %v1660_v18  ;;  %v7197_v38 = vpack.c.bf16 %v2193_v36, %v2095_v53 }
 0x250   :  { %v7195_v37 = vpack.c.bf16 %v1996_v32, %v1898_v52  ;;  %v6857_v3 = vpack.c.bf16 %v1955_v17, %v1857_v54  ;;  %v2195_v18 = vld [vmem:[%s11288_s3 + $0x1158] sm:$0xff]  ;;  %v1858_v53 = vld [vmem:[%s11288_s3 + $0x6d0] sm:$0xff]  ;;  %v1956_v36 = vld [vmem:[%s11288_s3 + $0x9e0] sm:$0xff] }
 0x251   :  { %v6875_v16 = vpack.c.bf16 %v1956_v36, %v1858_v53 }
 0x254   :  { %3595 = vmatmul.mubr.f32.vlgmr.msra.gmra.mrb[16].mxu1 %v9295_v45  ;;  %v2190_v45 = vld [vmem:[%s11288_s3 + $0x1130] sm:$0xff] }
 0x255   :  { %6840 = vmatpush1.bf16.xpose.msra.mxu1 %v6839_v58  ;;  %3664 = vmatprep.mubr.f32.mxu1 %v2540_v44  ;;  %v7183_v15 = vpack.c.bf16 %v2190_v45, %v2092_v14  ;;  %v2094_v58 = vld [vmem:[%s11288_s3 + $0xe30] sm:$0xff]  ;;  %v2291_v44 = vld [vmem:[%s11288_s3 + $0x1458] sm:$0xff] }
 0x256   :  { %7180 = vmatpush1.bf16.xpose.msra.mxu0 %v7179_v43  ;;  %6842 = vmatprep.subr.bf16.mxu1 %v6841_v23  ;;  %v2053_v43 = vld [vmem:[%s11288_s3 + $0xce8] sm:$0xff]  ;;  %v2151_v23 = vld [vmem:[%s11288_s3 + $0xff8] sm:$0xff] }
 0x257   :  { %7182 = vmatprep.subr.bf16.mxu0 %v7181_v56  ;;  %v2389_v56 = vld [vmem:[%s11288_s3 + $0x1768] sm:$0xff]  ;;  %v6861_v14 = vpack.c.bf16 %v2151_v23, %v2053_v43  ;;  %v2054_v43 = vld [vmem:[%s11288_s3 + $0xcf0] sm:$0xff]  ;;  %v2152_v23 = vld [vmem:[%s11288_s3 + $0x1000] sm:$0xff] }
 0x258   :  { %v7201_v45 = vpack.c.bf16 %v2389_v56, %v2291_v44  ;;  %v2292_v44 = vld [vmem:[%s11288_s3 + $0x1460] sm:$0xff]  ;;  %v2390_v56 = vld [vmem:[%s11288_s3 + $0x1770] sm:$0xff]  ;;  %v6879_v12 = vpack.c.bf16 %v2152_v23, %v2054_v43 }
 0x259   :  { %v7219_v8 = vpack.c.bf16 %v2390_v56, %v2292_v44 }
 0x25d   :  { %6844 = vmatpush1.bf16.xpose.msra.mxu1 %v6843_v27  ;;  %v2249_v27 = vld [vmem:[%s11288_s3 + $0x1308] sm:$0xff] }
 0x25e   :  { %7184 = vmatpush1.bf16.xpose.msra.mxu0 %v7183_v15  ;;  %6846 = vmatprep.subr.bf16.mxu1 %v6845_v2  ;;  %v2347_v15 = vld [vmem:[%s11288_s3 + $0x1618] sm:$0xff]  ;;  %v1705_v2 = vld [vmem:[%s11288_s3 + $0x208] sm:$0xff] }
 0x25f   :  { %7186 = vmatprep.subr.bf16.mxu0 %v7185_v62  ;;  %v1803_v62 = vld [vmem:[%s11288_s3 + $0x518] sm:$0xff]  ;;  %v6865_v39 = vpack.c.bf16 %v2347_v15, %v2249_v27  ;;  %v2728_v27 = vcombine.high %v9589_v28, %v9589_v28  ;;  %v2250_v15 = vld [vmem:[%s11288_s3 + $0x1310] sm:$0xff] }
 0x260   :  { %v7205_v22 = vpack.c.bf16 %v1803_v62, %v1705_v2  ;;  %v2348_v2 = vld [vmem:[%s11288_s3 + $0x1620] sm:$0xff]  ;;  %v1706_v62 = vld [vmem:[%s11288_s3 + $0x210] sm:$0xff] }
 0x261   :  { %v6883_v4 = vpack.c.bf16 %v2348_v2, %v2250_v15  ;;  %v2003_v15 = vld [vmem:[%s11288_s3 + $0xb58] sm:$0xff] }
 0x265   :  { %6848 = vmatpush1.bf16.xpose.msra.mxu1 %v6847_v19  ;;  %v1802_v19 = vld [vmem:[%s11288_s3 + $0x510] sm:$0xff] }
 0x266   :  { %7188 = vmatpush1.bf16.xpose.msra.mxu0 %v7187_v21  ;;  %6850 = vmatprep.subr.bf16.mxu1 %v6849_v42  ;;  %v1663_v21 = vld [vmem:[%s11288_s3 + $0xb8] sm:$0xff]  ;;  %v9608_v42 = vrot.slane %v9589_v28, %v8024_v26  ;;  %v7207_v34 = vpack.c.bf16 %v1802_v19, %v1704_v29 }
 0x267   :  { %7190 = vmatprep.subr.bf16.mxu0 %v7189_v6  ;;  %v1761_v6 = vld [vmem:[%s11288_s3 + $0x3c8] sm:$0xff]  ;;  %v1903_v28 = vld [vmem:[%s11288_s3 + $0x838] sm:$0xff] }
 0x268   :  { %v6869_v61 = vpack.c.bf16 %v1761_v6, %v1663_v21  ;;  %v2743_v9 = vcombine.high %v9608_v42, %v9608_v42  ;;  %v7225_v21 = vpack.c.bf16 %v2001_v63, %v1903_v28  ;;  %v1666_v63 = vld [vmem:[%s11288_s3 + $0xd0] sm:$0xff] }
 0x26d   :  { %5135 = vmatmul.mubr.f32.vlgmr.msra.gmra.mrb[12].mxu0 %v9382_v30  ;;  %6852 = vmatpush1.bf16.xpose.msra.mxu1 %v6851_v47  ;;  %v9521_v30 = vrot.slane %v9507_v25, %v8024_v26  ;;  %v1760_v47 = vld [vmem:[%s11288_s3 + $0x3c0] sm:$0xff]  ;;  %v2097_v25 = vld [vmem:[%s11288_s3 + $0xe48] sm:$0xff] }
 0x26e   :  { %7192 = vmatpush1.bf16.xpose.msra.mxu0 %v7191_v60  ;;  %5204 = vmatprep.mubr.f32.mxu0 %v2727_v31  ;;  %v1900_v60 = vld [vmem:[%s11288_s3 + $0x820] sm:$0xff]  ;;  %v1957_v31 = vld [vmem:[%s11288_s3 + $0x9e8] sm:$0xff]  ;;  %v6871_v11 = vpack.c.bf16 %v1760_v47, %v1662_v40  ;;  %v7213_v17 = vpack.c.bf16 %v2195_v18, %v2097_v25  ;;  %v1958_v18 = vld [vmem:[%s11288_s3 + $0x9f0] sm:$0xff] }
 0x26f   :  { %6854 = vmatprep.subr.bf16.mxu1 %v6853_v46  ;;  %7194 = vmatprep.subr.bf16.mxu0 %v7193_v10  ;;  %v2556_v50 = vcombine.high %v9521_v30, %v9521_v30  ;;  %v9634_v46 = vrot.slane %v2541_v55, %v8024_v26  ;;  %v1859_v10 = vld [vmem:[%s11288_s3 + $0x6d8] sm:$0xff]  ;;  %v2197_v40 = vld [vmem:[%s11288_s3 + $0x1168] sm:$0xff]  ;;  %v1860_v25 = vld [vmem:[%s11288_s3 + $0x6e0] sm:$0xff] }
 0x270   :  { %v6873_v32 = vpack.c.bf16 %v1957_v31, %v1859_v10  ;;  %v1959_v55 = vld [vmem:[%s11288_s3 + $0x9f8] sm:$0xff]  ;;  %v6891_v53 = vpack.c.bf16 %v1958_v18, %v1860_v25 }
 0x271   :  { %v2557_v54 = vcombine.high %v9634_v46, %v9634_v46 }
 0x274   :  { %3665 = vmatmul.mubr.f32.vlgmr.msra.gmra.mrb[16].mxu1 %v9408_v13  ;;  %v2192_v13 = vld [vmem:[%s11288_s3 + $0x1140] sm:$0xff] }
 0x275   :  { %6856 = vmatpush1.bf16.xpose.msra.mxu1 %v6855_v1  ;;  %3734 = vmatprep.mubr.f32.mxu1 %v2556_v50  ;;  %v7199_v0 = vpack.c.bf16 %v2192_v13, %v2094_v58  ;;  %v2096_v1 = vld [vmem:[%s11288_s3 + $0xe40] sm:$0xff]  ;;  %v2293_v50 = vld [vmem:[%s11288_s3 + $0x1468] sm:$0xff] }
 0x276   :  { %7196 = vmatpush1.bf16.xpose.msra.mxu0 %v7195_v37  ;;  %6858 = vmatprep.subr.bf16.mxu1 %v6857_v3  ;;  %v2055_v37 = vld [vmem:[%s11288_s3 + $0xcf8] sm:$0xff]  ;;  %v2153_v3 = vld [vmem:[%s11288_s3 + $0x1008] sm:$0xff] }
 0x277   :  { %7198 = vmatprep.subr.bf16.mxu0 %v7197_v38  ;;  %v2391_v38 = vld [vmem:[%s11288_s3 + $0x1778] sm:$0xff]  ;;  %v6877_v58 = vpack.c.bf16 %v2153_v3, %v2055_v37  ;;  %v2056_v37 = vld [vmem:[%s11288_s3 + $0xd00] sm:$0xff]  ;;  %v2154_v3 = vld [vmem:[%s11288_s3 + $0x1010] sm:$0xff] }
 0x278   :  { %v7217_v13 = vpack.c.bf16 %v2391_v38, %v2293_v50  ;;  %v2294_v50 = vld [vmem:[%s11288_s3 + $0x1470] sm:$0xff]  ;;  %v2392_v38 = vld [vmem:[%s11288_s3 + $0x1780] sm:$0xff]  ;;  %v6895_v43 = vpack.c.bf16 %v2154_v3, %v2056_v37 }
 0x279   :  { %v7235_v23 = vpack.c.bf16 %v2392_v38, %v2294_v50 }
 0x27d   :  { %6860 = vmatpush1.bf16.xpose.msra.mxu1 %v6859_v57  ;;  %v2251_v57 = vld [vmem:[%s11288_s3 + $0x1318] sm:$0xff] }
 0x27e   :  { %7200 = vmatpush1.bf16.xpose.msra.mxu0 %v7199_v0  ;;  %6862 = vmatprep.subr.bf16.mxu1 %v6861_v14  ;;  %v2349_v0 = vld [vmem:[%s11288_s3 + $0x1628] sm:$0xff]  ;;  %v1707_v14 = vld [vmem:[%s11288_s3 + $0x218] sm:$0xff] }
 0x27f   :  { %7202 = vmatprep.subr.bf16.mxu0 %v7201_v45  ;;  %v1805_v45 = vld [vmem:[%s11288_s3 + $0x528] sm:$0xff]  ;;  %v6881_v20 = vpack.c.bf16 %v2349_v0, %v2251_v57  ;;  %v2252_v0 = vld [vmem:[%s11288_s3 + $0x1320] sm:$0xff] }
 0x280   :  { %v7221_v48 = vpack.c.bf16 %v1805_v45, %v1707_v14  ;;  %v9815_v57 = vld [vmem:[#allocation2 + $0x88] sm:$0xff]  ;;  %v2350_v14 = vld [vmem:[%s11288_s3 + $0x1630] sm:$0xff]  ;;  %v1708_v45 = vld [vmem:[%s11288_s3 + $0x220] sm:$0xff] }
 0x281   :  { %v6899_v2 = vpack.c.bf16 %v2350_v14, %v2252_v0  ;;  %v2005_v0 = vld [vmem:[%s11288_s3 + $0xb68] sm:$0xff] }
 0x285   :  { %6864 = vmatpush1.bf16.xpose.msra.mxu1 %v6863_v51  ;;  %v1804_v51 = vld [vmem:[%s11288_s3 + $0x520] sm:$0xff] }
 0x286   :  { %7204 = vmatpush1.bf16.xpose.msra.mxu0 %v7203_v5  ;;  %6866 = vmatprep.subr.bf16.mxu1 %v6865_v39  ;;  %v1665_v5 = vld [vmem:[%s11288_s3 + $0xc8] sm:$0xff]  ;;  %v9720_v39 = vrot.slane %v2728_v27, %v8024_v26  ;;  %v7223_v29 = vpack.c.bf16 %v1804_v51, %v1706_v62 }
 0x287   :  { %7206 = vmatprep.subr.bf16.mxu0 %v7205_v22  ;;  %v1763_v22 = vld [vmem:[%s11288_s3 + $0x3d8] sm:$0xff]  ;;  %v1905_v27 = vld [vmem:[%s11288_s3 + $0x848] sm:$0xff] }
 0x288   :  { %v6885_v19 = vpack.c.bf16 %v1763_v22, %v1665_v5  ;;  %v2744_v6 = vcombine.high %v9720_v39, %v9720_v39  ;;  %v7241_v5 = vpack.c.bf16 %v2003_v15, %v1905_v27  ;;  %v2558_v22 = vcombine.high %v9733_v41, %v9733_v41  ;;  %v9959_v27 = vld [vmem:[#allocation2 + $0x38] sm:$0xff]  ;;  %v1668_v15 = vld [vmem:[%s11288_s3 + $0xe0] sm:$0xff] }
 0x28d   :  { %5205 = vmatmul.mubr.f32.vlgmr.msra.gmra.mrb[12].mxu0 %v9494_v24  ;;  %6868 = vmatpush1.bf16.xpose.msra.mxu1 %v6867_v35  ;;  %v1998_v24 = vld [vmem:[%s11288_s3 + $0xb30] sm:$0xff] }
 0x28e   :  { %7208 = vmatpush1.bf16.xpose.msra.mxu0 %v7207_v34  ;;  %5274 = vmatprep.mubr.f32.mxu0 %v2743_v9  ;;  %v7211_v52 = vpack.c.bf16 %v1998_v24, %v1900_v60  ;;  %v1762_v35 = vld [vmem:[%s11288_s3 + $0x3d0] sm:$0xff]  ;;  %v2099_v9 = vld [vmem:[%s11288_s3 + $0xe58] sm:$0xff] }
 0x28f   :  { %6870 = vmatprep.subr.bf16.mxu1 %v6869_v61  ;;  %7210 = vmatprep.subr.bf16.mxu0 %v7209_v59  ;;  %v1902_v34 = vld [vmem:[%s11288_s3 + $0x830] sm:$0xff]  ;;  %v2000_v61 = vld [vmem:[%s11288_s3 + $0xb40] sm:$0xff]  ;;  %v1861_v59 = vld [vmem:[%s11288_s3 + $0x6e8] sm:$0xff]  ;;  %v6887_v47 = vpack.c.bf16 %v1762_v35, %v1664_v33  ;;  %v7229_v31 = vpack.c.bf16 %v2197_v40, %v2099_v9 }
 0x290   :  { %v7227_v60 = vpack.c.bf16 %v2000_v61, %v1902_v34  ;;  %v6889_v24 = vpack.c.bf16 %v1959_v55, %v1861_v59  ;;  %v2199_v33 = vld [vmem:[%s11288_s3 + $0x1178] sm:$0xff]  ;;  %v1862_v9 = vld [vmem:[%s11288_s3 + $0x6f0] sm:$0xff]  ;;  %v1960_v40 = vld [vmem:[%s11288_s3 + $0xa00] sm:$0xff] }
 0x291   :  { %v6907_v25 = vpack.c.bf16 %v1960_v40, %v1862_v9 }
 0x294   :  { %3735 = vmatmul.mubr.f32.vlgmr.msra.gmra.mrb[16].mxu1 %v9521_v30  ;;  %v2194_v30 = vld [vmem:[%s11288_s3 + $0x1150] sm:$0xff] }
 0x295   :  { %6872 = vmatpush1.bf16.xpose.msra.mxu1 %v6871_v11  ;;  %3804 = vmatprep.mubr.f32.mxu1 %v2557_v54  ;;  %v7215_v49 = vpack.c.bf16 %v2194_v30, %v2096_v1  ;;  %v2098_v11 = vld [vmem:[%s11288_s3 + $0xe50] sm:$0xff]  ;;  %v2295_v54 = vld [vmem:[%s11288_s3 + $0x1478] sm:$0xff] }
 0x296   :  { %7212 = vmatpush1.bf16.xpose.msra.mxu0 %v7211_v52  ;;  %6874 = vmatprep.subr.bf16.mxu1 %v6873_v32  ;;  %v2057_v52 = vld [vmem:[%s11288_s3 + $0xd08] sm:$0xff]  ;;  %v2155_v32 = vld [vmem:[%s11288_s3 + $0x1018] sm:$0xff] }
 0x297   :  { %7214 = vmatprep.subr.bf16.mxu0 %v7213_v17  ;;  %v2393_v17 = vld [vmem:[%s11288_s3 + $0x1788] sm:$0xff]  ;;  %v6893_v1 = vpack.c.bf16 %v2155_v32, %v2057_v52  ;;  %v2058_v52 = vld [vmem:[%s11288_s3 + $0xd10] sm:$0xff]  ;;  %v2156_v32 = vld [vmem:[%s11288_s3 + $0x1020] sm:$0xff] }
 0x298   :  { %v7233_v30 = vpack.c.bf16 %v2393_v17, %v2295_v54  ;;  %v2296_v54 = vld [vmem:[%s11288_s3 + $0x1480] sm:$0xff]  ;;  %v2394_v17 = vld [vmem:[%s11288_s3 + $0x1790] sm:$0xff]  ;;  %v6911_v37 = vpack.c.bf16 %v2156_v32, %v2058_v52 }
 0x299   :  { %v7251_v3 = vpack.c.bf16 %v2394_v17, %v2296_v54 }
 0x29d   :  { %6876 = vmatpush1.bf16.xpose.msra.mxu1 %v6875_v16  ;;  %v2253_v16 = vld [vmem:[%s11288_s3 + $0x1328] sm:$0xff] }
 0x29e   :  { %7216 = vmatpush1.bf16.xpose.msra.mxu0 %v7215_v49  ;;  %6878 = vmatprep.subr.bf16.mxu1 %v6877_v58  ;;  %v2351_v49 = vld [vmem:[%s11288_s3 + $0x1638] sm:$0xff]  ;;  %v1709_v58 = vld [vmem:[%s11288_s3 + $0x228] sm:$0xff] }
 0x29f   :  { %7218 = vmatprep.subr.bf16.mxu0 %v7217_v13  ;;  %v1807_v13 = vld [vmem:[%s11288_s3 + $0x538] sm:$0xff]  ;;  %v6897_v44 = vpack.c.bf16 %v2351_v49, %v2253_v16  ;;  %v2745_v16 = vcombine.high %v9815_v57, %v9815_v57  ;;  %v2254_v49 = vld [vmem:[%s11288_s3 + $0x1330] sm:$0xff] }
 0x2a0   :  { %v7237_v56 = vpack.c.bf16 %v1807_v13, %v1709_v58  ;;  %v2352_v58 = vld [vmem:[%s11288_s3 + $0x1640] sm:$0xff]  ;;  %v1710_v13 = vld [vmem:[%s11288_s3 + $0x230] sm:$0xff] }
 0x2a1   :  { %v6915_v14 = vpack.c.bf16 %v2352_v58, %v2254_v49  ;;  %v2007_v49 = vld [vmem:[%s11288_s3 + $0xb78] sm:$0xff] }
 0x2a5   :  { %6880 = vmatpush1.bf16.xpose.msra.mxu1 %v6879_v12  ;;  %v1806_v12 = vld [vmem:[%s11288_s3 + $0x530] sm:$0xff] }
 0x2a6   :  { %7220 = vmatpush1.bf16.xpose.msra.mxu0 %v7219_v8  ;;  %6882 = vmatprep.subr.bf16.mxu1 %v6881_v20  ;;  %v1667_v8 = vld [vmem:[%s11288_s3 + $0xd8] sm:$0xff]  ;;  %v9834_v20 = vrot.slane %v9815_v57, %v8024_v26  ;;  %v7239_v62 = vpack.c.bf16 %v1806_v12, %v1708_v45 }
 0x2a7   :  { %7222 = vmatprep.subr.bf16.mxu0 %v7221_v48  ;;  %v1765_v48 = vld [vmem:[%s11288_s3 + $0x3e8] sm:$0xff]  ;;  %v1907_v57 = vld [vmem:[%s11288_s3 + $0x858] sm:$0xff] }
 0x2a8   :  { %v6901_v51 = vpack.c.bf16 %v1765_v48, %v1667_v8  ;;  %v2760_v28 = vcombine.high %v9834_v20, %v9834_v20  ;;  %v7257_v8 = vpack.c.bf16 %v2005_v0, %v1907_v57  ;;  %v1670_v0 = vld [vmem:[%s11288_s3 + $0xf0] sm:$0xff] }
 0x2ad   :  { %5275 = vmatmul.mubr.f32.vlgmr.msra.gmra.mrb[12].mxu0 %v9608_v42  ;;  %6884 = vmatpush1.bf16.xpose.msra.mxu1 %v6883_v4  ;;  %v9747_v42 = vrot.slane %v9733_v41, %v8024_v26  ;;  %v1764_v4 = vld [vmem:[%s11288_s3 + $0x3e0] sm:$0xff]  ;;  %v2101_v41 = vld [vmem:[%s11288_s3 + $0xe68] sm:$0xff] }
 0x2ae   :  { %7224 = vmatpush1.bf16.xpose.msra.mxu0 %v7223_v29  ;;  %5344 = vmatprep.mubr.f32.mxu0 %v2744_v6  ;;  %v1904_v29 = vld [vmem:[%s11288_s3 + $0x840] sm:$0xff]  ;;  %v1961_v6 = vld [vmem:[%s11288_s3 + $0xa08] sm:$0xff]  ;;  %v6903_v35 = vpack.c.bf16 %v1764_v4, %v1666_v63  ;;  %v7245_v55 = vpack.c.bf16 %v2199_v33, %v2101_v41  ;;  %v1962_v33 = vld [vmem:[%s11288_s3 + $0xa10] sm:$0xff] }
 0x2af   :  { %6886 = vmatprep.subr.bf16.mxu1 %v6885_v19  ;;  %7226 = vmatprep.subr.bf16.mxu0 %v7225_v21  ;;  %v2573_v10 = vcombine.high %v9747_v42, %v9747_v42  ;;  %v9860_v19 = vrot.slane %v2558_v22, %v8024_v26  ;;  %v1863_v21 = vld [vmem:[%s11288_s3 + $0x6f8] sm:$0xff]  ;;  %v2201_v63 = vld [vmem:[%s11288_s3 + $0x1188] sm:$0xff]  ;;  %v1864_v41 = vld [vmem:[%s11288_s3 + $0x700] sm:$0xff] }
 0x2b0   :  { %v6905_v61 = vpack.c.bf16 %v1961_v6, %v1863_v21  ;;  %v1963_v22 = vld [vmem:[%s11288_s3 + $0xa18] sm:$0xff]  ;;  %v6923_v9 = vpack.c.bf16 %v1962_v33, %v1864_v41 }
 0x2b1   :  { %v2574_v59 = vcombine.high %v9860_v19, %v9860_v19 }
 0x2b4   :  { %3805 = vmatmul.mubr.f32.vlgmr.msra.gmra.mrb[16].mxu1 %v9634_v46  ;;  %v2196_v46 = vld [vmem:[%s11288_s3 + $0x1160] sm:$0xff] }
 0x2b5   :  { %6888 = vmatpush1.bf16.xpose.msra.mxu1 %v6887_v47  ;;  %3874 = vmatprep.mubr.f32.mxu1 %v2573_v10  ;;  %v7231_v36 = vpack.c.bf16 %v2196_v46, %v2098_v11  ;;  %v2100_v47 = vld [vmem:[%s11288_s3 + $0xe60] sm:$0xff]  ;;  %v2297_v10 = vld [vmem:[%s11288_s3 + $0x1488] sm:$0xff] }
 0x2b6   :  { %7228 = vmatpush1.bf16.xpose.msra.mxu0 %v7227_v60  ;;  %6890 = vmatprep.subr.bf16.mxu1 %v6889_v24  ;;  %v2059_v60 = vld [vmem:[%s11288_s3 + $0xd18] sm:$0xff]  ;;  %v2157_v24 = vld [vmem:[%s11288_s3 + $0x1028] sm:$0xff] }
 0x2b7   :  { %7230 = vmatprep.subr.bf16.mxu0 %v7229_v31  ;;  %v2395_v31 = vld [vmem:[%s11288_s3 + $0x1798] sm:$0xff]  ;;  %v6909_v11 = vpack.c.bf16 %v2157_v24, %v2059_v60  ;;  %v2060_v60 = vld [vmem:[%s11288_s3 + $0xd20] sm:$0xff]  ;;  %v2158_v24 = vld [vmem:[%s11288_s3 + $0x1030] sm:$0xff] }
 0x2b8   :  { %v7249_v46 = vpack.c.bf16 %v2395_v31, %v2297_v10  ;;  %v2298_v10 = vld [vmem:[%s11288_s3 + $0x1490] sm:$0xff]  ;;  %v2396_v31 = vld [vmem:[%s11288_s3 + $0x17a0] sm:$0xff]  ;;  %v6927_v52 = vpack.c.bf16 %v2158_v24, %v2060_v60 }
 0x2b9   :  { %v7267_v32 = vpack.c.bf16 %v2396_v31, %v2298_v10 }
 0x2bd   :  { %6892 = vmatpush1.bf16.xpose.msra.mxu1 %v6891_v53  ;;  %v2255_v53 = vld [vmem:[%s11288_s3 + $0x1338] sm:$0xff] }
 0x2be   :  { %7232 = vmatpush1.bf16.xpose.msra.mxu0 %v7231_v36  ;;  %6894 = vmatprep.subr.bf16.mxu1 %v6893_v1  ;;  %v2353_v36 = vld [vmem:[%s11288_s3 + $0x1648] sm:$0xff]  ;;  %v1711_v1 = vld [vmem:[%s11288_s3 + $0x238] sm:$0xff] }
 0x2bf   :  { %7234 = vmatprep.subr.bf16.mxu0 %v7233_v30  ;;  %v1809_v30 = vld [vmem:[%s11288_s3 + $0x548] sm:$0xff]  ;;  %v6913_v50 = vpack.c.bf16 %v2353_v36, %v2255_v53  ;;  %v10041_v53 = vld [vmem:[#allocation2 + $0x90] sm:$0xff]  ;;  %v2256_v36 = vld [vmem:[%s11288_s3 + $0x1340] sm:$0xff] }
 0x2c0   :  { %v7253_v38 = vpack.c.bf16 %v1809_v30, %v1711_v1  ;;  %v2354_v1 = vld [vmem:[%s11288_s3 + $0x1650] sm:$0xff]  ;;  %v1712_v30 = vld [vmem:[%s11288_s3 + $0x240] sm:$0xff] }
 0x2c1   :  { %v6931_v58 = vpack.c.bf16 %v2354_v1, %v2256_v36  ;;  %v2009_v36 = vld [vmem:[%s11288_s3 + $0xb88] sm:$0xff] }
 0x2c5   :  { %6896 = vmatpush1.bf16.xpose.msra.mxu1 %v6895_v43  ;;  %v1808_v43 = vld [vmem:[%s11288_s3 + $0x540] sm:$0xff] }
 0x2c6   :  { %7236 = vmatpush1.bf16.xpose.msra.mxu0 %v7235_v23  ;;  %6898 = vmatprep.subr.bf16.mxu1 %v6897_v44  ;;  %v1669_v23 = vld [vmem:[%s11288_s3 + $0xe8] sm:$0xff]  ;;  %v9946_v44 = vrot.slane %v2745_v16, %v8024_v26  ;;  %v7255_v45 = vpack.c.bf16 %v1808_v43, %v1710_v13 }
 0x2c7   :  { %7238 = vmatprep.subr.bf16.mxu0 %v7237_v56  ;;  %v1767_v56 = vld [vmem:[%s11288_s3 + $0x3f8] sm:$0xff]  ;;  %v1909_v16 = vld [vmem:[%s11288_s3 + $0x868] sm:$0xff] }
 0x2c8   :  { %v6917_v12 = vpack.c.bf16 %v1767_v56, %v1669_v23  ;;  %v2761_v48 = vcombine.high %v9946_v44, %v9946_v44  ;;  %v7273_v23 = vpack.c.bf16 %v2007_v49, %v1909_v16  ;;  %v2575_v56 = vcombine.high %v9959_v27, %v9959_v27  ;;  %v10185_v16 = vld [vmem:[#allocation2 + $0x40] sm:$0xff] }
 0x2c9   :  { %v1672_v49 = vld [vmem:[%s11288_s3 + $0x100] sm:$0xff] }
 0x2cd   :  { %5345 = vmatmul.mubr.f32.vlgmr.msra.gmra.mrb[12].mxu0 %v9720_v39  ;;  %6900 = vmatpush1.bf16.xpose.msra.mxu1 %v6899_v2  ;;  %v2002_v39 = vld [vmem:[%s11288_s3 + $0xb50] sm:$0xff] }
 0x2ce   :  { %7240 = vmatpush1.bf16.xpose.msra.mxu0 %v7239_v62  ;;  %5414 = vmatprep.mubr.f32.mxu0 %v2760_v28  ;;  %v7243_v34 = vpack.c.bf16 %v2002_v39, %v1904_v29  ;;  %v1766_v2 = vld [vmem:[%s11288_s3 + $0x3f0] sm:$0xff]  ;;  %v2103_v28 = vld [vmem:[%s11288_s3 + $0xe78] sm:$0xff] }
 0x2cf   :  { %6902 = vmatprep.subr.bf16.mxu1 %v6901_v51  ;;  %7242 = vmatprep.subr.bf16.mxu0 %v7241_v5  ;;  %v1906_v62 = vld [vmem:[%s11288_s3 + $0x850] sm:$0xff]  ;;  %v2004_v51 = vld [vmem:[%s11288_s3 + $0xb60] sm:$0xff]  ;;  %v1865_v5 = vld [vmem:[%s11288_s3 + $0x708] sm:$0xff]  ;;  %v6919_v4 = vpack.c.bf16 %v1766_v2, %v1668_v15  ;;  %v7261_v6 = vpack.c.bf16 %v2201_v63, %v2103_v28 }
 0x2d0   :  { %v7259_v29 = vpack.c.bf16 %v2004_v51, %v1906_v62  ;;  %v6921_v39 = vpack.c.bf16 %v1963_v22, %v1865_v5  ;;  %v2203_v15 = vld [vmem:[%s11288_s3 + $0x1198] sm:$0xff]  ;;  %v1866_v28 = vld [vmem:[%s11288_s3 + $0x710] sm:$0xff]  ;;  %v1964_v63 = vld [vmem:[%s11288_s3 + $0xa20] sm:$0xff] }
 0x2d1   :  { %v6939_v41 = vpack.c.bf16 %v1964_v63, %v1866_v28 }
 0x2d4   :  { %3875 = vmatmul.mubr.f32.vlgmr.msra.gmra.mrb[16].mxu1 %v9747_v42  ;;  %v2198_v42 = vld [vmem:[%s11288_s3 + $0x1170] sm:$0xff] }
 0x2d5   :  { %6904 = vmatpush1.bf16.xpose.msra.mxu1 %v6903_v35  ;;  %3944 = vmatprep.mubr.f32.mxu1 %v2574_v59  ;;  %v7247_v18 = vpack.c.bf16 %v2198_v42, %v2100_v47  ;;  %v2102_v35 = vld [vmem:[%s11288_s3 + $0xe70] sm:$0xff]  ;;  %v2299_v59 = vld [vmem:[%s11288_s3 + $0x1498] sm:$0xff] }
 0x2d6   :  { %7244 = vmatpush1.bf16.xpose.msra.mxu0 %v7243_v34  ;;  %6906 = vmatprep.subr.bf16.mxu1 %v6905_v61  ;;  %v2061_v34 = vld [vmem:[%s11288_s3 + $0xd28] sm:$0xff]  ;;  %v2159_v61 = vld [vmem:[%s11288_s3 + $0x1038] sm:$0xff] }
 0x2d7   :  { %7246 = vmatprep.subr.bf16.mxu0 %v7245_v55  ;;  %v2397_v55 = vld [vmem:[%s11288_s3 + $0x17a8] sm:$0xff]  ;;  %v6925_v47 = vpack.c.bf16 %v2159_v61, %v2061_v34  ;;  %v2062_v34 = vld [vmem:[%s11288_s3 + $0xd30] sm:$0xff]  ;;  %v2160_v61 = vld [vmem:[%s11288_s3 + $0x1040] sm:$0xff] }
 0x2d8   :  { %v7265_v42 = vpack.c.bf16 %v2397_v55, %v2299_v59  ;;  %v2300_v59 = vld [vmem:[%s11288_s3 + $0x14a0] sm:$0xff]  ;;  %v2398_v55 = vld [vmem:[%s11288_s3 + $0x17b0] sm:$0xff]  ;;  %v6943_v60 = vpack.c.bf16 %v2160_v61, %v2062_v34 }
 0x2d9   :  { %v7283_v24 = vpack.c.bf16 %v2398_v55, %v2300_v59 }
 0x2dd   :  { %6908 = vmatpush1.bf16.xpose.msra.mxu1 %v6907_v25  ;;  %v2257_v25 = vld [vmem:[%s11288_s3 + $0x1348] sm:$0xff] }
 0x2de   :  { %7248 = vmatpush1.bf16.xpose.msra.mxu0 %v7247_v18  ;;  %6910 = vmatprep.subr.bf16.mxu1 %v6909_v11  ;;  %v2355_v18 = vld [vmem:[%s11288_s3 + $0x1658] sm:$0xff]  ;;  %v1713_v11 = vld [vmem:[%s11288_s3 + $0x248] sm:$0xff] }
 0x2df   :  { %7250 = vmatprep.subr.bf16.mxu0 %v7249_v46  ;;  %v1811_v46 = vld [vmem:[%s11288_s3 + $0x558] sm:$0xff]  ;;  %v6929_v54 = vpack.c.bf16 %v2355_v18, %v2257_v25  ;;  %v2762_v25 = vcombine.high %v10041_v53, %v10041_v53  ;;  %v2258_v18 = vld [vmem:[%s11288_s3 + $0x1350] sm:$0xff] }
 0x2e0   :  { %v7269_v17 = vpack.c.bf16 %v1811_v46, %v1713_v11  ;;  %v2356_v11 = vld [vmem:[%s11288_s3 + $0x1660] sm:$0xff]  ;;  %v1714_v46 = vld [vmem:[%s11288_s3 + $0x250] sm:$0xff] }
 0x2e1   :  { %v6947_v1 = vpack.c.bf16 %v2356_v11, %v2258_v18  ;;  %v2011_v18 = vld [vmem:[%s11288_s3 + $0xb98] sm:$0xff] }
 0x2e5   :  { %6912 = vmatpush1.bf16.xpose.msra.mxu1 %v6911_v37  ;;  %v1810_v37 = vld [vmem:[%s11288_s3 + $0x550] sm:$0xff] }
 0x2e6   :  { %7252 = vmatpush1.bf16.xpose.msra.mxu0 %v7251_v3  ;;  %6914 = vmatprep.subr.bf16.mxu1 %v6913_v50  ;;  %v1671_v3 = vld [vmem:[%s11288_s3 + $0xf8] sm:$0xff]  ;;  %v10060_v50 = vrot.slane %v10041_v53, %v8024_v26  ;;  %v7271_v13 = vpack.c.bf16 %v1810_v37, %v1712_v30 }
 0x2e7   :  { %7254 = vmatprep.subr.bf16.mxu0 %v7253_v38  ;;  %v1769_v38 = vld [vmem:[%s11288_s3 + $0x408] sm:$0xff]  ;;  %v1911_v53 = vld [vmem:[%s11288_s3 + $0x878] sm:$0xff] }
 0x2e8   :  { %v6933_v43 = vpack.c.bf16 %v1769_v38, %v1671_v3  ;;  %v2777_v57 = vcombine.high %v10060_v50, %v10060_v50  ;;  %v7289_v3 = vpack.c.bf16 %v2009_v36, %v1911_v53  ;;  %v1674_v36 = vld [vmem:[%s11288_s3 + $0x110] sm:$0xff] }
 0x2ed   :  { %5415 = vmatmul.mubr.f32.vlgmr.msra.gmra.mrb[12].mxu0 %v9834_v20  ;;  %6916 = vmatpush1.bf16.xpose.msra.mxu1 %v6915_v14  ;;  %v9973_v20 = vrot.slane %v9959_v27, %v8024_v26  ;;  %v1768_v14 = vld [vmem:[%s11288_s3 + $0x400] sm:$0xff]  ;;  %v2105_v27 = vld [vmem:[%s11288_s3 + $0xe88] sm:$0xff] }
 0x2ee   :  { %7256 = vmatpush1.bf16.xpose.msra.mxu0 %v7255_v45  ;;  %5484 = vmatprep.mubr.f32.mxu0 %v2761_v48  ;;  %v1908_v45 = vld [vmem:[%s11288_s3 + $0x860] sm:$0xff]  ;;  %v1965_v48 = vld [vmem:[%s11288_s3 + $0xa28] sm:$0xff]  ;;  %v6935_v2 = vpack.c.bf16 %v1768_v14, %v1670_v0  ;;  %v7277_v22 = vpack.c.bf16 %v2203_v15, %v2105_v27  ;;  %v1966_v15 = vld [vmem:[%s11288_s3 + $0xa30] sm:$0xff] }
 0x2ef   :  { %6918 = vmatprep.subr.bf16.mxu1 %v6917_v12  ;;  %7258 = vmatprep.subr.bf16.mxu0 %v7257_v8  ;;  %v2590_v21 = vcombine.high %v9973_v20, %v9973_v20  ;;  %v10086_v12 = vrot.slane %v2575_v56, %v8024_v26  ;;  %v1867_v8 = vld [vmem:[%s11288_s3 + $0x718] sm:$0xff]  ;;  %v2205_v0 = vld [vmem:[%s11288_s3 + $0x11a8] sm:$0xff]  ;;  %v1868_v27 = vld [vmem:[%s11288_s3 + $0x720] sm:$0xff] }
 0x2f0   :  { %v6937_v51 = vpack.c.bf16 %v1965_v48, %v1867_v8  ;;  %v1967_v56 = vld [vmem:[%s11288_s3 + $0xa38] sm:$0xff]  ;;  %v6955_v28 = vpack.c.bf16 %v1966_v15, %v1868_v27 }
 0x2f1   :  { %v2591_v5 = vcombine.high %v10086_v12, %v10086_v12 }
 0x2f4   :  { %3945 = vmatmul.mubr.f32.vlgmr.msra.gmra.mrb[16].mxu1 %v9860_v19  ;;  %v2200_v19 = vld [vmem:[%s11288_s3 + $0x1180] sm:$0xff] }
 0x2f5   :  { %6920 = vmatpush1.bf16.xpose.msra.mxu1 %v6919_v4  ;;  %4014 = vmatprep.mubr.f32.mxu1 %v2590_v21  ;;  %v7263_v40 = vpack.c.bf16 %v2200_v19, %v2102_v35  ;;  %v2104_v4 = vld [vmem:[%s11288_s3 + $0xe80] sm:$0xff]  ;;  %v2301_v21 = vld [vmem:[%s11288_s3 + $0x14a8] sm:$0xff] }
 0x2f6   :  { %7260 = vmatpush1.bf16.xpose.msra.mxu0 %v7259_v29  ;;  %6922 = vmatprep.subr.bf16.mxu1 %v6921_v39  ;;  %v2063_v29 = vld [vmem:[%s11288_s3 + $0xd38] sm:$0xff]  ;;  %v2161_v39 = vld [vmem:[%s11288_s3 + $0x1048] sm:$0xff] }
 0x2f7   :  { %7262 = vmatprep.subr.bf16.mxu0 %v7261_v6  ;;  %v2399_v6 = vld [vmem:[%s11288_s3 + $0x17b8] sm:$0xff]  ;;  %v6941_v35 = vpack.c.bf16 %v2161_v39, %v2063_v29  ;;  %v2064_v29 = vld [vmem:[%s11288_s3 + $0xd40] sm:$0xff]  ;;  %v2162_v39 = vld [vmem:[%s11288_s3 + $0x1050] sm:$0xff] }
 0x2f8   :  { %v7281_v19 = vpack.c.bf16 %v2399_v6, %v2301_v21  ;;  %v2302_v21 = vld [vmem:[%s11288_s3 + $0x14b0] sm:$0xff]  ;;  %v2400_v6 = vld [vmem:[%s11288_s3 + $0x17c0] sm:$0xff]  ;;  %v6959_v34 = vpack.c.bf16 %v2162_v39, %v2064_v29 }
 0x2f9   :  { %v7299_v61 = vpack.c.bf16 %v2400_v6, %v2302_v21 }
 0x2fd   :  { %6924 = vmatpush1.bf16.xpose.msra.mxu1 %v6923_v9  ;;  %v2259_v9 = vld [vmem:[%s11288_s3 + $0x1358] sm:$0xff] }
 0x2fe   :  { %7264 = vmatpush1.bf16.xpose.msra.mxu0 %v7263_v40  ;;  %6926 = vmatprep.subr.bf16.mxu1 %v6925_v47  ;;  %v2357_v40 = vld [vmem:[%s11288_s3 + $0x1668] sm:$0xff]  ;;  %v1715_v47 = vld [vmem:[%s11288_s3 + $0x258] sm:$0xff] }
 0x2ff   :  { %7266 = vmatprep.subr.bf16.mxu0 %v7265_v42  ;;  %v1813_v42 = vld [vmem:[%s11288_s3 + $0x568] sm:$0xff]  ;;  %v6945_v10 = vpack.c.bf16 %v2357_v40, %v2259_v9  ;;  %v10267_v9 = vld [vmem:[#allocation2 + $0x98] sm:$0xff]  ;;  %v2260_v40 = vld [vmem:[%s11288_s3 + $0x1360] sm:$0xff] }
 0x300   :  { %v7285_v31 = vpack.c.bf16 %v1813_v42, %v1715_v47  ;;  %v2358_v47 = vld [vmem:[%s11288_s3 + $0x1670] sm:$0xff]  ;;  %v1716_v42 = vld [vmem:[%s11288_s3 + $0x260] sm:$0xff] }
 0x301   :  { %v6963_v11 = vpack.c.bf16 %v2358_v47, %v2260_v40  ;;  %v2013_v40 = vld [vmem:[%s11288_s3 + $0xba8] sm:$0xff] }
 0x305   :  { %6928 = vmatpush1.bf16.xpose.msra.mxu1 %v6927_v52  ;;  %v1812_v52 = vld [vmem:[%s11288_s3 + $0x560] sm:$0xff] }
 0x306   :  { %7268 = vmatpush1.bf16.xpose.msra.mxu0 %v7267_v32  ;;  %6930 = vmatprep.subr.bf16.mxu1 %v6929_v54  ;;  %v1673_v32 = vld [vmem:[%s11288_s3 + $0x108] sm:$0xff]  ;;  %v10172_v54 = vrot.slane %v2762_v25, %v8024_v26  ;;  %v7287_v30 = vpack.c.bf16 %v1812_v52, %v1714_v46 }
 0x307   :  { %7270 = vmatprep.subr.bf16.mxu0 %v7269_v17  ;;  %v1771_v17 = vld [vmem:[%s11288_s3 + $0x418] sm:$0xff]  ;;  %v1913_v25 = vld [vmem:[%s11288_s3 + $0x888] sm:$0xff] }
 0x308   :  { %v6949_v37 = vpack.c.bf16 %v1771_v17, %v1673_v32  ;;  %v2778_v38 = vcombine.high %v10172_v54, %v10172_v54  ;;  %v7305_v32 = vpack.c.bf16 %v2011_v18, %v1913_v25  ;;  %v2592_v17 = vcombine.high %v10185_v16, %v10185_v16  ;;  %v10411_v25 = vld [vmem:[#allocation2 + $0x48] sm:$0xff]  ;;  %v1676_v18 = vld [vmem:[%s11288_s3 + $0x120] sm:$0xff] }
 0x30d   :  { %5485 = vmatmul.mubr.f32.vlgmr.msra.gmra.mrb[12].mxu0 %v9946_v44  ;;  %6932 = vmatpush1.bf16.xpose.msra.mxu1 %v6931_v58  ;;  %v2006_v44 = vld [vmem:[%s11288_s3 + $0xb70] sm:$0xff] }
 0x30e   :  { %7272 = vmatpush1.bf16.xpose.msra.mxu0 %v7271_v13  ;;  %5554 = vmatprep.mubr.f32.mxu0 %v2777_v57  ;;  %v7275_v62 = vpack.c.bf16 %v2006_v44, %v1908_v45  ;;  %v1770_v58 = vld [vmem:[%s11288_s3 + $0x410] sm:$0xff]  ;;  %v2107_v57 = vld [vmem:[%s11288_s3 + $0xe98] sm:$0xff] }
 0x30f   :  { %6934 = vmatprep.subr.bf16.mxu1 %v6933_v43  ;;  %7274 = vmatprep.subr.bf16.mxu0 %v7273_v23  ;;  %v1910_v13 = vld [vmem:[%s11288_s3 + $0x870] sm:$0xff]  ;;  %v2008_v43 = vld [vmem:[%s11288_s3 + $0xb80] sm:$0xff]  ;;  %v1869_v23 = vld [vmem:[%s11288_s3 + $0x728] sm:$0xff]  ;;  %v6951_v14 = vpack.c.bf16 %v1770_v58, %v1672_v49  ;;  %v7293_v48 = vpack.c.bf16 %v2205_v0, %v2107_v57 }
 0x310   :  { %v7291_v45 = vpack.c.bf16 %v2008_v43, %v1910_v13  ;;  %v6953_v44 = vpack.c.bf16 %v1967_v56, %v1869_v23  ;;  %v2207_v49 = vld [vmem:[%s11288_s3 + $0x11b8] sm:$0xff]  ;;  %v1870_v57 = vld [vmem:[%s11288_s3 + $0x730] sm:$0xff]  ;;  %v1968_v0 = vld [vmem:[%s11288_s3 + $0xa40] sm:$0xff] }
 0x311   :  { %v6971_v27 = vpack.c.bf16 %v1968_v0, %v1870_v57 }
 0x314   :  { %4015 = vmatmul.mubr.f32.vlgmr.msra.gmra.mrb[16].mxu1 %v9973_v20  ;;  %v2202_v20 = vld [vmem:[%s11288_s3 + $0x1190] sm:$0xff] }
 0x315   :  { %6936 = vmatpush1.bf16.xpose.msra.mxu1 %v6935_v2  ;;  %4084 = vmatprep.mubr.f32.mxu1 %v2591_v5  ;;  %v7279_v33 = vpack.c.bf16 %v2202_v20, %v2104_v4  ;;  %v2106_v2 = vld [vmem:[%s11288_s3 + $0xe90] sm:$0xff]  ;;  %v2303_v5 = vld [vmem:[%s11288_s3 + $0x14b8] sm:$0xff] }
 0x316   :  { %7276 = vmatpush1.bf16.xpose.msra.mxu0 %v7275_v62  ;;  %6938 = vmatprep.subr.bf16.mxu1 %v6937_v51  ;;  %v2065_v62 = vld [vmem:[%s11288_s3 + $0xd48] sm:$0xff]  ;;  %v2163_v51 = vld [vmem:[%s11288_s3 + $0x1058] sm:$0xff] }
 0x317   :  { %7278 = vmatprep.subr.bf16.mxu0 %v7277_v22  ;;  %v2401_v22 = vld [vmem:[%s11288_s3 + $0x17c8] sm:$0xff]  ;;  %v6957_v4 = vpack.c.bf16 %v2163_v51, %v2065_v62  ;;  %v2066_v62 = vld [vmem:[%s11288_s3 + $0xd50] sm:$0xff]  ;;  %v2164_v51 = vld [vmem:[%s11288_s3 + $0x1060] sm:$0xff] }
 0x318   :  { %v7297_v20 = vpack.c.bf16 %v2401_v22, %v2303_v5  ;;  %v2304_v5 = vld [vmem:[%s11288_s3 + $0x14c0] sm:$0xff]  ;;  %v2402_v22 = vld [vmem:[%s11288_s3 + $0x17d0] sm:$0xff]  ;;  %v6975_v29 = vpack.c.bf16 %v2164_v51, %v2066_v62 }
 0x319   :  { %v7315_v39 = vpack.c.bf16 %v2402_v22, %v2304_v5 }
 0x31d   :  { %6940 = vmatpush1.bf16.xpose.msra.mxu1 %v6939_v41  ;;  %v2261_v41 = vld [vmem:[%s11288_s3 + $0x1368] sm:$0xff] }
 0x31e   :  { %7280 = vmatpush1.bf16.xpose.msra.mxu0 %v7279_v33  ;;  %6942 = vmatprep.subr.bf16.mxu1 %v6941_v35  ;;  %v2359_v33 = vld [vmem:[%s11288_s3 + $0x1678] sm:$0xff]  ;;  %v1717_v35 = vld [vmem:[%s11288_s3 + $0x268] sm:$0xff] }
 0x31f   :  { %7282 = vmatprep.subr.bf16.mxu0 %v7281_v19  ;;  %v1815_v19 = vld [vmem:[%s11288_s3 + $0x578] sm:$0xff]  ;;  %v6961_v59 = vpack.c.bf16 %v2359_v33, %v2261_v41  ;;  %v2779_v41 = vcombine.high %v10267_v9, %v10267_v9  ;;  %v2262_v33 = vld [vmem:[%s11288_s3 + $0x1370] sm:$0xff] }
 0x320   :  { %v7301_v55 = vpack.c.bf16 %v1815_v19, %v1717_v35  ;;  %v2360_v35 = vld [vmem:[%s11288_s3 + $0x1680] sm:$0xff]  ;;  %v1718_v19 = vld [vmem:[%s11288_s3 + $0x270] sm:$0xff] }
 0x321   :  { %v6979_v47 = vpack.c.bf16 %v2360_v35, %v2262_v33  ;;  %v2015_v33 = vld [vmem:[%s11288_s3 + $0xbb8] sm:$0xff] }
 0x325   :  { %6944 = vmatpush1.bf16.xpose.msra.mxu1 %v6943_v60  ;;  %v1814_v60 = vld [vmem:[%s11288_s3 + $0x570] sm:$0xff] }
 0x326   :  { %7284 = vmatpush1.bf16.xpose.msra.mxu0 %v7283_v24  ;;  %6946 = vmatprep.subr.bf16.mxu1 %v6945_v10  ;;  %v1675_v24 = vld [vmem:[%s11288_s3 + $0x118] sm:$0xff]  ;;  %v10286_v10 = vrot.slane %v10267_v9, %v8024_v26  ;;  %v7303_v46 = vpack.c.bf16 %v1814_v60, %v1716_v42 }
 0x327   :  { %7286 = vmatprep.subr.bf16.mxu0 %v7285_v31  ;;  %v1773_v31 = vld [vmem:[%s11288_s3 + $0x428] sm:$0xff]  ;;  %v1915_v9 = vld [vmem:[%s11288_s3 + $0x898] sm:$0xff] }
 0x328   :  { %v6965_v52 = vpack.c.bf16 %v1773_v31, %v1675_v24  ;;  %v2794_v53 = vcombine.high %v10286_v10, %v10286_v10  ;;  %v7321_v24 = vpack.c.bf16 %v2013_v40, %v1915_v9  ;;  %v1678_v40 = vld [vmem:[%s11288_s3 + $0x130] sm:$0xff] }
 0x32d   :  { %5555 = vmatmul.mubr.f32.vlgmr.msra.gmra.mrb[12].mxu0 %v10060_v50  ;;  %6948 = vmatpush1.bf16.xpose.msra.mxu1 %v6947_v1  ;;  %v10199_v50 = vrot.slane %v10185_v16, %v8024_v26  ;;  %v1772_v1 = vld [vmem:[%s11288_s3 + $0x420] sm:$0xff]  ;;  %v2109_v16 = vld [vmem:[%s11288_s3 + $0xea8] sm:$0xff] }
 0x32e   :  { %7288 = vmatpush1.bf16.xpose.msra.mxu0 %v7287_v30  ;;  %5624 = vmatprep.mubr.f32.mxu0 %v2778_v38  ;;  %v1912_v30 = vld [vmem:[%s11288_s3 + $0x880] sm:$0xff]  ;;  %v1969_v38 = vld [vmem:[%s11288_s3 + $0xa48] sm:$0xff]  ;;  %v6967_v58 = vpack.c.bf16 %v1772_v1, %v1674_v36  ;;  %v7309_v56 = vpack.c.bf16 %v2207_v49, %v2109_v16  ;;  %v1970_v49 = vld [vmem:[%s11288_s3 + $0xa50] sm:$0xff] }
 0x32f   :  { %6950 = vmatprep.subr.bf16.mxu1 %v6949_v37  ;;  %7290 = vmatprep.subr.bf16.mxu0 %v7289_v3  ;;  %v2607_v8 = vcombine.high %v10199_v50, %v10199_v50  ;;  %v10312_v37 = vrot.slane %v2592_v17, %v8024_v26  ;;  %v1871_v3 = vld [vmem:[%s11288_s3 + $0x738] sm:$0xff]  ;;  %v2209_v36 = vld [vmem:[%s11288_s3 + $0x11c8] sm:$0xff]  ;;  %v1872_v16 = vld [vmem:[%s11288_s3 + $0x740] sm:$0xff] }
 0x330   :  { %v6969_v43 = vpack.c.bf16 %v1969_v38, %v1871_v3  ;;  %v1971_v17 = vld [vmem:[%s11288_s3 + $0xa58] sm:$0xff]  ;;  %v6987_v57 = vpack.c.bf16 %v1970_v49, %v1872_v16 }
 0x331   :  { %v2608_v23 = vcombine.high %v10312_v37, %v10312_v37 }
 0x334   :  { %4085 = vmatmul.mubr.f32.vlgmr.msra.gmra.mrb[16].mxu1 %v10086_v12  ;;  %v2204_v12 = vld [vmem:[%s11288_s3 + $0x11a0] sm:$0xff] }
 0x335   :  { %6952 = vmatpush1.bf16.xpose.msra.mxu1 %v6951_v14  ;;  %4154 = vmatprep.mubr.f32.mxu1 %v2607_v8  ;;  %v7295_v63 = vpack.c.bf16 %v2204_v12, %v2106_v2  ;;  %v2108_v14 = vld [vmem:[%s11288_s3 + $0xea0] sm:$0xff]  ;;  %v2305_v8 = vld [vmem:[%s11288_s3 + $0x14c8] sm:$0xff] }
 0x336   :  { %7292 = vmatpush1.bf16.xpose.msra.mxu0 %v7291_v45  ;;  %6954 = vmatprep.subr.bf16.mxu1 %v6953_v44  ;;  %v2067_v45 = vld [vmem:[%s11288_s3 + $0xd58] sm:$0xff]  ;;  %v2165_v44 = vld [vmem:[%s11288_s3 + $0x1068] sm:$0xff] }
 0x337   :  { %7294 = vmatprep.subr.bf16.mxu0 %v7293_v48  ;;  %v2403_v48 = vld [vmem:[%s11288_s3 + $0x17d8] sm:$0xff]  ;;  %v6973_v2 = vpack.c.bf16 %v2165_v44, %v2067_v45  ;;  %v2068_v45 = vld [vmem:[%s11288_s3 + $0xd60] sm:$0xff]  ;;  %v2166_v44 = vld [vmem:[%s11288_s3 + $0x1070] sm:$0xff] }
 0x338   :  { %v7313_v12 = vpack.c.bf16 %v2403_v48, %v2305_v8  ;;  %v2306_v8 = vld [vmem:[%s11288_s3 + $0x14d0] sm:$0xff]  ;;  %v2404_v48 = vld [vmem:[%s11288_s3 + $0x17e0] sm:$0xff]  ;;  %v6991_v62 = vpack.c.bf16 %v2166_v44, %v2068_v45 }
 0x339   :  { %v7331_v51 = vpack.c.bf16 %v2404_v48, %v2306_v8 }
 0x33d   :  { %6956 = vmatpush1.bf16.xpose.msra.mxu1 %v6955_v28  ;;  %v2263_v28 = vld [vmem:[%s11288_s3 + $0x1378] sm:$0xff] }
 0x33e   :  { %7296 = vmatpush1.bf16.xpose.msra.mxu0 %v7295_v63  ;;  %6958 = vmatprep.subr.bf16.mxu1 %v6957_v4  ;;  %v2361_v63 = vld [vmem:[%s11288_s3 + $0x1688] sm:$0xff]  ;;  %v1719_v4 = vld [vmem:[%s11288_s3 + $0x278] sm:$0xff] }
 0x33f   :  { %7298 = vmatprep.subr.bf16.mxu0 %v7297_v20  ;;  %v1817_v20 = vld [vmem:[%s11288_s3 + $0x588] sm:$0xff]  ;;  %v6977_v21 = vpack.c.bf16 %v2361_v63, %v2263_v28  ;;  %v10493_v28 = vld [vmem:[#allocation2 + $0xa0] sm:$0xff] }
 0x340   :  { %v7317_v6 = vpack.c.bf16 %v1817_v20, %v1719_v4  ;;  %v2264_v63 = vld [vmem:[%s11288_s3 + $0x1380] sm:$0xff]  ;;  %v2362_v4 = vld [vmem:[%s11288_s3 + $0x1690] sm:$0xff] }
 0x341   :  { %v1720_v20 = vld [vmem:[%s11288_s3 + $0x280] sm:$0xff]  ;;  %v6995_v35 = vpack.c.bf16 %v2362_v4, %v2264_v63  ;;  %v2017_v63 = vld [vmem:[%s11288_s3 + $0xbc8] sm:$0xff] }
 0x345   :  { %6960 = vmatpush1.bf16.xpose.msra.mxu1 %v6959_v34  ;;  %v1816_v34 = vld [vmem:[%s11288_s3 + $0x580] sm:$0xff] }
 0x346   :  { %7300 = vmatpush1.bf16.xpose.msra.mxu0 %v7299_v61  ;;  %6962 = vmatprep.subr.bf16.mxu1 %v6961_v59  ;;  %v1677_v61 = vld [vmem:[%s11288_s3 + $0x128] sm:$0xff]  ;;  %v10398_v59 = vrot.slane %v2779_v41, %v8024_v26  ;;  %v7319_v42 = vpack.c.bf16 %v1816_v34, %v1718_v19 }
 0x347   :  { %7302 = vmatprep.subr.bf16.mxu0 %v7301_v55  ;;  %v1775_v55 = vld [vmem:[%s11288_s3 + $0x438] sm:$0xff]  ;;  %v1917_v41 = vld [vmem:[%s11288_s3 + $0x8a8] sm:$0xff] }
 0x348   :  { %v6981_v60 = vpack.c.bf16 %v1775_v55, %v1677_v61  ;;  %v2795_v31 = vcombine.high %v10398_v59, %v10398_v59  ;;  %v7337_v61 = vpack.c.bf16 %v2015_v33, %v1917_v41  ;;  %v2609_v55 = vcombine.high %v10411_v25, %v10411_v25  ;;  %v10637_v41 = vld [vmem:[#allocation2 + $0x50] sm:$0xff]  ;;  %v1680_v33 = vld [vmem:[%s11288_s3 + $0x140] sm:$0xff] }
 0x34d   :  { %5625 = vmatmul.mubr.f32.vlgmr.msra.gmra.mrb[12].mxu0 %v10172_v54  ;;  %6964 = vmatpush1.bf16.xpose.msra.mxu1 %v6963_v11  ;;  %v2010_v54 = vld [vmem:[%s11288_s3 + $0xb90] sm:$0xff] }
 0x34e   :  { %7304 = vmatpush1.bf16.xpose.msra.mxu0 %v7303_v46  ;;  %5694 = vmatprep.mubr.f32.mxu0 %v2794_v53  ;;  %v7307_v13 = vpack.c.bf16 %v2010_v54, %v1912_v30  ;;  %v1774_v11 = vld [vmem:[%s11288_s3 + $0x430] sm:$0xff]  ;;  %v2111_v53 = vld [vmem:[%s11288_s3 + $0xeb8] sm:$0xff] }
 0x34f   :  { %6966 = vmatprep.subr.bf16.mxu1 %v6965_v52  ;;  %7306 = vmatprep.subr.bf16.mxu0 %v7305_v32  ;;  %v1914_v46 = vld [vmem:[%s11288_s3 + $0x890] sm:$0xff]  ;;  %v2012_v52 = vld [vmem:[%s11288_s3 + $0xba0] sm:$0xff]  ;;  %v1873_v32 = vld [vmem:[%s11288_s3 + $0x748] sm:$0xff]  ;;  %v6983_v1 = vpack.c.bf16 %v1774_v11, %v1676_v18  ;;  %v7325_v38 = vpack.c.bf16 %v2209_v36, %v2111_v53 }
 0x350   :  { %v7323_v30 = vpack.c.bf16 %v2012_v52, %v1914_v46  ;;  %v6985_v54 = vpack.c.bf16 %v1971_v17, %v1873_v32  ;;  %v2211_v18 = vld [vmem:[%s11288_s3 + $0x11d8] sm:$0xff]  ;;  %v1874_v53 = vld [vmem:[%s11288_s3 + $0x750] sm:$0xff]  ;;  %v1972_v36 = vld [vmem:[%s11288_s3 + $0xa60] sm:$0xff] }
 0x351   :  { %v7003_v16 = vpack.c.bf16 %v1972_v36, %v1874_v53 }
 0x354   :  { %4155 = vmatmul.mubr.f32.vlgmr.msra.gmra.mrb[16].mxu1 %v10199_v50  ;;  %v2206_v50 = vld [vmem:[%s11288_s3 + $0x11b0] sm:$0xff] }
 0x355   :  { %6968 = vmatpush1.bf16.xpose.msra.mxu1 %v6967_v58  ;;  %4224 = vmatprep.mubr.f32.mxu1 %v2608_v23  ;;  %v7311_v15 = vpack.c.bf16 %v2206_v50, %v2108_v14  ;;  %v2110_v58 = vld [vmem:[%s11288_s3 + $0xeb0] sm:$0xff]  ;;  %v2307_v23 = vld [vmem:[%s11288_s3 + $0x14d8] sm:$0xff] }
 0x356   :  { %7308 = vmatpush1.bf16.xpose.msra.mxu0 %v7307_v13  ;;  %6970 = vmatprep.subr.bf16.mxu1 %v6969_v43  ;;  %v2069_v13 = vld [vmem:[%s11288_s3 + $0xd68] sm:$0xff]  ;;  %v2167_v43 = vld [vmem:[%s11288_s3 + $0x1078] sm:$0xff] }
 0x357   :  { %7310 = vmatprep.subr.bf16.mxu0 %v7309_v56  ;;  %v2405_v56 = vld [vmem:[%s11288_s3 + $0x17e8] sm:$0xff]  ;;  %v6989_v14 = vpack.c.bf16 %v2167_v43, %v2069_v13  ;;  %v2070_v13 = vld [vmem:[%s11288_s3 + $0xd70] sm:$0xff]  ;;  %v2168_v43 = vld [vmem:[%s11288_s3 + $0x1080] sm:$0xff] }
 0x358   :  { %v7329_v50 = vpack.c.bf16 %v2405_v56, %v2307_v23  ;;  %v2308_v23 = vld [vmem:[%s11288_s3 + $0x14e0] sm:$0xff]  ;;  %v2406_v56 = vld [vmem:[%s11288_s3 + $0x17f0] sm:$0xff]  ;;  %v7007_v45 = vpack.c.bf16 %v2168_v43, %v2070_v13 }
 0x359   :  { %v7347_v44 = vpack.c.bf16 %v2406_v56, %v2308_v23 }
 0x35d   :  { %6972 = vmatpush1.bf16.xpose.msra.mxu1 %v6971_v27  ;;  %v2265_v27 = vld [vmem:[%s11288_s3 + $0x1388] sm:$0xff] }
 0x35e   :  { %7312 = vmatpush1.bf16.xpose.msra.mxu0 %v7311_v15  ;;  %6974 = vmatprep.subr.bf16.mxu1 %v6973_v2  ;;  %v2363_v15 = vld [vmem:[%s11288_s3 + $0x1698] sm:$0xff]  ;;  %v1721_v2 = vld [vmem:[%s11288_s3 + $0x288] sm:$0xff] }
 0x35f   :  { %7314 = vmatprep.subr.bf16.mxu0 %v7313_v12  ;;  %v1819_v12 = vld [vmem:[%s11288_s3 + $0x598] sm:$0xff]  ;;  %v6993_v5 = vpack.c.bf16 %v2363_v15, %v2265_v27  ;;  %v2796_v27 = vcombine.high %v10493_v28, %v10493_v28  ;;  %v2266_v15 = vld [vmem:[%s11288_s3 + $0x1390] sm:$0xff] }
 0x360   :  { %v7333_v22 = vpack.c.bf16 %v1819_v12, %v1721_v2  ;;  %v2364_v2 = vld [vmem:[%s11288_s3 + $0x16a0] sm:$0xff]  ;;  %v1722_v12 = vld [vmem:[%s11288_s3 + $0x290] sm:$0xff] }
 0x361   :  { %v7011_v4 = vpack.c.bf16 %v2364_v2, %v2266_v15  ;;  %v2019_v15 = vld [vmem:[%s11288_s3 + $0xbd8] sm:$0xff] }
 0x365   :  { %6976 = vmatpush1.bf16.xpose.msra.mxu1 %v6975_v29  ;;  %v1818_v29 = vld [vmem:[%s11288_s3 + $0x590] sm:$0xff] }
 0x366   :  { %7316 = vmatpush1.bf16.xpose.msra.mxu0 %v7315_v39  ;;  %6978 = vmatprep.subr.bf16.mxu1 %v6977_v21  ;;  %v1679_v39 = vld [vmem:[%s11288_s3 + $0x138] sm:$0xff]  ;;  %v10512_v21 = vrot.slane %v10493_v28, %v8024_v26  ;;  %v7335_v19 = vpack.c.bf16 %v1818_v29, %v1720_v20 }
 0x367   :  { %7318 = vmatprep.subr.bf16.mxu0 %v7317_v6  ;;  %v1777_v6 = vld [vmem:[%s11288_s3 + $0x448] sm:$0xff]  ;;  %v1919_v28 = vld [vmem:[%s11288_s3 + $0x8b8] sm:$0xff] }
 0x368   :  { %v6997_v34 = vpack.c.bf16 %v1777_v6, %v1679_v39  ;;  %v2811_v9 = vcombine.high %v10512_v21, %v10512_v21  ;;  %v7353_v39 = vpack.c.bf16 %v2017_v63, %v1919_v28  ;;  %v1682_v63 = vld [vmem:[%s11288_s3 + $0x150] sm:$0xff] }
 0x36d   :  { %5695 = vmatmul.mubr.f32.vlgmr.msra.gmra.mrb[12].mxu0 %v10286_v10  ;;  %6980 = vmatpush1.bf16.xpose.msra.mxu1 %v6979_v47  ;;  %v10425_v10 = vrot.slane %v10411_v25, %v8024_v26  ;;  %v1776_v47 = vld [vmem:[%s11288_s3 + $0x440] sm:$0xff]  ;;  %v2113_v25 = vld [vmem:[%s11288_s3 + $0xec8] sm:$0xff] }
 0x36e   :  { %7320 = vmatpush1.bf16.xpose.msra.mxu0 %v7319_v42  ;;  %5764 = vmatprep.mubr.f32.mxu0 %v2795_v31  ;;  %v1916_v42 = vld [vmem:[%s11288_s3 + $0x8a0] sm:$0xff]  ;;  %v1973_v31 = vld [vmem:[%s11288_s3 + $0xa68] sm:$0xff]  ;;  %v6999_v11 = vpack.c.bf16 %v1776_v47, %v1678_v40  ;;  %v7341_v17 = vpack.c.bf16 %v2211_v18, %v2113_v25  ;;  %v1974_v18 = vld [vmem:[%s11288_s3 + $0xa70] sm:$0xff] }
 0x36f   :  { %6982 = vmatprep.subr.bf16.mxu1 %v6981_v60  ;;  %7322 = vmatprep.subr.bf16.mxu0 %v7321_v24  ;;  %v2624_v3 = vcombine.high %v10425_v10, %v10425_v10  ;;  %v10538_v60 = vrot.slane %v2609_v55, %v8024_v26  ;;  %v1875_v24 = vld [vmem:[%s11288_s3 + $0x758] sm:$0xff]  ;;  %v2213_v40 = vld [vmem:[%s11288_s3 + $0x11e8] sm:$0xff]  ;;  %v1876_v25 = vld [vmem:[%s11288_s3 + $0x760] sm:$0xff] }
 0x370   :  { %v7001_v52 = vpack.c.bf16 %v1973_v31, %v1875_v24  ;;  %v1975_v55 = vld [vmem:[%s11288_s3 + $0xa78] sm:$0xff]  ;;  %v7019_v53 = vpack.c.bf16 %v1974_v18, %v1876_v25 }
 0x371   :  { %v2625_v32 = vcombine.high %v10538_v60, %v10538_v60 }
 0x374   :  { %4225 = vmatmul.mubr.f32.vlgmr.msra.gmra.mrb[16].mxu1 %v10312_v37  ;;  %v2208_v37 = vld [vmem:[%s11288_s3 + $0x11c0] sm:$0xff] }
 0x375   :  { %6984 = vmatpush1.bf16.xpose.msra.mxu1 %v6983_v1  ;;  %4294 = vmatprep.mubr.f32.mxu1 %v2624_v3  ;;  %v7327_v0 = vpack.c.bf16 %v2208_v37, %v2110_v58  ;;  %v2112_v1 = vld [vmem:[%s11288_s3 + $0xec0] sm:$0xff]  ;;  %v2309_v3 = vld [vmem:[%s11288_s3 + $0x14e8] sm:$0xff] }
 0x376   :  { %7324 = vmatpush1.bf16.xpose.msra.mxu0 %v7323_v30  ;;  %6986 = vmatprep.subr.bf16.mxu1 %v6985_v54  ;;  %v2071_v30 = vld [vmem:[%s11288_s3 + $0xd78] sm:$0xff]  ;;  %v2169_v54 = vld [vmem:[%s11288_s3 + $0x1088] sm:$0xff] }
 0x377   :  { %7326 = vmatprep.subr.bf16.mxu0 %v7325_v38  ;;  %v2407_v38 = vld [vmem:[%s11288_s3 + $0x17f8] sm:$0xff]  ;;  %v7005_v58 = vpack.c.bf16 %v2169_v54, %v2071_v30  ;;  %v2072_v30 = vld [vmem:[%s11288_s3 + $0xd80] sm:$0xff]  ;;  %v2170_v54 = vld [vmem:[%s11288_s3 + $0x1090] sm:$0xff] }
 0x378   :  { %v7345_v37 = vpack.c.bf16 %v2407_v38, %v2309_v3  ;;  %v2310_v3 = vld [vmem:[%s11288_s3 + $0x14f0] sm:$0xff]  ;;  %v2408_v38 = vld [vmem:[%s11288_s3 + $0x1800] sm:$0xff]  ;;  %v7023_v13 = vpack.c.bf16 %v2170_v54, %v2072_v30 }
 0x379   :  { %v7363_v43 = vpack.c.bf16 %v2408_v38, %v2310_v3 }
 0x37d   :  { %6988 = vmatpush1.bf16.xpose.msra.mxu1 %v6987_v57  ;;  %v2267_v57 = vld [vmem:[%s11288_s3 + $0x1398] sm:$0xff] }
 0x37e   :  { %7328 = vmatpush1.bf16.xpose.msra.mxu0 %v7327_v0  ;;  %6990 = vmatprep.subr.bf16.mxu1 %v6989_v14  ;;  %v2365_v0 = vld [vmem:[%s11288_s3 + $0x16a8] sm:$0xff]  ;;  %v1723_v14 = vld [vmem:[%s11288_s3 + $0x298] sm:$0xff] }
 0x37f   :  { %7330 = vmatprep.subr.bf16.mxu0 %v7329_v50  ;;  %v1821_v50 = vld [vmem:[%s11288_s3 + $0x5a8] sm:$0xff]  ;;  %v7009_v8 = vpack.c.bf16 %v2365_v0, %v2267_v57  ;;  %v2268_v0 = vld [vmem:[%s11288_s3 + $0x13a0] sm:$0xff] }
 0x380   :  { %v7349_v48 = vpack.c.bf16 %v1821_v50, %v1723_v14  ;;  %v10719_v57 = vld [vmem:[#allocation2 + $0xa8] sm:$0xff]  ;;  %v2366_v14 = vld [vmem:[%s11288_s3 + $0x16b0] sm:$0xff]  ;;  %v1724_v50 = vld [vmem:[%s11288_s3 + $0x2a0] sm:$0xff] }
 0x381   :  { %v7027_v2 = vpack.c.bf16 %v2366_v14, %v2268_v0  ;;  %v2021_v0 = vld [vmem:[%s11288_s3 + $0xbe8] sm:$0xff] }
 0x385   :  { %6992 = vmatpush1.bf16.xpose.msra.mxu1 %v6991_v62  ;;  %v1820_v62 = vld [vmem:[%s11288_s3 + $0x5a0] sm:$0xff] }
 0x386   :  { %7332 = vmatpush1.bf16.xpose.msra.mxu0 %v7331_v51  ;;  %6994 = vmatprep.subr.bf16.mxu1 %v6993_v5  ;;  %v1681_v51 = vld [vmem:[%s11288_s3 + $0x148] sm:$0xff]  ;;  %v10624_v5 = vrot.slane %v2796_v27, %v8024_v26  ;;  %v7351_v20 = vpack.c.bf16 %v1820_v62, %v1722_v12 }
 0x387   :  { %7334 = vmatprep.subr.bf16.mxu0 %v7333_v22  ;;  %v1779_v22 = vld [vmem:[%s11288_s3 + $0x458] sm:$0xff]  ;;  %v1921_v27 = vld [vmem:[%s11288_s3 + $0x8c8] sm:$0xff] }
 0x388   :  { %v7013_v29 = vpack.c.bf16 %v1779_v22, %v1681_v51  ;;  %v2812_v6 = vcombine.high %v10624_v5, %v10624_v5  ;;  %v7369_v51 = vpack.c.bf16 %v2019_v15, %v1921_v27  ;;  %v2626_v22 = vcombine.high %v10637_v41, %v10637_v41  ;;  %v10863_v27 = vld [vmem:[#allocation2 + $0x58] sm:$0xff]  ;;  %v1684_v15 = vld [vmem:[%s11288_s3 + $0x160] sm:$0xff] }
 0x38d   :  { %5765 = vmatmul.mubr.f32.vlgmr.msra.gmra.mrb[12].mxu0 %v10398_v59  ;;  %6996 = vmatpush1.bf16.xpose.msra.mxu1 %v6995_v35  ;;  %v2014_v59 = vld [vmem:[%s11288_s3 + $0xbb0] sm:$0xff] }
 0x38e   :  { %7336 = vmatpush1.bf16.xpose.msra.mxu0 %v7335_v19  ;;  %5834 = vmatprep.mubr.f32.mxu0 %v2811_v9  ;;  %v7339_v46 = vpack.c.bf16 %v2014_v59, %v1916_v42  ;;  %v1778_v35 = vld [vmem:[%s11288_s3 + $0x450] sm:$0xff]  ;;  %v2115_v9 = vld [vmem:[%s11288_s3 + $0xed8] sm:$0xff] }
 0x38f   :  { %6998 = vmatprep.subr.bf16.mxu1 %v6997_v34  ;;  %7338 = vmatprep.subr.bf16.mxu0 %v7337_v61  ;;  %v1918_v19 = vld [vmem:[%s11288_s3 + $0x8b0] sm:$0xff]  ;;  %v2016_v34 = vld [vmem:[%s11288_s3 + $0xbc0] sm:$0xff]  ;;  %v1877_v61 = vld [vmem:[%s11288_s3 + $0x768] sm:$0xff]  ;;  %v7015_v47 = vpack.c.bf16 %v1778_v35, %v1680_v33  ;;  %v7357_v31 = vpack.c.bf16 %v2213_v40, %v2115_v9 }
 0x390   :  { %v7355_v42 = vpack.c.bf16 %v2016_v34, %v1918_v19  ;;  %v7017_v59 = vpack.c.bf16 %v1975_v55, %v1877_v61  ;;  %v2215_v33 = vld [vmem:[%s11288_s3 + $0x11f8] sm:$0xff]  ;;  %v1878_v9 = vld [vmem:[%s11288_s3 + $0x770] sm:$0xff]  ;;  %v1976_v40 = vld [vmem:[%s11288_s3 + $0xa80] sm:$0xff] }
 0x391   :  { %v7035_v25 = vpack.c.bf16 %v1976_v40, %v1878_v9 }
 0x394   :  { %4295 = vmatmul.mubr.f32.vlgmr.msra.gmra.mrb[16].mxu1 %v10425_v10  ;;  %v2210_v10 = vld [vmem:[%s11288_s3 + $0x11d0] sm:$0xff] }
 0x395   :  { %7000 = vmatpush1.bf16.xpose.msra.mxu1 %v6999_v11  ;;  %4364 = vmatprep.mubr.f32.mxu1 %v2625_v32  ;;  %v7343_v49 = vpack.c.bf16 %v2210_v10, %v2112_v1  ;;  %v2114_v11 = vld [vmem:[%s11288_s3 + $0xed0] sm:$0xff]  ;;  %v2311_v32 = vld [vmem:[%s11288_s3 + $0x14f8] sm:$0xff] }
 0x396   :  { %7340 = vmatpush1.bf16.xpose.msra.mxu0 %v7339_v46  ;;  %7002 = vmatprep.subr.bf16.mxu1 %v7001_v52  ;;  %v2073_v46 = vld [vmem:[%s11288_s3 + $0xd88] sm:$0xff]  ;;  %v2171_v52 = vld [vmem:[%s11288_s3 + $0x1098] sm:$0xff] }
 0x397   :  { %7342 = vmatprep.subr.bf16.mxu0 %v7341_v17  ;;  %v2409_v17 = vld [vmem:[%s11288_s3 + $0x1808] sm:$0xff]  ;;  %v7021_v1 = vpack.c.bf16 %v2171_v52, %v2073_v46  ;;  %v2074_v46 = vld [vmem:[%s11288_s3 + $0xd90] sm:$0xff]  ;;  %v2172_v52 = vld [vmem:[%s11288_s3 + $0x10a0] sm:$0xff] }
 0x398   :  { %v7361_v10 = vpack.c.bf16 %v2409_v17, %v2311_v32  ;;  %v2312_v32 = vld [vmem:[%s11288_s3 + $0x1500] sm:$0xff]  ;;  %v2410_v17 = vld [vmem:[%s11288_s3 + $0x1810] sm:$0xff]  ;;  %v7039_v30 = vpack.c.bf16 %v2172_v52, %v2074_v46 }
 0x399   :  { %v7379_v54 = vpack.c.bf16 %v2410_v17, %v2312_v32 }
 0x39d   :  { %7004 = vmatpush1.bf16.xpose.msra.mxu1 %v7003_v16  ;;  %v2269_v16 = vld [vmem:[%s11288_s3 + $0x13a8] sm:$0xff] }
 0x39e   :  { %7344 = vmatpush1.bf16.xpose.msra.mxu0 %v7343_v49  ;;  %7006 = vmatprep.subr.bf16.mxu1 %v7005_v58  ;;  %v2367_v49 = vld [vmem:[%s11288_s3 + $0x16b8] sm:$0xff]  ;;  %v1725_v58 = vld [vmem:[%s11288_s3 + $0x2a8] sm:$0xff] }
 0x39f   :  { %7346 = vmatprep.subr.bf16.mxu0 %v7345_v37  ;;  %v1823_v37 = vld [vmem:[%s11288_s3 + $0x5b8] sm:$0xff]  ;;  %v7025_v23 = vpack.c.bf16 %v2367_v49, %v2269_v16  ;;  %v2813_v16 = vcombine.high %v10719_v57, %v10719_v57  ;;  %v2270_v49 = vld [vmem:[%s11288_s3 + $0x13b0] sm:$0xff] }
 0x3a0   :  { %v7365_v56 = vpack.c.bf16 %v1823_v37, %v1725_v58  ;;  %v2368_v58 = vld [vmem:[%s11288_s3 + $0x16c0] sm:$0xff]  ;;  %v1726_v37 = vld [vmem:[%s11288_s3 + $0x2b0] sm:$0xff] }
 0x3a1   :  { %v7043_v14 = vpack.c.bf16 %v2368_v58, %v2270_v49  ;;  %v2023_v49 = vld [vmem:[%s11288_s3 + $0xbf8] sm:$0xff] }
 0x3a5   :  { %7008 = vmatpush1.bf16.xpose.msra.mxu1 %v7007_v45  ;;  %v1822_v45 = vld [vmem:[%s11288_s3 + $0x5b0] sm:$0xff] }
 0x3a6   :  { %7348 = vmatpush1.bf16.xpose.msra.mxu0 %v7347_v44  ;;  %7010 = vmatprep.subr.bf16.mxu1 %v7009_v8  ;;  %v1683_v44 = vld [vmem:[%s11288_s3 + $0x158] sm:$0xff]  ;;  %v10738_v8 = vrot.slane %v10719_v57, %v8024_v26  ;;  %v7367_v12 = vpack.c.bf16 %v1822_v45, %v1724_v50 }
 0x3a7   :  { %7350 = vmatprep.subr.bf16.mxu0 %v7349_v48  ;;  %v1781_v48 = vld [vmem:[%s11288_s3 + $0x468] sm:$0xff]  ;;  %v1923_v57 = vld [vmem:[%s11288_s3 + $0x8d8] sm:$0xff] }
 0x3a8   :  { %v7029_v62 = vpack.c.bf16 %v1781_v48, %v1683_v44  ;;  %v2828_v28 = vcombine.high %v10738_v8, %v10738_v8  ;;  %v7385_v44 = vpack.c.bf16 %v2021_v0, %v1923_v57  ;;  %v1686_v0 = vld [vmem:[%s11288_s3 + $0x170] sm:$0xff] }
 0x3ad   :  { %5835 = vmatmul.mubr.f32.vlgmr.msra.gmra.mrb[12].mxu0 %v10512_v21  ;;  %7012 = vmatpush1.bf16.xpose.msra.mxu1 %v7011_v4  ;;  %v10651_v21 = vrot.slane %v10637_v41, %v8024_v26  ;;  %v1780_v4 = vld [vmem:[%s11288_s3 + $0x460] sm:$0xff]  ;;  %v2117_v41 = vld [vmem:[%s11288_s3 + $0xee8] sm:$0xff] }
 0x3ae   :  { %7352 = vmatpush1.bf16.xpose.msra.mxu0 %v7351_v20  ;;  %5904 = vmatprep.mubr.f32.mxu0 %v2812_v6  ;;  %v1920_v20 = vld [vmem:[%s11288_s3 + $0x8c0] sm:$0xff]  ;;  %v1977_v6 = vld [vmem:[%s11288_s3 + $0xa88] sm:$0xff]  ;;  %v7031_v35 = vpack.c.bf16 %v1780_v4, %v1682_v63  ;;  %v7373_v55 = vpack.c.bf16 %v2215_v33, %v2117_v41  ;;  %v1978_v33 = vld [vmem:[%s11288_s3 + $0xa90] sm:$0xff] }
 0x3af   :  { %7014 = vmatprep.subr.bf16.mxu1 %v7013_v29  ;;  %7354 = vmatprep.subr.bf16.mxu0 %v7353_v39  ;;  %v2641_v24 = vcombine.high %v10651_v21, %v10651_v21  ;;  %v10764_v29 = vrot.slane %v2626_v22, %v8024_v26  ;;  %v1879_v39 = vld [vmem:[%s11288_s3 + $0x778] sm:$0xff]  ;;  %v2217_v63 = vld [vmem:[%s11288_s3 + $0x1208] sm:$0xff]  ;;  %v1880_v41 = vld [vmem:[%s11288_s3 + $0x780] sm:$0xff] }
 0x3b0   :  { %v7033_v34 = vpack.c.bf16 %v1977_v6, %v1879_v39  ;;  %v1979_v22 = vld [vmem:[%s11288_s3 + $0xa98] sm:$0xff]  ;;  %v7051_v9 = vpack.c.bf16 %v1978_v33, %v1880_v41 }
 0x3b1   :  { %v2642_v61 = vcombine.high %v10764_v29, %v10764_v29 }
 0x3b4   :  { %4365 = vmatmul.mubr.f32.vlgmr.msra.gmra.mrb[16].mxu1 %v10538_v60  ;;  %v2212_v60 = vld [vmem:[%s11288_s3 + $0x11e0] sm:$0xff] }
 0x3b5   :  { %7016 = vmatpush1.bf16.xpose.msra.mxu1 %v7015_v47  ;;  %4434 = vmatprep.mubr.f32.mxu1 %v2641_v24  ;;  %v7359_v36 = vpack.c.bf16 %v2212_v60, %v2114_v11  ;;  %v2116_v47 = vld [vmem:[%s11288_s3 + $0xee0] sm:$0xff]  ;;  %v2313_v24 = vld [vmem:[%s11288_s3 + $0x1508] sm:$0xff] }
 0x3b6   :  { %7356 = vmatpush1.bf16.xpose.msra.mxu0 %v7355_v42  ;;  %7018 = vmatprep.subr.bf16.mxu1 %v7017_v59  ;;  %v2075_v42 = vld [vmem:[%s11288_s3 + $0xd98] sm:$0xff]  ;;  %v2173_v59 = vld [vmem:[%s11288_s3 + $0x10a8] sm:$0xff] }
 0x3b7   :  { %7358 = vmatprep.subr.bf16.mxu0 %v7357_v31  ;;  %v2411_v31 = vld [vmem:[%s11288_s3 + $0x1818] sm:$0xff]  ;;  %v7037_v11 = vpack.c.bf16 %v2173_v59, %v2075_v42  ;;  %v2076_v42 = vld [vmem:[%s11288_s3 + $0xda0] sm:$0xff]  ;;  %v2174_v59 = vld [vmem:[%s11288_s3 + $0x10b0] sm:$0xff] }
 0x3b8   :  { %v7377_v60 = vpack.c.bf16 %v2411_v31, %v2313_v24  ;;  %v2314_v24 = vld [vmem:[%s11288_s3 + $0x1510] sm:$0xff]  ;;  %v2412_v31 = vld [vmem:[%s11288_s3 + $0x1820] sm:$0xff]  ;;  %v7055_v46 = vpack.c.bf16 %v2174_v59, %v2076_v42 }
 0x3b9   :  { %v7395_v52 = vpack.c.bf16 %v2412_v31, %v2314_v24 }
 0x3bd   :  { %7020 = vmatpush1.bf16.xpose.msra.mxu1 %v7019_v53  ;;  %v2271_v53 = vld [vmem:[%s11288_s3 + $0x13b8] sm:$0xff] }
 0x3be   :  { %7360 = vmatpush1.bf16.xpose.msra.mxu0 %v7359_v36  ;;  %7022 = vmatprep.subr.bf16.mxu1 %v7021_v1  ;;  %v2369_v36 = vld [vmem:[%s11288_s3 + $0x16c8] sm:$0xff]  ;;  %v1727_v1 = vld [vmem:[%s11288_s3 + $0x2b8] sm:$0xff] }
 0x3bf   :  { %7362 = vmatprep.subr.bf16.mxu0 %v7361_v10  ;;  %v1825_v10 = vld [vmem:[%s11288_s3 + $0x5c8] sm:$0xff]  ;;  %v7041_v3 = vpack.c.bf16 %v2369_v36, %v2271_v53  ;;  %v10945_v53 = vld [vmem:[#allocation2 + $0xb0] sm:$0xff]  ;;  %v2272_v36 = vld [vmem:[%s11288_s3 + $0x13c0] sm:$0xff] }
 0x3c0   :  { %v7381_v38 = vpack.c.bf16 %v1825_v10, %v1727_v1  ;;  %v2370_v1 = vld [vmem:[%s11288_s3 + $0x16d0] sm:$0xff]  ;;  %v1728_v10 = vld [vmem:[%s11288_s3 + $0x2c0] sm:$0xff] }
 0x3c1   :  { %v7059_v58 = vpack.c.bf16 %v2370_v1, %v2272_v36 }
 0x3c5   :  { %7024 = vmatpush1.bf16.xpose.msra.mxu1 %v7023_v13  ;;  %v1824_v13 = vld [vmem:[%s11288_s3 + $0x5c0] sm:$0xff] }
 0x3c6   :  { %7364 = vmatpush1.bf16.xpose.msra.mxu0 %v7363_v43  ;;  %7026 = vmatprep.subr.bf16.mxu1 %v7025_v23  ;;  %v1685_v43 = vld [vmem:[%s11288_s3 + $0x168] sm:$0xff]  ;;  %v10850_v23 = vrot.slane %v2813_v16, %v8024_v26  ;;  %v7383_v50 = vpack.c.bf16 %v1824_v13, %v1726_v37 }
 0x3c7   :  { %7366 = vmatprep.subr.bf16.mxu0 %v7365_v56  ;;  %v1783_v56 = vld [vmem:[%s11288_s3 + $0x478] sm:$0xff]  ;;  %v1925_v16 = vld [vmem:[%s11288_s3 + $0x8e8] sm:$0xff] }
 0x3c8   :  { %v7045_v45 = vpack.c.bf16 %v1783_v56, %v1685_v43  ;;  %v2829_v48 = vcombine.high %v10850_v23, %v10850_v23  ;;  %v7401_v43 = vpack.c.bf16 %v2023_v49, %v1925_v16  ;;  %v2643_v56 = vcombine.high %v10863_v27, %v10863_v27 }
 0x3cd   :  { %5905 = vmatmul.mubr.f32.vlgmr.msra.gmra.mrb[12].mxu0 %v10624_v5  ;;  %7028 = vmatpush1.bf16.xpose.msra.mxu1 %v7027_v2  ;;  %v2018_v5 = vld [vmem:[%s11288_s3 + $0xbd0] sm:$0xff] }
 0x3ce   :  { %7368 = vmatpush1.bf16.xpose.msra.mxu0 %v7367_v12  ;;  %5974 = vmatprep.mubr.f32.mxu0 %v2828_v28  ;;  %v7371_v19 = vpack.c.bf16 %v2018_v5, %v1920_v20  ;;  %v1782_v2 = vld [vmem:[%s11288_s3 + $0x470] sm:$0xff]  ;;  %v2119_v28 = vld [vmem:[%s11288_s3 + $0xef8] sm:$0xff] }
 0x3cf   :  { %7030 = vmatprep.subr.bf16.mxu1 %v7029_v62  ;;  %7370 = vmatprep.subr.bf16.mxu0 %v7369_v51  ;;  %v1922_v12 = vld [vmem:[%s11288_s3 + $0x8d0] sm:$0xff]  ;;  %v2020_v62 = vld [vmem:[%s11288_s3 + $0xbe0] sm:$0xff]  ;;  %v1881_v51 = vld [vmem:[%s11288_s3 + $0x788] sm:$0xff]  ;;  %v7047_v4 = vpack.c.bf16 %v1782_v2, %v1684_v15  ;;  %v7389_v6 = vpack.c.bf16 %v2217_v63, %v2119_v28 }
 0x3d0   :  { %v7387_v20 = vpack.c.bf16 %v2020_v62, %v1922_v12  ;;  %v7049_v5 = vpack.c.bf16 %v1979_v22, %v1881_v51  ;;  %v2219_v15 = vld [vmem:[%s11288_s3 + $0x1218] sm:$0xff]  ;;  %v1882_v28 = vld [vmem:[%s11288_s3 + $0x790] sm:$0xff]  ;;  %v1980_v63 = vld [vmem:[%s11288_s3 + $0xaa0] sm:$0xff] }
 0x3d1   :  { %v7067_v41 = vpack.c.bf16 %v1980_v63, %v1882_v28  ;;  %v1928_v63 = vld [vmem:[%s11288_s3 + $0x900] sm:$0xff] }
 0x3d4   :  { %4435 = vmatmul.mubr.f32.vlgmr.msra.gmra.mrb[16].mxu1 %v10651_v21  ;;  %v2214_v21 = vld [vmem:[%s11288_s3 + $0x11f0] sm:$0xff] }
 0x3d5   :  { %7032 = vmatpush1.bf16.xpose.msra.mxu1 %v7031_v35  ;;  %4504 = vmatprep.mubr.f32.mxu1 %v2642_v61  ;;  %v7375_v18 = vpack.c.bf16 %v2214_v21, %v2116_v47  ;;  %v2118_v35 = vld [vmem:[%s11288_s3 + $0xef0] sm:$0xff]  ;;  %v2315_v61 = vld [vmem:[%s11288_s3 + $0x1518] sm:$0xff] }
 0x3d6   :  { %7372 = vmatpush1.bf16.xpose.msra.mxu0 %v7371_v19  ;;  %7034 = vmatprep.subr.bf16.mxu1 %v7033_v34  ;;  %v2077_v19 = vld [vmem:[%s11288_s3 + $0xda8] sm:$0xff]  ;;  %v2175_v34 = vld [vmem:[%s11288_s3 + $0x10b8] sm:$0xff] }
 0x3d7   :  { %7374 = vmatprep.subr.bf16.mxu0 %v7373_v55  ;;  %v2413_v55 = vld [vmem:[%s11288_s3 + $0x1828] sm:$0xff]  ;;  %v7053_v47 = vpack.c.bf16 %v2175_v34, %v2077_v19  ;;  %v2078_v19 = vld [vmem:[%s11288_s3 + $0xdb0] sm:$0xff]  ;;  %v2176_v34 = vld [vmem:[%s11288_s3 + $0x10c0] sm:$0xff] }
 0x3d8   :  { %v7393_v21 = vpack.c.bf16 %v2413_v55, %v2315_v61  ;;  %v2316_v61 = vld [vmem:[%s11288_s3 + $0x1520] sm:$0xff]  ;;  %v2414_v55 = vld [vmem:[%s11288_s3 + $0x1830] sm:$0xff]  ;;  %v7071_v42 = vpack.c.bf16 %v2176_v34, %v2078_v19 }
 0x3d9   :  { %v7411_v59 = vpack.c.bf16 %v2414_v55, %v2316_v61  ;;  %v2320_v34 = vld [vmem:[%s11288_s3 + $0x1540] sm:$0xff]  ;;  %v2418_v61 = vld [vmem:[%s11288_s3 + $0x1850] sm:$0xff]  ;;  %v1735_v55 = vld [vmem:[%s11288_s3 + $0x2f8] sm:$0xff] }
 0x3dd   :  { %7036 = vmatpush1.bf16.xpose.msra.mxu1 %v7035_v25  ;;  %v2273_v25 = vld [vmem:[%s11288_s3 + $0x13c8] sm:$0xff] }
 0x3de   :  { %7376 = vmatpush1.bf16.xpose.msra.mxu0 %v7375_v18  ;;  %7038 = vmatprep.subr.bf16.mxu1 %v7037_v11  ;;  %v2371_v18 = vld [vmem:[%s11288_s3 + $0x16d8] sm:$0xff]  ;;  %v1729_v11 = vld [vmem:[%s11288_s3 + $0x2c8] sm:$0xff] }
 0x3df   :  { %7378 = vmatprep.subr.bf16.mxu0 %v7377_v60  ;;  %v1827_v60 = vld [vmem:[%s11288_s3 + $0x5d8] sm:$0xff]  ;;  %v7057_v32 = vpack.c.bf16 %v2371_v18, %v2273_v25  ;;  %v2830_v25 = vcombine.high %v10945_v53, %v10945_v53  ;;  %v2274_v18 = vld [vmem:[%s11288_s3 + $0x13d0] sm:$0xff] }
 0x3e0   :  { %v7397_v17 = vpack.c.bf16 %v1827_v60, %v1729_v11  ;;  %v2372_v11 = vld [vmem:[%s11288_s3 + $0x16e0] sm:$0xff]  ;;  %v1730_v60 = vld [vmem:[%s11288_s3 + $0x2d0] sm:$0xff] }
 0x3e5   :  { %7040 = vmatpush1.bf16.xpose.msra.mxu1 %v7039_v30  ;;  %v1826_v30 = vld [vmem:[%s11288_s3 + $0x5d0] sm:$0xff] }
 0x3e6   :  { %7380 = vmatpush1.bf16.xpose.msra.mxu0 %v7379_v54  ;;  %7042 = vmatprep.subr.bf16.mxu1 %v7041_v3  ;;  %v1687_v54 = vld [vmem:[%s11288_s3 + $0x178] sm:$0xff]  ;;  %v10964_v3 = vrot.slane %v10945_v53, %v8024_v26  ;;  %v7399_v37 = vpack.c.bf16 %v1826_v30, %v1728_v10  ;;  %v7075_v53 = vpack.c.bf16 %v2372_v11, %v2274_v18  ;;  %v1926_v30 = vld [vmem:[%s11288_s3 + $0x8f0] sm:$0xff] }
 0x3e7   :  { %7382 = vmatprep.subr.bf16.mxu0 %v7381_v38  ;;  %v1785_v38 = vld [vmem:[%s11288_s3 + $0x488] sm:$0xff] }
 0x3e8   :  { %v7061_v13 = vpack.c.bf16 %v1785_v38, %v1687_v54  ;;  %v2845_v57 = vcombine.high %v10964_v3, %v10964_v3  ;;  %v2024_v54 = vld [vmem:[%s11288_s3 + $0xc00] sm:$0xff]  ;;  %v2123_v38 = vld [vmem:[%s11288_s3 + $0xf18] sm:$0xff] }
 0x3e9   :  { %v7419_v16 = vpack.c.bf16 %v2024_v54, %v1926_v30  ;;  %v2421_v30 = vld [vmem:[%s11288_s3 + $0x1868] sm:$0xff] }
 0x3ed   :  { %5975 = vmatmul.mubr.f32.vlgmr.msra.gmra.mrb[12].mxu0 %v10738_v8  ;;  %7044 = vmatpush1.bf16.xpose.msra.mxu1 %v7043_v14  ;;  %v10877_v8 = vrot.slane %v10863_v27, %v8024_v26  ;;  %v1784_v14 = vld [vmem:[%s11288_s3 + $0x480] sm:$0xff]  ;;  %v2121_v27 = vld [vmem:[%s11288_s3 + $0xf08] sm:$0xff] }
 0x3ee   :  { %7384 = vmatpush1.bf16.xpose.msra.mxu0 %v7383_v50  ;;  %6044 = vmatprep.mubr.f32.mxu0 %v2829_v48  ;;  %v1924_v50 = vld [vmem:[%s11288_s3 + $0x8e0] sm:$0xff]  ;;  %v1981_v48 = vld [vmem:[%s11288_s3 + $0xaa8] sm:$0xff]  ;;  %v7063_v2 = vpack.c.bf16 %v1784_v14, %v1686_v0  ;;  %v7405_v22 = vpack.c.bf16 %v2219_v15, %v2121_v27  ;;  %v2318_v0 = vld [vmem:[%s11288_s3 + $0x1530] sm:$0xff] }
 0x3ef   :  { %7046 = vmatprep.subr.bf16.mxu1 %v7045_v45  ;;  %7386 = vmatprep.subr.bf16.mxu0 %v7385_v44  ;;  %v2658_v39 = vcombine.high %v10877_v8, %v10877_v8  ;;  %v10990_v45 = vrot.slane %v2643_v56, %v8024_v26  ;;  %v1883_v44 = vld [vmem:[%s11288_s3 + $0x798] sm:$0xff]  ;;  %v2416_v14 = vld [vmem:[%s11288_s3 + $0x1840] sm:$0xff]  ;;  %v1830_v15 = vld [vmem:[%s11288_s3 + $0x5f0] sm:$0xff] }
 0x3f0   :  { %v7065_v62 = vpack.c.bf16 %v1981_v48, %v1883_v44  ;;  %v1638_v48 = vld [vmem:[#allocation2 + $0xb8] sm:$0xff]  ;;  %v1732_v27 = vld [vmem:[%s11288_s3 + $0x2e0] sm:$0xff] }
 0x3f1   :  { %v2659_v51 = vcombine.high %v10990_v45, %v10990_v45 }
 0x3f4   :  { %4505 = vmatmul.mubr.f32.vlgmr.msra.gmra.mrb[16].mxu1 %v10764_v29  ;;  %v2216_v29 = vld [vmem:[%s11288_s3 + $0x1200] sm:$0xff] }
 0x3f5   :  { %7048 = vmatpush1.bf16.xpose.msra.mxu1 %v7047_v4  ;;  %4574 = vmatprep.mubr.f32.mxu1 %v2658_v39  ;;  %v7391_v40 = vpack.c.bf16 %v2216_v29, %v2118_v35  ;;  %v2120_v4 = vld [vmem:[%s11288_s3 + $0xf00] sm:$0xff]  ;;  %v2317_v39 = vld [vmem:[%s11288_s3 + $0x1528] sm:$0xff] }
 0x3f6   :  { %7388 = vmatpush1.bf16.xpose.msra.mxu0 %v7387_v20  ;;  %7050 = vmatprep.subr.bf16.mxu1 %v7049_v5  ;;  %v2079_v20 = vld [vmem:[%s11288_s3 + $0xdb8] sm:$0xff]  ;;  %v2177_v5 = vld [vmem:[%s11288_s3 + $0x10c8] sm:$0xff] }
 0x3f7   :  { %7390 = vmatprep.subr.bf16.mxu0 %v7389_v6  ;;  %v2415_v6 = vld [vmem:[%s11288_s3 + $0x1838] sm:$0xff]  ;;  %v7069_v35 = vpack.c.bf16 %v2177_v5, %v2079_v20 }
 0x3f8   :  { %v7409_v29 = vpack.c.bf16 %v2415_v6, %v2317_v39  ;;  %v2223_v20 = vld [vmem:[%s11288_s3 + $0x1238] sm:$0xff]  ;;  %v2124_v6 = vld [vmem:[%s11288_s3 + $0xf20] sm:$0xff] }
 0x3fd   :  { %7052 = vmatpush1.bf16.xpose.msra.mxu1 %v7051_v9  ;;  %v2275_v9 = vld [vmem:[%s11288_s3 + $0x13d8] sm:$0xff] }
 0x3fe   :  { %7392 = vmatpush1.bf16.xpose.msra.mxu0 %v7391_v40  ;;  %7054 = vmatprep.subr.bf16.mxu1 %v7053_v47  ;;  %v2373_v40 = vld [vmem:[%s11288_s3 + $0x16e8] sm:$0xff]  ;;  %v1731_v47 = vld [vmem:[%s11288_s3 + $0x2d8] sm:$0xff] }
 0x3ff   :  { %7394 = vmatprep.subr.bf16.mxu0 %v7393_v21  ;;  %v1829_v21 = vld [vmem:[%s11288_s3 + $0x5e8] sm:$0xff]  ;;  %v7073_v24 = vpack.c.bf16 %v2373_v40, %v2275_v9  ;;  %v7443_v40 = vpack.c.bf16 %v2418_v61, %v2320_v34 }
 0x400   :  { %v7413_v31 = vpack.c.bf16 %v1829_v21, %v1731_v47  ;;  %v1833_v9 = vld [vmem:[%s11288_s3 + $0x608] sm:$0xff]  ;;  %v2847_v21 = vcombine.high %v1638_v48, %v1638_v48 }
 0x401   :  { %v7445_v47 = vpack.c.bf16 %v1833_v9, %v1735_v55 }
 0x405   :  { %7056 = vmatpush1.bf16.xpose.msra.mxu1 %v7055_v46  ;;  %v1828_v46 = vld [vmem:[%s11288_s3 + $0x5e0] sm:$0xff] }
 0x406   :  { %7396 = vmatpush1.bf16.xpose.msra.mxu0 %v7395_v52  ;;  %7058 = vmatprep.subr.bf16.mxu1 %v7057_v32  ;;  %v2844_v52 = vrot.slane %v2830_v25, %v8024_v26  ;;  %v1927_v32 = vld [vmem:[%s11288_s3 + $0x8f8] sm:$0xff]  ;;  %v7415_v36 = vpack.c.bf16 %v1828_v46, %v1730_v60  ;;  %v2029_v25 = vld [vmem:[%s11288_s3 + $0xc28] sm:$0xff]  ;;  %v1930_v46 = vld [vmem:[%s11288_s3 + $0x910] sm:$0xff] }
 0x407   :  { %7398 = vmatprep.subr.bf16.mxu0 %v7397_v17  ;;  %v2025_v17 = vld [vmem:[%s11288_s3 + $0xc08] sm:$0xff] }
 0x408   :  { %v7417_v1 = vpack.c.bf16 %v2025_v17, %v1927_v32  ;;  %v2846_v10 = vcombine.high %v2844_v52, %v2844_v52  ;;  %v2225_v32 = vld [vmem:[%s11288_s3 + $0x1248] sm:$0xff] }
 0x40d   :  { %6045 = vmatmul.mubr.f32.vlgmr.msra.gmra.mrb[12].mxu0 %v10850_v23  ;;  %7060 = vmatpush1.bf16.xpose.msra.mxu1 %v7059_v58  ;;  %v2022_v23 = vld [vmem:[%s11288_s3 + $0xbf0] sm:$0xff] }
 0x40e   :  { %7400 = vmatpush1.bf16.xpose.msra.mxu0 %v7399_v37  ;;  %6114 = vmatprep.mubr.f32.mxu0 %v2845_v57  ;;  %v7403_v12 = vpack.c.bf16 %v2022_v23, %v1924_v50  ;;  %v2122_v58 = vld [vmem:[%s11288_s3 + $0xf10] sm:$0xff]  ;;  %v2220_v37 = vld [vmem:[%s11288_s3 + $0x1220] sm:$0xff]  ;;  %v1733_v50 = vld [vmem:[%s11288_s3 + $0x2e8] sm:$0xff]  ;;  %v7427_v23 = vpack.c.bf16 %v2416_v14, %v2318_v0 }
 0x40f   :  { %7062 = vmatprep.subr.bf16.mxu1 %v7061_v13  ;;  %7402 = vmatprep.subr.bf16.mxu0 %v7401_v43  ;;  %v2319_v13 = vld [vmem:[%s11288_s3 + $0x1538] sm:$0xff]  ;;  %v2417_v43 = vld [vmem:[%s11288_s3 + $0x1848] sm:$0xff]  ;;  %v7423_v56 = vpack.c.bf16 %v2220_v37, %v2122_v58  ;;  %v6401_v14 = vld [vmem:[%s11290_s5] sm:$0xff] }
 0x410   :  { %v7425_v57 = vpack.c.bf16 %v2417_v43, %v2319_v13  ;;  %v1835_v58 = vld [vmem:[%s11288_s3 + $0x618] sm:$0xff]  ;;  %v1736_v43 = vld [vmem:[%s11288_s3 + $0x300] sm:$0xff] }
 0x411   :  { %v2031_v0 = vld [vmem:[%s11288_s3 + $0xc38] sm:$0xff] }
 0x414   :  { %4575 = vmatmul.mubr.f32.vlgmr.msra.gmra.mrb[16].mxu1 %v10877_v8  ;;  %v2218_v8 = vld [vmem:[%s11288_s3 + $0x1210] sm:$0xff] }
 0x415   :  { %7064 = vmatpush1.bf16.xpose.msra.mxu1 %v7063_v2  ;;  %4644 = vmatprep.mubr.f32.mxu1 %v2659_v51  ;;  %v7407_v33 = vpack.c.bf16 %v2218_v8, %v2120_v4  ;;  %v2854_v2 = vrot.slane %v1638_v48, %v8024_v26  ;;  %v7431_v51 = vpack.c.bf16 %v1830_v15, %v1732_v27  ;;  %v2026_v4 = vld [vmem:[%s11288_s3 + $0xc10] sm:$0xff]  ;;  %v2125_v8 = vld [vmem:[%s11288_s3 + $0xf28] sm:$0xff] }
 0x416   :  { %7404 = vmatpush1.bf16.xpose.msra.mxu0 %v7403_v12  ;;  %7066 = vmatprep.subr.bf16.mxu1 %v7065_v62  ;;  %v1929_v12 = vld [vmem:[%s11288_s3 + $0x908] sm:$0xff]  ;;  %v2027_v62 = vld [vmem:[%s11288_s3 + $0xc18] sm:$0xff]  ;;  %v7435_v5 = vpack.c.bf16 %v2026_v4, %v1928_v63  ;;  %v7437_v39 = vpack.c.bf16 %v2223_v20, %v2125_v8  ;;  %v2128_v63 = vld [vmem:[%s11288_s3 + $0xf40] sm:$0xff] }
 0x417   :  { %7406 = vmatprep.subr.bf16.mxu0 %v7405_v22  ;;  %v7433_v22 = vpack.c.bf16 %v2027_v62, %v1929_v12  ;;  %v2862_v28 = vcombine.high %v2854_v2, %v2854_v2  ;;  %v2030_v12 = vld [vmem:[%s11288_s3 + $0xc30] sm:$0xff]  ;;  %v2129_v62 = vld [vmem:[%s11288_s3 + $0xf48] sm:$0xff]  ;;  %v2423_v20 = vld [vmem:[%s11288_s3 + $0x1878] sm:$0xff] }
 0x418   :  { %v2226_v4 = vld [vmem:[%s11288_s3 + $0x1250] sm:$0xff]  ;;  %v2325_v8 = vld [vmem:[%s11288_s3 + $0x1568] sm:$0xff] }
 0x41d   :  { %7068 = vmatpush1.bf16.xpose.msra.mxu1 %v7067_v41  ;;  %v2222_v41 = vld [vmem:[%s11288_s3 + $0x1230] sm:$0xff] }
 0x41e   :  { %7408 = vmatpush1.bf16.xpose.msra.mxu0 %v7407_v33  ;;  %7070 = vmatprep.subr.bf16.mxu1 %v7069_v35  ;;  %v2321_v33 = vld [vmem:[%s11288_s3 + $0x1548] sm:$0xff]  ;;  %v2419_v35 = vld [vmem:[%s11288_s3 + $0x1858] sm:$0xff] }
 0x41f   :  { %7410 = vmatprep.subr.bf16.mxu0 %v7409_v29  ;;  %v7439_v29 = vpack.c.bf16 %v2222_v41, %v2124_v6  ;;  %v7441_v19 = vpack.c.bf16 %v2419_v35, %v2321_v33  ;;  %v2324_v6 = vld [vmem:[%s11288_s3 + $0x1560] sm:$0xff]  ;;  %v2422_v41 = vld [vmem:[%s11288_s3 + $0x1870] sm:$0xff] }
 0x420   :  { %v7475_v33 = vpack.c.bf16 %v2422_v41, %v2324_v6 }
 0x425   :  { %7072 = vmatpush1.bf16.xpose.msra.mxu1 %v7071_v42  ;;  %v1734_v42 = vld [vmem:[%s11288_s3 + $0x2f0] sm:$0xff] }
 0x426   :  { %7412 = vmatpush1.bf16.xpose.msra.mxu0 %v7411_v59  ;;  %7074 = vmatprep.subr.bf16.mxu1 %v7073_v24  ;;  %v1832_v59 = vld [vmem:[%s11288_s3 + $0x600] sm:$0xff]  ;;  %v2861_v24 = vrot.slane %v2847_v21, %v8024_v26 }
 0x427   :  { %7414 = vmatprep.subr.bf16.mxu0 %v7413_v31  ;;  %v1931_v31 = vld [vmem:[%s11288_s3 + $0x918] sm:$0xff]  ;;  %v7447_v18 = vpack.c.bf16 %v1832_v59, %v1734_v42  ;;  %v2028_v26 = vld [vmem:[%s11288_s3 + $0xc20] sm:$0xff] }
 0x428   :  { %v7449_v11 = vpack.c.bf16 %v2029_v25, %v1931_v31  ;;  %v2863_v60 = vcombine.high %v2861_v24, %v2861_v24  ;;  %v7451_v17 = vpack.c.bf16 %v2028_v26, %v1930_v46 }
 0x42d   :  { %6115 = vmatmul.mubr.f32.vlgmr.msra.gmra.mrb[12].mxu0 %v10964_v3  ;;  %7076 = vmatpush1.bf16.xpose.msra.mxu1 %v7075_v53  ;;  %v2221_v3 = vld [vmem:[%s11288_s3 + $0x1228] sm:$0xff] }
 0x42e   :  { %7416 = vmatpush1.bf16.xpose.msra.mxu0 %v7415_v36  ;;  %6184 = vmatprep.mubr.f32.mxu0 %v2846_v10  ;;  %v7421_v49 = vpack.c.bf16 %v2221_v3, %v2123_v38  ;;  %v2126_v36 = vld [vmem:[%s11288_s3 + $0xf30] sm:$0xff]  ;;  %v2323_v10 = vld [vmem:[%s11288_s3 + $0x1558] sm:$0xff] }
 0x42f   :  { %7418 = vmatprep.subr.bf16.mxu0 %v7417_v1  ;;  %v2224_v1 = vld [vmem:[%s11288_s3 + $0x1240] sm:$0xff]  ;;  %v7457_v38 = vpack.c.bf16 %v2421_v30, %v2323_v10  ;;  %v2322_v3 = vld [vmem:[%s11288_s3 + $0x1550] sm:$0xff] }
 0x430   :  { %v7455_v54 = vpack.c.bf16 %v2224_v1, %v2126_v36 }
 0x434   :  { %4645 = vmatmul.mubr.f32.vlgmr.msra.gmra.mrb[16].mxu1 %v10990_v45  ;;  %v1831_v45 = vld [vmem:[%s11288_s3 + $0x5f8] sm:$0xff] }
 0x435   :  { %v7429_v44 = vpack.c.bf16 %v1831_v45, %v1733_v50  ;;  %v6402_v50 = vld [vmem:[%s11290_s5 + $0x8] sm:$0x3]  ;;  %v6564_v45 = vld.sshfl [vmem:[#allocation2 + $0xc0] sm:$0x33 pattern:$0x76325410]  ;;  %6610 = vmatprep.mubr.msk.f32.mxu1 %vm7654_vm8, %v7641_v7 }
 0x436   :  { %7420 = vmatpush1.bf16.xpose.msra.mxu0 %v7419_v16  ;;  %v2420_v16 = vld [vmem:[%s11288_s3 + $0x1860] sm:$0xff]  ;;  %v2871_v15 = vcombine.high %v6564_v45, %v6564_v45 }
 0x437   :  { %7422 = vmatprep.subr.bf16.mxu0 %v7421_v49  ;;  %v1737_v49 = vld [vmem:[%s11288_s3 + $0x308] sm:$0xff]  ;;  %v7459_v37 = vpack.c.bf16 %v2420_v16, %v2322_v3 }
 0x438   :  { %v7461_v13 = vpack.c.bf16 %v1835_v58, %v1737_v49 }
 0x43e   :  { %7424 = vmatpush1.bf16.xpose.msra.mxu0 %v7423_v56  ;;  %v1834_v56 = vld [vmem:[%s11288_s3 + $0x610] sm:$0xff] }
 0x43f   :  { %7426 = vmatprep.subr.bf16.mxu0 %v7425_v57  ;;  %v1933_v57 = vld [vmem:[%s11288_s3 + $0x928] sm:$0xff]  ;;  %v7463_v48 = vpack.c.bf16 %v1834_v56, %v1736_v43 }
 0x440   :  { %v7465_v27 = vpack.c.bf16 %v2031_v0, %v1933_v57 }
 0x446   :  { %7428 = vmatpush1.bf16.xpose.msra.mxu0 %v7427_v23  ;;  %v7653_v23 = vmov 0.0|0.0  }
 0x447   :  { %7430 = vmatprep.subr.bf16.mxu0 %v7429_v44  ;;  %7477 = vmatprep.subr.bf16.mxu1 %v7653_v23  ;;  %v7478_v44 = vpack.c.bf16 %v6402_v50, %v6401_v14 }
 0x449   :  { %7480 = vmatpush3.bf16.xpose.msk.msra.mxu1 %vm7479_vm7, %v7478_v44 }
 0x44d   :  { %6185 = vmatmul.mubr.f32.vlgmr.msra.gmra.mrb[12].mxu0 %v2844_v52  ;;  %v2127_v52 = vld [vmem:[%s11288_s3 + $0xf38] sm:$0xff] }
 0x44e   :  { %7432 = vmatpush1.bf16.xpose.msra.mxu0 %v7431_v51  ;;  %6254 = vmatprep.mubr.f32.mxu0 %v2862_v28  ;;  %v7453_v53 = vpack.c.bf16 %v2225_v32, %v2127_v52  ;;  %v2227_v51 = vld [vmem:[%s11288_s3 + $0x1258] sm:$0xff] }
 0x44f   :  { %7434 = vmatprep.subr.bf16.mxu0 %v7433_v22  ;;  %v7469_v28 = vpack.c.bf16 %v2227_v51, %v2129_v62 }
 0x456   :  { %7436 = vmatpush1.bf16.xpose.msra.mxu0 %v7435_v5  ;;  %v7471_v5 = vpack.c.bf16 %v2226_v4, %v2128_v63 }
 0x457   :  { %7438 = vmatprep.subr.bf16.mxu0 %v7437_v39  ;;  %v7473_v39 = vpack.c.bf16 %v2423_v20, %v2325_v8 }
 0x45e   :  { %7440 = vmatpush1.bf16.xpose.msra.mxu0 %v7439_v29 }
 0x45f   :  { %7442 = vmatprep.subr.bf16.mxu0 %v7441_v19  ;;  %v6563_v19 = vld [vmem:[%s11289_s4] ss:$0 sm:$0xff]  ;;  %s7617_s4 = scalar_lea.vmem %s6498_s17, 32 }
 0x460   :  { %p7618_p0 = scmp.ne.s32.totalorder %s6498_s17, %s7617_s4  ;;  %p7623_p2 = scmp.lt.s32.totalorder %s7617_s4, %s7617_s4 }
 0x462   :  { %p7624_p3 = por %p7623_p2, %p7622_p1 }
 0x464   :  { %p7625_p4 = pnand %p7624_p3, %p7618_p0 }
 0x466   :  { %7444 = vmatpush1.bf16.xpose.msra.mxu0 %v7443_v40 }
 0x467   :  { %7446 = vmatprep.subr.bf16.mxu0 %v7445_v47  ;;  %v6565_v47 = vld [vmem:[%s11291_s6] ss:$0 sm:$0xff] }
 0x46d   :  { %6255 = vmatmul.mubr.f32.vlgmr.msra.gmra.mrb[12].mxu0 %v2854_v2  ;;  %v1932_v2 = vld [vmem:[%s11288_s3 + $0x920] sm:$0xff] }
 0x46e   :  { %7448 = vmatpush1.bf16.xpose.msra.mxu0 %v7447_v18  ;;  %6324 = vmatprep.mubr.f32.mxu0 %v2863_v60  ;;  %v7467_v22 = vpack.c.bf16 %v2030_v12, %v1932_v2 }
 0x46f   :  { %7450 = vmatprep.subr.bf16.mxu0 %v7449_v11 }
 0x476   :  { %7452 = vmatpush1.bf16.xpose.msra.mxu0 %v7451_v17 }
 0x477   :  { %7454 = vmatprep.subr.bf16.mxu0 %v7453_v53 }
 0x47e   :  { %7456 = vmatpush1.bf16.xpose.msra.mxu0 %v7455_v54 }
 0x47f   :  { %7458 = vmatprep.subr.bf16.mxu0 %v7457_v38 }
 0x486   :  { %7460 = vmatpush1.bf16.xpose.msra.mxu0 %v7459_v37 }
 0x487   :  { %7462 = vmatprep.subr.bf16.mxu0 %v7461_v13 }
 0x48d   :  { %6325 = vmatmul.mubr.f32.vlgmr.msra.gmra.mrb[12].mxu0 %v2861_v24 }
 0x48e   :  { %7464 = vmatpush1.bf16.xpose.msra.mxu0 %v7463_v48  ;;  %6394 = vmatprep.mubr.f32.mxu0 %v2871_v15 }
 0x48f   :  { %7466 = vmatprep.subr.bf16.mxu0 %v7465_v27 }
 0x496   :  { %7468 = vmatpush1.bf16.xpose.msra.mxu0 %v7467_v22 }
 0x497   :  { %7470 = vmatprep.subr.bf16.mxu0 %v7469_v28 }
 0x49e   :  { %7472 = vmatpush1.bf16.xpose.msra.mxu0 %v7471_v5 }
 0x49f   :  { %7474 = vmatprep.subr.bf16.mxu0 %v7473_v39 }
 0x4a6   :  { %7476 = vmatpush1.bf16.xpose.msra.mxu0 %v7475_v33 }
 0x4ad   :  { %6395 = vmatmul.mubr.f32.vlgmr.msra.gmra.mrb[12].mxu0 %v6564_v45 }
 0x507   :  { %v4646_v35 = vpop.f32.mrb[16].mxu1 }
 0x508   :  { %v4648_v29 = vpop.f32.mrb[17].mxu1  ;;  %v7481_v34 = vadd.f32 %v6563_v19, %v4646_v35 }
 0x580   :  { %v6396_v61 = vpop.f32.mrb[12].mxu0 }
 0x581   :  { %v7482_v55 = vadd.f32 %v7481_v34, %v6396_v61  ;;  %v6398_v9 = vpop.f32.mrb[13].mxu0 }
 0x583   :  { %v6400_v40 = vmax.f32 %v7482_v55, 0.0 }
 0x585   :  { %6611 = vmatmul.mubr.msk.f32.vlgmr.msra.gmra.mrb[18].mxu1 %vm583_vm3, %v6400_v40 }
 0x658   :  { %v6485_v7 = vpop.f32.mrb[18].mxu1 }
 0x659   :  { %v6486_v21 = vadd.f32 %v6565_v47, %v6485_v7  ;;  %v6612_v42 = vpop.f32.mrb[19].mxu1 }
 0x65b   :  { %6490 = vst.msk [vmem:[#allocation3] sm:$0x3] %vm6489_vm11, %v6486_v21 }
 0x65c   :  { %7628 = shalt.err (!%p7625_p4)
}
 0x65d   :  { %s7629_s18 = scalar_lea.hbm %s11292_s7, 32 }
 0x65e   :  { %p7630_p5 = scmp.ne.s32.totalorder %s11292_s7, %s7629_s18  ;;  %p7633_p6 = scmp.lt.u32.totalorder %s7629_s18, %s11292_s7 }
 0x660   :  { %p7635_p7 = pnand %p7633_p6, %p7630_p5 }
 0x662   :  { %7638 = shalt.err (!%p7635_p7)
}
 0x663   :  { %6500 = dma.vmem_to_hbm [thread:$0]  %s6498_s17, 32, %s11292_s7, [#allocation4]  }
 0x664   :  { %7639 = dma.done.wait [#allocation4], 32  }
 0x665   :  { %7640 = vsyncadd [#allocation4], 4294967264 }
 0x666   :  { %6504 = vsyncpa [#allocation4], 1 }

</bundles_post_ra>
